<compile_context>
chip_gen: v7x
topology: tpu7x:2x2x1
jax: 0.10.0
libtpu: 0.0.40
codegen_flags: <defaults>
</compile_context>

<pallas_src>
import jax
import jax.numpy as jnp
from jax.experimental import pallas as pl
from jax.experimental.pallas import tpu as pltpu

C1, C2, C3, F1, F2 = 64, 128, 1024, 512, 256   # channel sizes fixed by the module
OUT_PAD = 128                                   # lane-dense output width (>= K*K)
BN_EPS = 1e-5


# -----------------------------------------------------------------------------
# Kernel
# -----------------------------------------------------------------------------
def transform_net_kernel(
    x_ref,                      # [1, C_in, Kn, TILE_N]  f32 (streamed per grid step)
    w1t_ref, c1_ref,            # [C1, C_in] f32, [C1, 1] f32   (conv1, BN folded)
    w2t_ref, c2_ref,            # [C2, C1] bf16, [C2, 1] f32    (conv2, BN folded)
    w3_ref,  c3_ref,            # [C2, C3] bf16, [1, C3] f32    (conv3, BN folded)
    wf1_ref, cf1_ref,           # [C3, F1] bf16, [1, F1] f32    (fc1, BN folded)
    wf2_ref, cf2_ref,           # [F1, F2] bf16, [1, F2] f32    (fc2, BN folded)
    wf3_ref, cf3_ref,           # [F2, OUT_PAD] bf16, [1, OUT_PAD] f32 (fc3 + identity)
    o_ref,                      # [1, 1, OUT_PAD] f32
    gmax_ref,                   # VMEM scratch [1, C3] f32 (global max over N, per batch)
):
    nt = pl.program_id(1)

    @pl.when(nt == 0)
    def _init():
        gmax_ref[...] = jnp.full(gmax_ref.shape, -jnp.inf, gmax_ref.dtype)

    x = x_ref[0]                          # [C_in, Kn, TILE_N]  (static shapes)
    c_in, kn_dim, _ = x.shape
    w1t = w1t_ref[...]                    # [C1, C_in]
    c1 = c1_ref[...]                      # [C1, 1]
    w2t = w2t_ref[...]                    # [C2, C1] bf16
    c2 = c2_ref[...]                      # [C2, 1]

    def conv1_conv2(kn):
        # conv1: C_in broadcast multiply-adds on the VPU (feature-major).
        xk = x[:, kn, :]                                  # [C_in, TILE_N]
        h1 = w1t[:, 0:1] * xk[0:1, :]
        for c in range(1, c_in):
            h1 = h1 + w1t[:, c:c + 1] * xk[c:c + 1, :]
        h1 = jnp.maximum(h1 + c1, 0.0)                    # [C1, TILE_N]
        # conv2: MXU matmul, bf16 operands, f32 accumulation.
        z = jnp.dot(w2t, h1.astype(jnp.bfloat16),
                    preferred_element_type=jnp.float32)   # [C2, TILE_N]
        return jnp.maximum(z + c2, 0.0)

    # torch.max(x, dim=-1): running elementwise max over the neighbour axis Kn
    # (keeps the live h2 buffer at [C2, TILE_N] instead of [C2, Kn*TILE_N]).
    m = conv1_conv2(0)
    for kn in range(1, kn_dim):
        m = jnp.maximum(m, conv1_conv2(kn))               # [C2, TILE_N]

    # conv3 (row-major so the N-max lands lane-dense in [1, C3]).
    mt = m.T.astype(jnp.bfloat16)                         # [TILE_N, C2]
    h3 = jnp.dot(mt, w3_ref[...], preferred_element_type=jnp.float32) + c3_ref[...]
    h3 = jnp.maximum(h3, 0.0)                             # [TILE_N, C3]

    # TODO(synk): nn.MaxPool2d(kernel_size=(1024, 1)) hard-codes N==1024 in the
    # PyTorch module; implemented here as the intended global max over the point
    # axis N (accumulated across N tiles).
    gmax_ref[...] = jnp.maximum(gmax_ref[...],
                                jnp.max(h3, axis=0, keepdims=True))

    # fc epilogue: tiny (M=1) matmuls, run once per batch on the last N tile.
    @pl.when(nt == pl.num_programs(1) - 1)
    def _epilogue():
        g = gmax_ref[...].astype(jnp.bfloat16)            # [1, C3]
        f1 = jnp.dot(g, wf1_ref[...], preferred_element_type=jnp.float32) + cf1_ref[...]
        f1 = jnp.maximum(f1, 0.0).astype(jnp.bfloat16)    # [1, F1]
        f2 = jnp.dot(f1, wf2_ref[...], preferred_element_type=jnp.float32) + cf2_ref[...]
        f2 = jnp.maximum(f2, 0.0).astype(jnp.bfloat16)    # [1, F2]
        out = jnp.dot(f2, wf3_ref[...], preferred_element_type=jnp.float32) + cf3_ref[...]
        o_ref[...] = out.reshape(o_ref.shape)             # [1, 1, OUT_PAD]


# -----------------------------------------------------------------------------
# Wrapper
# -----------------------------------------------------------------------------
def _vmem_limit_bytes(c_in, kn, tile_n, params):
    x_tile = 2 * c_in * kn * tile_n * 4                               # double-buffered input tile
    weights = 2 * sum(int(p.size) * p.dtype.itemsize for p in params)  # resident (2 bufs worst case)
    acts = tile_n * (C1 + 3 * C2 + C3) * 4                            # live f32 activations
    misc = C3 * 4 + 2 * OUT_PAD * 4 + (1 << 20)
    est = x_tile + weights + acts + misc
    # Headroom, clamped to 64 MiB so it is valid on v7x as well as v5e/v6e.
    return int(min(64 * 2 ** 20, max(16 * 2 ** 20, 2 * est)))


def transform_net_forward(x_nchw, kernel_params, K=3, tile_n=128):
    """x_nchw: [B, C_in, N, Kn] float32 (PyTorch NCHW). Returns [B, K, K] float32.

    tile_n: points per grid step (multiple of 128, or == N).
    v7x has only 64 MiB VMEM — keep tile_n <= ~512 there; v5e/v6e tolerate larger.
    """
    B, C_in, N, Kn = x_nchw.shape
    KK = K * K
    assert KK <= OUT_PAD
    if N % tile_n != 0:
        raise ValueError("N must be divisible by tile_n")
    if tile_n % 128 != 0 and tile_n != N:
        raise ValueError("tile_n must be a multiple of 128 (or equal to N)")

    # NCHW -> feature-major [B, C_in, Kn, N]: neighbours on sublanes, points on lanes.
    x_arr = jnp.transpose(x_nchw, (0, 1, 3, 2))

    grid = (B, N // tile_n)
    x_spec = pl.BlockSpec((1, C_in, Kn, tile_n), lambda b, nt: (b, 0, 0, nt))
    # Weights / shifts: full-array blocks, constant index_map -> fetched once, VMEM resident.
    w_specs = [pl.BlockSpec(p.shape, lambda b, nt: (0, 0)) for p in kernel_params]
    out_spec = pl.BlockSpec((1, 1, OUT_PAD), lambda b, nt: (b, 0, 0))

    grid_spec = pltpu.PrefetchScalarGridSpec(
        num_scalar_prefetch=0,
        grid=grid,
        in_specs=[x_spec] + w_specs,
        out_specs=out_spec,
        scratch_shapes=[pltpu.VMEM((1, C3), jnp.float32)],
    )

    out = pl.pallas_call(
        transform_net_kernel,
        out_shape=jax.ShapeDtypeStruct((B, 1, OUT_PAD), jnp.float32),
        grid_spec=grid_spec,
        compiler_params=pltpu.CompilerParams(
            dimension_semantics=("parallel", "arbitrary"),
            vmem_limit_bytes=_vmem_limit_bytes(C_in, Kn, tile_n, kernel_params),
        ),
    )(x_arr, *kernel_params)

    return out.reshape(B, OUT_PAD)[:, :KK].reshape(B, K, K)


# -----------------------------------------------------------------------------
# Parameter construction (PyTorch-like init, eval-mode BN folded into weights)
# -----------------------------------------------------------------------------
def _layer_params(key, c_in, c_out, with_bn=True):
    kw, kb, kg, kbe, km, kv = jax.random.split(key, 6)
    lim = 1.0 / (c_in ** 0.5)
    w = jax.random.uniform(kw, (c_in, c_out), jnp.float32, -lim, lim)
    b = jax.random.uniform(kb, (1, c_out), jnp.float32, -lim, lim)
    if not with_bn:
        return w, b
    gamma = jax.random.uniform(kg, (1, c_out), jnp.float32, 0.5, 1.5)
    beta = jax.random.uniform(kbe, (1, c_out), jnp.float32, -0.1, 0.1)
    mean = jax.random.uniform(km, (1, c_out), jnp.float32, -0.1, 0.1)
    var = jax.random.uniform(kv, (1, c_out), jnp.float32, 0.5, 1.5)
    s = gamma / jnp.sqrt(var + BN_EPS)          # eval-mode BN (running stats)
    t = beta - mean * s
    return w * s, b * s + t                      # folded: w' = w*s, shift' = b*s + t


def build_transform_net_params(key, C_in, K):
    k1, k2, k3, k4, k5, k6 = jax.random.split(key, 6)
    w1, c1 = _layer_params(k1, C_in, C1)
    w2, c2 = _layer_params(k2, C1, C2)
    w3, c3 = _layer_params(k3, C2, C3)
    wf1, cf1 = _layer_params(k4, C3, F1)
    wf2, cf2 = _layer_params(k5, F1, F2)
    wf3, bf3 = _layer_params(k6, F2, K * K, with_bn=False)

    KK = K * K
    wf3p = jnp.zeros((F2, OUT_PAD), jnp.float32).at[:, :KK].set(wf3)
    cf3 = jnp.zeros((1, OUT_PAD), jnp.float32).at[:, :KK].set(
        bf3 + jnp.eye(K, dtype=jnp.float32).reshape(1, KK))

    # Kernel layouts: conv1/conv2 feature-major (transposed), the rest row-major.
    return (
        w1.T, c1.T,        # [C1, C_in], [C1, 1]
        w2.T, c2.T,        # [C2, C1],  [C2, 1]
        w3, c3,            # [C2, C3],  [1, C3]
        wf1, cf1,          # [C3, F1],  [1, F1]
        wf2, cf2,          # [F1, F2],  [1, F2]
        wf3p, cf3,         # [F2, OUT_PAD], [1, OUT_PAD] (bias + flattened identity)
    )


def cast_params_for_kernel(folded_f32):
    """bf16 operands for the MXU matmuls; shifts + the tiny conv1 weight stay f32."""
    (w1t, c1, w2t, c2, w3, c3, wf1, cf1, wf2, cf2, wf3p, cf3) = folded_f32
    bf = jnp.bfloat16
    return (w1t, c1,
            w2t.astype(bf), c2,
            w3.astype(bf), c3,
            wf1.astype(bf), cf1,
            wf2.astype(bf), cf2,
            wf3p.astype(bf), cf3)


# -----------------------------------------------------------------------------
# Pure-JAX f32 reference (same folded params) for a sanity check
# -----------------------------------------------------------------------------
def transform_net_reference(x_nchw, folded_f32, K=3):
    (w1t, c1, w2t, c2, w3, c3, wf1, cf1, wf2, cf2, wf3p, cf3) = folded_f32
    B, C_in, N, Kn = x_nchw.shape
    rows = jnp.transpose(x_nchw, (0, 2, 3, 1)).reshape(B * N * Kn, C_in)
    h1 = jnp.maximum(rows @ w1t.T + c1.T, 0.0)
    h2 = jnp.maximum(h1 @ w2t.T + c2.T, 0.0)
    h2 = jnp.max(h2.reshape(B, N, Kn, C2), axis=2)
    h3 = jnp.maximum(h2 @ w3 + c3, 0.0)
    g = jnp.max(h3, axis=1)
    f1 = jnp.maximum(g @ wf1 + cf1, 0.0)
    f2 = jnp.maximum(f1 @ wf2 + cf2, 0.0)
    out = f2 @ wf3p + cf3
    return out[:, :K * K].reshape(B, K, K)


if __name__ == "__main__":
    B, C_in, N, Kn, K = 2, 3, 256, 8, 3
    TILE_N = 128   # multiple of 128; 2 tiles over N exercises the running-max pipeline

    root = jax.random.PRNGKey(0)
    kx, kp = jax.random.split(root)
    x = jax.random.normal(kx, (B, C_in, N, Kn), jnp.float32)

    folded_f32 = build_transform_net_params(kp, C_in, K)
    kernel_params = cast_params_for_kernel(folded_f32)

    out = transform_net_forward(x, kernel_params, K=K, tile_n=TILE_N)
    jax.block_until_ready(out)
    assert out.shape == (B, K, K) and out.dtype == jnp.float32

    ref = transform_net_reference(x, folded_f32, K=K)
    rel_err = float(jnp.max(jnp.abs(out - ref)) / (jnp.max(jnp.abs(ref)) + 1e-6))
    assert rel_err < 5e-2, f"mismatch vs f32 reference: rel_err={rel_err}"

    print("KERNEL_OK")
</pallas_src>

<mosaic_0001>
module attributes {stable_mosaic.version = 11 : i64} {
  func.func @transform_net_kernel(%arg0: i32, %arg1: i32, %arg2: memref<1x3x8x128xf32, #tpu.memory_space<vmem>>, %arg3: memref<64x3xf32, #tpu.memory_space<vmem>>, %arg4: memref<64x1xf32, #tpu.memory_space<vmem>>, %arg5: memref<128x64xbf16, #tpu.memory_space<vmem>>, %arg6: memref<128x1xf32, #tpu.memory_space<vmem>>, %arg7: memref<128x1024xbf16, #tpu.memory_space<vmem>>, %arg8: memref<1x1024xf32, #tpu.memory_space<vmem>>, %arg9: memref<1024x512xbf16, #tpu.memory_space<vmem>>, %arg10: memref<1x512xf32, #tpu.memory_space<vmem>>, %arg11: memref<512x256xbf16, #tpu.memory_space<vmem>>, %arg12: memref<1x256xf32, #tpu.memory_space<vmem>>, %arg13: memref<256x128xbf16, #tpu.memory_space<vmem>>, %arg14: memref<1x128xf32, #tpu.memory_space<vmem>>, %arg15: memref<1x1x128xf32, #tpu.memory_space<vmem>>, %arg16: memref<1x1024xf32, #tpu.memory_space<vmem>>) attributes {dimension_semantics = [#tpu.dimension_semantics<parallel>, #tpu.dimension_semantics<arbitrary>], iteration_bounds = array<i64: 2, 2>, scalar_prefetch = 0 : i64, scratch_operands = 1 : i64, tpu.core_type = #tpu.core_type<tc>, window_params = [{transform_indices = @transform_0, window_bounds = array<i64: 1, 3, 8, 128>}, {pipeline_mode = #tpu.pipeline_mode<synchronous>, transform_indices = @transform_1, window_bounds = array<i64: 64, 3>}, {pipeline_mode = #tpu.pipeline_mode<synchronous>, transform_indices = @transform_2, window_bounds = array<i64: 64, 1>}, {pipeline_mode = #tpu.pipeline_mode<synchronous>, transform_indices = @transform_3, window_bounds = array<i64: 128, 64>}, {pipeline_mode = #tpu.pipeline_mode<synchronous>, transform_indices = @transform_4, window_bounds = array<i64: 128, 1>}, {pipeline_mode = #tpu.pipeline_mode<synchronous>, transform_indices = @transform_5, window_bounds = array<i64: 128, 1024>}, {pipeline_mode = #tpu.pipeline_mode<synchronous>, transform_indices = @transform_6, window_bounds = array<i64: 1, 1024>}, {pipeline_mode = #tpu.pipeline_mode<synchronous>, transform_indices = @transform_7, window_bounds = array<i64: 1024, 512>}, {pipeline_mode = #tpu.pipeline_mode<synchronous>, transform_indices = @transform_8, window_bounds = array<i64: 1, 512>}, {pipeline_mode = #tpu.pipeline_mode<synchronous>, transform_indices = @transform_9, window_bounds = array<i64: 512, 256>}, {pipeline_mode = #tpu.pipeline_mode<synchronous>, transform_indices = @transform_10, window_bounds = array<i64: 1, 256>}, {pipeline_mode = #tpu.pipeline_mode<synchronous>, transform_indices = @transform_11, window_bounds = array<i64: 256, 128>}, {pipeline_mode = #tpu.pipeline_mode<synchronous>, transform_indices = @transform_12, window_bounds = array<i64: 1, 128>}, {transform_indices = @transform_13, window_bounds = array<i64: 1, 1, 128>}]} {
    %c0_i32 = arith.constant 0 : i32
    %0 = arith.cmpi eq, %arg1, %c0_i32 : i32
    %1 = arith.extui %0 : i1 to i32
    %c0_i32_0 = arith.constant 0 : i32
    %2 = arith.cmpi ne, %1, %c0_i32_0 : i32
    scf.if %2 {
      %cst_47 = arith.constant 0xFF800000 : f32
      %265 = vector.broadcast %cst_47 : f32 to vector<1x1024xf32>
      %c0_48 = arith.constant 0 : index
      %c0_49 = arith.constant 0 : index
      %266 = vector.load %arg16[%c0_48, %c0_49] : memref<1x1024xf32, #tpu.memory_space<vmem>>, vector<1x1024xf32>
      tpu.vector_store %arg16[%c0_48, %c0_49], %265 {strides = array<i32>} : memref<1x1024xf32, #tpu.memory_space<vmem>>, vector<1x1024xf32>,
    } else {
    }
    %c0 = arith.constant 0 : index
    %c0_1 = arith.constant 0 : index
    %c0_2 = arith.constant 0 : index
    %c0_3 = arith.constant 0 : index
    %3 = vector.load %arg2[%c0, %c0_1, %c0_2, %c0_3] : memref<1x3x8x128xf32, #tpu.memory_space<vmem>>, vector<1x3x8x128xf32>
    %4 = vector.shape_cast %3 : vector<1x3x8x128xf32> to vector<3x8x128xf32>
    %c0_4 = arith.constant 0 : index
    %c0_5 = arith.constant 0 : index
    %5 = vector.load %arg3[%c0_4, %c0_5] : memref<64x3xf32, #tpu.memory_space<vmem>>, vector<64x3xf32>
    %c0_6 = arith.constant 0 : index
    %c0_7 = arith.constant 0 : index
    %6 = vector.load %arg4[%c0_6, %c0_7] : memref<64x1xf32, #tpu.memory_space<vmem>>, vector<64x1xf32>
    %c0_8 = arith.constant 0 : index
    %c0_9 = arith.constant 0 : index
    %7 = vector.load %arg5[%c0_8, %c0_9] : memref<128x64xbf16, #tpu.memory_space<vmem>>, vector<128x64xbf16>
    %c0_10 = arith.constant 0 : index
    %c0_11 = arith.constant 0 : index
    %8 = vector.load %arg6[%c0_10, %c0_11] : memref<128x1xf32, #tpu.memory_space<vmem>>, vector<128x1xf32>
    %9 = vector.extract_strided_slice %4 {offsets = [0, 0, 0], sizes = [3, 1, 128], strides = [1, 1, 1]} : vector<3x8x128xf32> to vector<3x1x128xf32>
    %10 = vector.shape_cast %9 : vector<3x1x128xf32> to vector<3x128xf32>
    %11 = vector.extract_strided_slice %5 {offsets = [0, 0], sizes = [64, 1], strides = [1, 1]} : vector<64x3xf32> to vector<64x1xf32>
    %12 = vector.extract_strided_slice %10 {offsets = [0, 0], sizes = [1, 128], strides = [1, 1]} : vector<3x128xf32> to vector<1x128xf32>
    %13 = vector.broadcast %11 : vector<64x1xf32> to vector<64x128xf32>
    %14 = vector.broadcast %12 : vector<1x128xf32> to vector<64x128xf32>
    %15 = arith.mulf %13, %14 : vector<64x128xf32>
    %16 = vector.extract_strided_slice %5 {offsets = [0, 1], sizes = [64, 1], strides = [1, 1]} : vector<64x3xf32> to vector<64x1xf32>
    %17 = vector.extract_strided_slice %10 {offsets = [1, 0], sizes = [1, 128], strides = [1, 1]} : vector<3x128xf32> to vector<1x128xf32>
    %18 = vector.broadcast %16 : vector<64x1xf32> to vector<64x128xf32>
    %19 = vector.broadcast %17 : vector<1x128xf32> to vector<64x128xf32>
    %20 = arith.mulf %18, %19 : vector<64x128xf32>
    %21 = arith.addf %15, %20 : vector<64x128xf32>
    %22 = vector.extract_strided_slice %5 {offsets = [0, 2], sizes = [64, 1], strides = [1, 1]} : vector<64x3xf32> to vector<64x1xf32>
    %23 = vector.extract_strided_slice %10 {offsets = [2, 0], sizes = [1, 128], strides = [1, 1]} : vector<3x128xf32> to vector<1x128xf32>
    %24 = vector.broadcast %22 : vector<64x1xf32> to vector<64x128xf32>
    %25 = vector.broadcast %23 : vector<1x128xf32> to vector<64x128xf32>
    %26 = arith.mulf %24, %25 : vector<64x128xf32>
    %27 = arith.addf %21, %26 : vector<64x128xf32>
    %28 = vector.broadcast %6 : vector<64x1xf32> to vector<64x128xf32>
    %29 = arith.addf %27, %28 : vector<64x128xf32>
    %cst = arith.constant 0.000000e+00 : f32
    %30 = vector.broadcast %cst : f32 to vector<64x128xf32>
    %31 = arith.maximumf %29, %30 : vector<64x128xf32>
    %32 = arith.truncf %31 : vector<64x128xf32> to vector<64x128xbf16>
    %cst_12 = arith.constant dense<0.000000e+00> : vector<128x128xf32>
    %33 = tpu.matmul %7, %32, %cst_12 {dimension_numbers = #tpu.dot_dimension_numbers<[1], [0], [0], [1], [0, 0, 1, 1], [], []>} : vector<128x64xbf16>, vector<64x128xbf16>, vector<128x128xf32> -> vector<128x128xf32>
    %34 = vector.broadcast %8 : vector<128x1xf32> to vector<128x128xf32>
    %35 = arith.addf %33, %34 : vector<128x128xf32>
    %cst_13 = arith.constant 0.000000e+00 : f32
    %36 = vector.broadcast %cst_13 : f32 to vector<128x128xf32>
    %37 = arith.maximumf %35, %36 : vector<128x128xf32>
    %38 = vector.extract_strided_slice %4 {offsets = [0, 1, 0], sizes = [3, 1, 128], strides = [1, 1, 1]} : vector<3x8x128xf32> to vector<3x1x128xf32>
    %39 = vector.shape_cast %38 : vector<3x1x128xf32> to vector<3x128xf32>
    %40 = vector.extract_strided_slice %5 {offsets = [0, 0], sizes = [64, 1], strides = [1, 1]} : vector<64x3xf32> to vector<64x1xf32>
    %41 = vector.extract_strided_slice %39 {offsets = [0, 0], sizes = [1, 128], strides = [1, 1]} : vector<3x128xf32> to vector<1x128xf32>
    %42 = vector.broadcast %40 : vector<64x1xf32> to vector<64x128xf32>
    %43 = vector.broadcast %41 : vector<1x128xf32> to vector<64x128xf32>
    %44 = arith.mulf %42, %43 : vector<64x128xf32>
    %45 = vector.extract_strided_slice %5 {offsets = [0, 1], sizes = [64, 1], strides = [1, 1]} : vector<64x3xf32> to vector<64x1xf32>
    %46 = vector.extract_strided_slice %39 {offsets = [1, 0], sizes = [1, 128], strides = [1, 1]} : vector<3x128xf32> to vector<1x128xf32>
    %47 = vector.broadcast %45 : vector<64x1xf32> to vector<64x128xf32>
    %48 = vector.broadcast %46 : vector<1x128xf32> to vector<64x128xf32>
    %49 = arith.mulf %47, %48 : vector<64x128xf32>
    %50 = arith.addf %44, %49 : vector<64x128xf32>
    %51 = vector.extract_strided_slice %5 {offsets = [0, 2], sizes = [64, 1], strides = [1, 1]} : vector<64x3xf32> to vector<64x1xf32>
    %52 = vector.extract_strided_slice %39 {offsets = [2, 0], sizes = [1, 128], strides = [1, 1]} : vector<3x128xf32> to vector<1x128xf32>
    %53 = vector.broadcast %51 : vector<64x1xf32> to vector<64x128xf32>
    %54 = vector.broadcast %52 : vector<1x128xf32> to vector<64x128xf32>
    %55 = arith.mulf %53, %54 : vector<64x128xf32>
    %56 = arith.addf %50, %55 : vector<64x128xf32>
    %57 = vector.broadcast %6 : vector<64x1xf32> to vector<64x128xf32>
    %58 = arith.addf %56, %57 : vector<64x128xf32>
    %cst_14 = arith.constant 0.000000e+00 : f32
    %59 = vector.broadcast %cst_14 : f32 to vector<64x128xf32>
    %60 = arith.maximumf %58, %59 : vector<64x128xf32>
    %61 = arith.truncf %60 : vector<64x128xf32> to vector<64x128xbf16>
    %cst_15 = arith.constant dense<0.000000e+00> : vector<128x128xf32>
    %62 = tpu.matmul %7, %61, %cst_15 {dimension_numbers = #tpu.dot_dimension_numbers<[1], [0], [0], [1], [0, 0, 1, 1], [], []>} : vector<128x64xbf16>, vector<64x128xbf16>, vector<128x128xf32> -> vector<128x128xf32>
    %63 = vector.broadcast %8 : vector<128x1xf32> to vector<128x128xf32>
    %64 = arith.addf %62, %63 : vector<128x128xf32>
    %cst_16 = arith.constant 0.000000e+00 : f32
    %65 = vector.broadcast %cst_16 : f32 to vector<128x128xf32>
    %66 = arith.maximumf %64, %65 : vector<128x128xf32>
    %67 = arith.maximumf %37, %66 : vector<128x128xf32>
    %68 = vector.extract_strided_slice %4 {offsets = [0, 2, 0], sizes = [3, 1, 128], strides = [1, 1, 1]} : vector<3x8x128xf32> to vector<3x1x128xf32>
    %69 = vector.shape_cast %68 : vector<3x1x128xf32> to vector<3x128xf32>
    %70 = vector.extract_strided_slice %5 {offsets = [0, 0], sizes = [64, 1], strides = [1, 1]} : vector<64x3xf32> to vector<64x1xf32>
    %71 = vector.extract_strided_slice %69 {offsets = [0, 0], sizes = [1, 128], strides = [1, 1]} : vector<3x128xf32> to vector<1x128xf32>
    %72 = vector.broadcast %70 : vector<64x1xf32> to vector<64x128xf32>
    %73 = vector.broadcast %71 : vector<1x128xf32> to vector<64x128xf32>
    %74 = arith.mulf %72, %73 : vector<64x128xf32>
    %75 = vector.extract_strided_slice %5 {offsets = [0, 1], sizes = [64, 1], strides = [1, 1]} : vector<64x3xf32> to vector<64x1xf32>
    %76 = vector.extract_strided_slice %69 {offsets = [1, 0], sizes = [1, 128], strides = [1, 1]} : vector<3x128xf32> to vector<1x128xf32>
    %77 = vector.broadcast %75 : vector<64x1xf32> to vector<64x128xf32>
    %78 = vector.broadcast %76 : vector<1x128xf32> to vector<64x128xf32>
    %79 = arith.mulf %77, %78 : vector<64x128xf32>
    %80 = arith.addf %74, %79 : vector<64x128xf32>
    %81 = vector.extract_strided_slice %5 {offsets = [0, 2], sizes = [64, 1], strides = [1, 1]} : vector<64x3xf32> to vector<64x1xf32>
    %82 = vector.extract_strided_slice %69 {offsets = [2, 0], sizes = [1, 128], strides = [1, 1]} : vector<3x128xf32> to vector<1x128xf32>
    %83 = vector.broadcast %81 : vector<64x1xf32> to vector<64x128xf32>
    %84 = vector.broadcast %82 : vector<1x128xf32> to vector<64x128xf32>
    %85 = arith.mulf %83, %84 : vector<64x128xf32>
    %86 = arith.addf %80, %85 : vector<64x128xf32>
    %87 = vector.broadcast %6 : vector<64x1xf32> to vector<64x128xf32>
    %88 = arith.addf %86, %87 : vector<64x128xf32>
    %cst_17 = arith.constant 0.000000e+00 : f32
    %89 = vector.broadcast %cst_17 : f32 to vector<64x128xf32>
    %90 = arith.maximumf %88, %89 : vector<64x128xf32>
    %91 = arith.truncf %90 : vector<64x128xf32> to vector<64x128xbf16>
    %cst_18 = arith.constant dense<0.000000e+00> : vector<128x128xf32>
    %92 = tpu.matmul %7, %91, %cst_18 {dimension_numbers = #tpu.dot_dimension_numbers<[1], [0], [0], [1], [0, 0, 1, 1], [], []>} : vector<128x64xbf16>, vector<64x128xbf16>, vector<128x128xf32> -> vector<128x128xf32>
    %93 = vector.broadcast %8 : vector<128x1xf32> to vector<128x128xf32>
    %94 = arith.addf %92, %93 : vector<128x128xf32>
    %cst_19 = arith.constant 0.000000e+00 : f32
    %95 = vector.broadcast %cst_19 : f32 to vector<128x128xf32>
    %96 = arith.maximumf %94, %95 : vector<128x128xf32>
    %97 = arith.maximumf %67, %96 : vector<128x128xf32>
    %98 = vector.extract_strided_slice %4 {offsets = [0, 3, 0], sizes = [3, 1, 128], strides = [1, 1, 1]} : vector<3x8x128xf32> to vector<3x1x128xf32>
    %99 = vector.shape_cast %98 : vector<3x1x128xf32> to vector<3x128xf32>
    %100 = vector.extract_strided_slice %5 {offsets = [0, 0], sizes = [64, 1], strides = [1, 1]} : vector<64x3xf32> to vector<64x1xf32>
    %101 = vector.extract_strided_slice %99 {offsets = [0, 0], sizes = [1, 128], strides = [1, 1]} : vector<3x128xf32> to vector<1x128xf32>
    %102 = vector.broadcast %100 : vector<64x1xf32> to vector<64x128xf32>
    %103 = vector.broadcast %101 : vector<1x128xf32> to vector<64x128xf32>
    %104 = arith.mulf %102, %103 : vector<64x128xf32>
    %105 = vector.extract_strided_slice %5 {offsets = [0, 1], sizes = [64, 1], strides = [1, 1]} : vector<64x3xf32> to vector<64x1xf32>
    %106 = vector.extract_strided_slice %99 {offsets = [1, 0], sizes = [1, 128], strides = [1, 1]} : vector<3x128xf32> to vector<1x128xf32>
    %107 = vector.broadcast %105 : vector<64x1xf32> to vector<64x128xf32>
    %108 = vector.broadcast %106 : vector<1x128xf32> to vector<64x128xf32>
    %109 = arith.mulf %107, %108 : vector<64x128xf32>
    %110 = arith.addf %104, %109 : vector<64x128xf32>
    %111 = vector.extract_strided_slice %5 {offsets = [0, 2], sizes = [64, 1], strides = [1, 1]} : vector<64x3xf32> to vector<64x1xf32>
    %112 = vector.extract_strided_slice %99 {offsets = [2, 0], sizes = [1, 128], strides = [1, 1]} : vector<3x128xf32> to vector<1x128xf32>
    %113 = vector.broadcast %111 : vector<64x1xf32> to vector<64x128xf32>
    %114 = vector.broadcast %112 : vector<1x128xf32> to vector<64x128xf32>
    %115 = arith.mulf %113, %114 : vector<64x128xf32>
    %116 = arith.addf %110, %115 : vector<64x128xf32>
    %117 = vector.broadcast %6 : vector<64x1xf32> to vector<64x128xf32>
    %118 = arith.addf %116, %117 : vector<64x128xf32>
    %cst_20 = arith.constant 0.000000e+00 : f32
    %119 = vector.broadcast %cst_20 : f32 to vector<64x128xf32>
    %120 = arith.maximumf %118, %119 : vector<64x128xf32>
    %121 = arith.truncf %120 : vector<64x128xf32> to vector<64x128xbf16>
    %cst_21 = arith.constant dense<0.000000e+00> : vector<128x128xf32>
    %122 = tpu.matmul %7, %121, %cst_21 {dimension_numbers = #tpu.dot_dimension_numbers<[1], [0], [0], [1], [0, 0, 1, 1], [], []>} : vector<128x64xbf16>, vector<64x128xbf16>, vector<128x128xf32> -> vector<128x128xf32>
    %123 = vector.broadcast %8 : vector<128x1xf32> to vector<128x128xf32>
    %124 = arith.addf %122, %123 : vector<128x128xf32>
    %cst_22 = arith.constant 0.000000e+00 : f32
    %125 = vector.broadcast %cst_22 : f32 to vector<128x128xf32>
    %126 = arith.maximumf %124, %125 : vector<128x128xf32>
    %127 = arith.maximumf %97, %126 : vector<128x128xf32>
    %128 = vector.extract_strided_slice %4 {offsets = [0, 4, 0], sizes = [3, 1, 128], strides = [1, 1, 1]} : vector<3x8x128xf32> to vector<3x1x128xf32>
    %129 = vector.shape_cast %128 : vector<3x1x128xf32> to vector<3x128xf32>
    %130 = vector.extract_strided_slice %5 {offsets = [0, 0], sizes = [64, 1], strides = [1, 1]} : vector<64x3xf32> to vector<64x1xf32>
    %131 = vector.extract_strided_slice %129 {offsets = [0, 0], sizes = [1, 128], strides = [1, 1]} : vector<3x128xf32> to vector<1x128xf32>
    %132 = vector.broadcast %130 : vector<64x1xf32> to vector<64x128xf32>
    %133 = vector.broadcast %131 : vector<1x128xf32> to vector<64x128xf32>
    %134 = arith.mulf %132, %133 : vector<64x128xf32>
    %135 = vector.extract_strided_slice %5 {offsets = [0, 1], sizes = [64, 1], strides = [1, 1]} : vector<64x3xf32> to vector<64x1xf32>
    %136 = vector.extract_strided_slice %129 {offsets = [1, 0], sizes = [1, 128], strides = [1, 1]} : vector<3x128xf32> to vector<1x128xf32>
    %137 = vector.broadcast %135 : vector<64x1xf32> to vector<64x128xf32>
    %138 = vector.broadcast %136 : vector<1x128xf32> to vector<64x128xf32>
    %139 = arith.mulf %137, %138 : vector<64x128xf32>
    %140 = arith.addf %134, %139 : vector<64x128xf32>
    %141 = vector.extract_strided_slice %5 {offsets = [0, 2], sizes = [64, 1], strides = [1, 1]} : vector<64x3xf32> to vector<64x1xf32>
    %142 = vector.extract_strided_slice %129 {offsets = [2, 0], sizes = [1, 128], strides = [1, 1]} : vector<3x128xf32> to vector<1x128xf32>
    %143 = vector.broadcast %141 : vector<64x1xf32> to vector<64x128xf32>
    %144 = vector.broadcast %142 : vector<1x128xf32> to vector<64x128xf32>
    %145 = arith.mulf %143, %144 : vector<64x128xf32>
    %146 = arith.addf %140, %145 : vector<64x128xf32>
    %147 = vector.broadcast %6 : vector<64x1xf32> to vector<64x128xf32>
    %148 = arith.addf %146, %147 : vector<64x128xf32>
    %cst_23 = arith.constant 0.000000e+00 : f32
    %149 = vector.broadcast %cst_23 : f32 to vector<64x128xf32>
    %150 = arith.maximumf %148, %149 : vector<64x128xf32>
    %151 = arith.truncf %150 : vector<64x128xf32> to vector<64x128xbf16>
    %cst_24 = arith.constant dense<0.000000e+00> : vector<128x128xf32>
    %152 = tpu.matmul %7, %151, %cst_24 {dimension_numbers = #tpu.dot_dimension_numbers<[1], [0], [0], [1], [0, 0, 1, 1], [], []>} : vector<128x64xbf16>, vector<64x128xbf16>, vector<128x128xf32> -> vector<128x128xf32>
    %153 = vector.broadcast %8 : vector<128x1xf32> to vector<128x128xf32>
    %154 = arith.addf %152, %153 : vector<128x128xf32>
    %cst_25 = arith.constant 0.000000e+00 : f32
    %155 = vector.broadcast %cst_25 : f32 to vector<128x128xf32>
    %156 = arith.maximumf %154, %155 : vector<128x128xf32>
    %157 = arith.maximumf %127, %156 : vector<128x128xf32>
    %158 = vector.extract_strided_slice %4 {offsets = [0, 5, 0], sizes = [3, 1, 128], strides = [1, 1, 1]} : vector<3x8x128xf32> to vector<3x1x128xf32>
    %159 = vector.shape_cast %158 : vector<3x1x128xf32> to vector<3x128xf32>
    %160 = vector.extract_strided_slice %5 {offsets = [0, 0], sizes = [64, 1], strides = [1, 1]} : vector<64x3xf32> to vector<64x1xf32>
    %161 = vector.extract_strided_slice %159 {offsets = [0, 0], sizes = [1, 128], strides = [1, 1]} : vector<3x128xf32> to vector<1x128xf32>
    %162 = vector.broadcast %160 : vector<64x1xf32> to vector<64x128xf32>
    %163 = vector.broadcast %161 : vector<1x128xf32> to vector<64x128xf32>
    %164 = arith.mulf %162, %163 : vector<64x128xf32>
    %165 = vector.extract_strided_slice %5 {offsets = [0, 1], sizes = [64, 1], strides = [1, 1]} : vector<64x3xf32> to vector<64x1xf32>
    %166 = vector.extract_strided_slice %159 {offsets = [1, 0], sizes = [1, 128], strides = [1, 1]} : vector<3x128xf32> to vector<1x128xf32>
    %167 = vector.broadcast %165 : vector<64x1xf32> to vector<64x128xf32>
    %168 = vector.broadcast %166 : vector<1x128xf32> to vector<64x128xf32>
    %169 = arith.mulf %167, %168 : vector<64x128xf32>
    %170 = arith.addf %164, %169 : vector<64x128xf32>
    %171 = vector.extract_strided_slice %5 {offsets = [0, 2], sizes = [64, 1], strides = [1, 1]} : vector<64x3xf32> to vector<64x1xf32>
    %172 = vector.extract_strided_slice %159 {offsets = [2, 0], sizes = [1, 128], strides = [1, 1]} : vector<3x128xf32> to vector<1x128xf32>
    %173 = vector.broadcast %171 : vector<64x1xf32> to vector<64x128xf32>
    %174 = vector.broadcast %172 : vector<1x128xf32> to vector<64x128xf32>
    %175 = arith.mulf %173, %174 : vector<64x128xf32>
    %176 = arith.addf %170, %175 : vector<64x128xf32>
    %177 = vector.broadcast %6 : vector<64x1xf32> to vector<64x128xf32>
    %178 = arith.addf %176, %177 : vector<64x128xf32>
    %cst_26 = arith.constant 0.000000e+00 : f32
    %179 = vector.broadcast %cst_26 : f32 to vector<64x128xf32>
    %180 = arith.maximumf %178, %179 : vector<64x128xf32>
    %181 = arith.truncf %180 : vector<64x128xf32> to vector<64x128xbf16>
    %cst_27 = arith.constant dense<0.000000e+00> : vector<128x128xf32>
    %182 = tpu.matmul %7, %181, %cst_27 {dimension_numbers = #tpu.dot_dimension_numbers<[1], [0], [0], [1], [0, 0, 1, 1], [], []>} : vector<128x64xbf16>, vector<64x128xbf16>, vector<128x128xf32> -> vector<128x128xf32>
    %183 = vector.broadcast %8 : vector<128x1xf32> to vector<128x128xf32>
    %184 = arith.addf %182, %183 : vector<128x128xf32>
    %cst_28 = arith.constant 0.000000e+00 : f32
    %185 = vector.broadcast %cst_28 : f32 to vector<128x128xf32>
    %186 = arith.maximumf %184, %185 : vector<128x128xf32>
    %187 = arith.maximumf %157, %186 : vector<128x128xf32>
    %188 = vector.extract_strided_slice %4 {offsets = [0, 6, 0], sizes = [3, 1, 128], strides = [1, 1, 1]} : vector<3x8x128xf32> to vector<3x1x128xf32>
    %189 = vector.shape_cast %188 : vector<3x1x128xf32> to vector<3x128xf32>
    %190 = vector.extract_strided_slice %5 {offsets = [0, 0], sizes = [64, 1], strides = [1, 1]} : vector<64x3xf32> to vector<64x1xf32>
    %191 = vector.extract_strided_slice %189 {offsets = [0, 0], sizes = [1, 128], strides = [1, 1]} : vector<3x128xf32> to vector<1x128xf32>
    %192 = vector.broadcast %190 : vector<64x1xf32> to vector<64x128xf32>
    %193 = vector.broadcast %191 : vector<1x128xf32> to vector<64x128xf32>
    %194 = arith.mulf %192, %193 : vector<64x128xf32>
    %195 = vector.extract_strided_slice %5 {offsets = [0, 1], sizes = [64, 1], strides = [1, 1]} : vector<64x3xf32> to vector<64x1xf32>
    %196 = vector.extract_strided_slice %189 {offsets = [1, 0], sizes = [1, 128], strides = [1, 1]} : vector<3x128xf32> to vector<1x128xf32>
    %197 = vector.broadcast %195 : vector<64x1xf32> to vector<64x128xf32>
    %198 = vector.broadcast %196 : vector<1x128xf32> to vector<64x128xf32>
    %199 = arith.mulf %197, %198 : vector<64x128xf32>
    %200 = arith.addf %194, %199 : vector<64x128xf32>
    %201 = vector.extract_strided_slice %5 {offsets = [0, 2], sizes = [64, 1], strides = [1, 1]} : vector<64x3xf32> to vector<64x1xf32>
    %202 = vector.extract_strided_slice %189 {offsets = [2, 0], sizes = [1, 128], strides = [1, 1]} : vector<3x128xf32> to vector<1x128xf32>
    %203 = vector.broadcast %201 : vector<64x1xf32> to vector<64x128xf32>
    %204 = vector.broadcast %202 : vector<1x128xf32> to vector<64x128xf32>
    %205 = arith.mulf %203, %204 : vector<64x128xf32>
    %206 = arith.addf %200, %205 : vector<64x128xf32>
    %207 = vector.broadcast %6 : vector<64x1xf32> to vector<64x128xf32>
    %208 = arith.addf %206, %207 : vector<64x128xf32>
    %cst_29 = arith.constant 0.000000e+00 : f32
    %209 = vector.broadcast %cst_29 : f32 to vector<64x128xf32>
    %210 = arith.maximumf %208, %209 : vector<64x128xf32>
    %211 = arith.truncf %210 : vector<64x128xf32> to vector<64x128xbf16>
    %cst_30 = arith.constant dense<0.000000e+00> : vector<128x128xf32>
    %212 = tpu.matmul %7, %211, %cst_30 {dimension_numbers = #tpu.dot_dimension_numbers<[1], [0], [0], [1], [0, 0, 1, 1], [], []>} : vector<128x64xbf16>, vector<64x128xbf16>, vector<128x128xf32> -> vector<128x128xf32>
    %213 = vector.broadcast %8 : vector<128x1xf32> to vector<128x128xf32>
    %214 = arith.addf %212, %213 : vector<128x128xf32>
    %cst_31 = arith.constant 0.000000e+00 : f32
    %215 = vector.broadcast %cst_31 : f32 to vector<128x128xf32>
    %216 = arith.maximumf %214, %215 : vector<128x128xf32>
    %217 = arith.maximumf %187, %216 : vector<128x128xf32>
    %218 = vector.extract_strided_slice %4 {offsets = [0, 7, 0], sizes = [3, 1, 128], strides = [1, 1, 1]} : vector<3x8x128xf32> to vector<3x1x128xf32>
    %219 = vector.shape_cast %218 : vector<3x1x128xf32> to vector<3x128xf32>
    %220 = vector.extract_strided_slice %5 {offsets = [0, 0], sizes = [64, 1], strides = [1, 1]} : vector<64x3xf32> to vector<64x1xf32>
    %221 = vector.extract_strided_slice %219 {offsets = [0, 0], sizes = [1, 128], strides = [1, 1]} : vector<3x128xf32> to vector<1x128xf32>
    %222 = vector.broadcast %220 : vector<64x1xf32> to vector<64x128xf32>
    %223 = vector.broadcast %221 : vector<1x128xf32> to vector<64x128xf32>
    %224 = arith.mulf %222, %223 : vector<64x128xf32>
    %225 = vector.extract_strided_slice %5 {offsets = [0, 1], sizes = [64, 1], strides = [1, 1]} : vector<64x3xf32> to vector<64x1xf32>
    %226 = vector.extract_strided_slice %219 {offsets = [1, 0], sizes = [1, 128], strides = [1, 1]} : vector<3x128xf32> to vector<1x128xf32>
    %227 = vector.broadcast %225 : vector<64x1xf32> to vector<64x128xf32>
    %228 = vector.broadcast %226 : vector<1x128xf32> to vector<64x128xf32>
    %229 = arith.mulf %227, %228 : vector<64x128xf32>
    %230 = arith.addf %224, %229 : vector<64x128xf32>
    %231 = vector.extract_strided_slice %5 {offsets = [0, 2], sizes = [64, 1], strides = [1, 1]} : vector<64x3xf32> to vector<64x1xf32>
    %232 = vector.extract_strided_slice %219 {offsets = [2, 0], sizes = [1, 128], strides = [1, 1]} : vector<3x128xf32> to vector<1x128xf32>
    %233 = vector.broadcast %231 : vector<64x1xf32> to vector<64x128xf32>
    %234 = vector.broadcast %232 : vector<1x128xf32> to vector<64x128xf32>
    %235 = arith.mulf %233, %234 : vector<64x128xf32>
    %236 = arith.addf %230, %235 : vector<64x128xf32>
    %237 = vector.broadcast %6 : vector<64x1xf32> to vector<64x128xf32>
    %238 = arith.addf %236, %237 : vector<64x128xf32>
    %cst_32 = arith.constant 0.000000e+00 : f32
    %239 = vector.broadcast %cst_32 : f32 to vector<64x128xf32>
    %240 = arith.maximumf %238, %239 : vector<64x128xf32>
    %241 = arith.truncf %240 : vector<64x128xf32> to vector<64x128xbf16>
    %cst_33 = arith.constant dense<0.000000e+00> : vector<128x128xf32>
    %242 = tpu.matmul %7, %241, %cst_33 {dimension_numbers = #tpu.dot_dimension_numbers<[1], [0], [0], [1], [0, 0, 1, 1], [], []>} : vector<128x64xbf16>, vector<64x128xbf16>, vector<128x128xf32> -> vector<128x128xf32>
    %243 = vector.broadcast %8 : vector<128x1xf32> to vector<128x128xf32>
    %244 = arith.addf %242, %243 : vector<128x128xf32>
    %cst_34 = arith.constant 0.000000e+00 : f32
    %245 = vector.broadcast %cst_34 : f32 to vector<128x128xf32>
    %246 = arith.maximumf %244, %245 : vector<128x128xf32>
    %247 = arith.maximumf %217, %246 : vector<128x128xf32>
    %248 = tpu.transpose %247, [1, 0] : vector<128x128xf32> -> vector<128x128xf32>
    %249 = arith.truncf %248 : vector<128x128xf32> to vector<128x128xbf16>
    %c0_35 = arith.constant 0 : index
    %c0_36 = arith.constant 0 : index
    %250 = vector.load %arg7[%c0_35, %c0_36] : memref<128x1024xbf16, #tpu.memory_space<vmem>>, vector<128x1024xbf16>
    %cst_37 = arith.constant dense<0.000000e+00> : vector<128x1024xf32>
    %251 = tpu.matmul %249, %250, %cst_37 {dimension_numbers = #tpu.dot_dimension_numbers<[1], [0], [0], [1], [0, 0, 1, 1], [], []>} : vector<128x128xbf16>, vector<128x1024xbf16>, vector<128x1024xf32> -> vector<128x1024xf32>
    %c0_38 = arith.constant 0 : index
    %c0_39 = arith.constant 0 : index
    %252 = vector.load %arg8[%c0_38, %c0_39] : memref<1x1024xf32, #tpu.memory_space<vmem>>, vector<1x1024xf32>
    %253 = vector.broadcast %252 : vector<1x1024xf32> to vector<128x1024xf32>
    %254 = arith.addf %251, %253 : vector<128x1024xf32>
    %cst_40 = arith.constant 0.000000e+00 : f32
    %255 = vector.broadcast %cst_40 : f32 to vector<128x1024xf32>
    %256 = arith.maximumf %254, %255 : vector<128x1024xf32>
    %c0_41 = arith.constant 0 : index
    %c0_42 = arith.constant 0 : index
    %257 = vector.load %arg16[%c0_41, %c0_42] : memref<1x1024xf32, #tpu.memory_space<vmem>>, vector<1x1024xf32>
    %cst_43 = arith.constant dense<0xFF800000> : vector<1024xf32>
    %258 = vector.multi_reduction <maximumf>, %256, %cst_43 [0] : vector<128x1024xf32> to vector<1024xf32>
    %259 = vector.shape_cast %258 : vector<1024xf32> to vector<1x1024xf32>
    %260 = arith.maximumf %257, %259 : vector<1x1024xf32>
    %c0_44 = arith.constant 0 : index
    %c0_45 = arith.constant 0 : index
    %261 = vector.load %arg16[%c0_44, %c0_45] : memref<1x1024xf32, #tpu.memory_space<vmem>>, vector<1x1024xf32>
    tpu.vector_store %arg16[%c0_44, %c0_45], %260 {strides = array<i32>} : memref<1x1024xf32, #tpu.memory_space<vmem>>, vector<1x1024xf32>,
    %c1_i32 = arith.constant 1 : i32
    %262 = arith.cmpi eq, %arg1, %c1_i32 : i32
    %263 = arith.extui %262 : i1 to i32
    %c0_i32_46 = arith.constant 0 : i32
    %264 = arith.cmpi ne, %263, %c0_i32_46 : i32
    scf.if %264 {
      %c0_47 = arith.constant 0 : index
      %c0_48 = arith.constant 0 : index
      %265 = vector.load %arg16[%c0_47, %c0_48] : memref<1x1024xf32, #tpu.memory_space<vmem>>, vector<1x1024xf32>
      %266 = arith.truncf %265 : vector<1x1024xf32> to vector<1x1024xbf16>
      %c0_49 = arith.constant 0 : index
      %c0_50 = arith.constant 0 : index
      %267 = vector.load %arg9[%c0_49, %c0_50] : memref<1024x512xbf16, #tpu.memory_space<vmem>>, vector<1024x512xbf16>
      %cst_51 = arith.constant dense<0.000000e+00> : vector<1x512xf32>
      %268 = tpu.matmul %266, %267, %cst_51 {dimension_numbers = #tpu.dot_dimension_numbers<[1], [0], [0], [1], [0, 0, 1, 1], [], []>} : vector<1x1024xbf16>, vector<1024x512xbf16>, vector<1x512xf32> -> vector<1x512xf32>
      %c0_52 = arith.constant 0 : index
      %c0_53 = arith.constant 0 : index
      %269 = vector.load %arg10[%c0_52, %c0_53] : memref<1x512xf32, #tpu.memory_space<vmem>>, vector<1x512xf32>
      %270 = arith.addf %268, %269 : vector<1x512xf32>
      %cst_54 = arith.constant 0.000000e+00 : f32
      %271 = vector.broadcast %cst_54 : f32 to vector<1x512xf32>
      %272 = arith.maximumf %270, %271 : vector<1x512xf32>
      %273 = arith.truncf %272 : vector<1x512xf32> to vector<1x512xbf16>
      %c0_55 = arith.constant 0 : index
      %c0_56 = arith.constant 0 : index
      %274 = vector.load %arg11[%c0_55, %c0_56] : memref<512x256xbf16, #tpu.memory_space<vmem>>, vector<512x256xbf16>
      %cst_57 = arith.constant dense<0.000000e+00> : vector<1x256xf32>
      %275 = tpu.matmul %273, %274, %cst_57 {dimension_numbers = #tpu.dot_dimension_numbers<[1], [0], [0], [1], [0, 0, 1, 1], [], []>} : vector<1x512xbf16>, vector<512x256xbf16>, vector<1x256xf32> -> vector<1x256xf32>
      %c0_58 = arith.constant 0 : index
      %c0_59 = arith.constant 0 : index
      %276 = vector.load %arg12[%c0_58, %c0_59] : memref<1x256xf32, #tpu.memory_space<vmem>>, vector<1x256xf32>
      %277 = arith.addf %275, %276 : vector<1x256xf32>
      %cst_60 = arith.constant 0.000000e+00 : f32
      %278 = vector.broadcast %cst_60 : f32 to vector<1x256xf32>
      %279 = arith.maximumf %277, %278 : vector<1x256xf32>
      %280 = arith.truncf %279 : vector<1x256xf32> to vector<1x256xbf16>
      %c0_61 = arith.constant 0 : index
      %c0_62 = arith.constant 0 : index
      %281 = vector.load %arg13[%c0_61, %c0_62] : memref<256x128xbf16, #tpu.memory_space<vmem>>, vector<256x128xbf16>
      %cst_63 = arith.constant dense<0.000000e+00> : vector<1x128xf32>
      %282 = tpu.matmul %280, %281, %cst_63 {dimension_numbers = #tpu.dot_dimension_numbers<[1], [0], [0], [1], [0, 0, 1, 1], [], []>} : vector<1x256xbf16>, vector<256x128xbf16>, vector<1x128xf32> -> vector<1x128xf32>
      %c0_64 = arith.constant 0 : index
      %c0_65 = arith.constant 0 : index
      %283 = vector.load %arg14[%c0_64, %c0_65] : memref<1x128xf32, #tpu.memory_space<vmem>>, vector<1x128xf32>
      %284 = arith.addf %282, %283 : vector<1x128xf32>
      %285 = vector.shape_cast %284 : vector<1x128xf32> to vector<1x1x128xf32>
      %c0_66 = arith.constant 0 : index
      %c0_67 = arith.constant 0 : index
      %c0_68 = arith.constant 0 : index
      %286 = vector.load %arg15[%c0_66, %c0_67, %c0_68] : memref<1x1x128xf32, #tpu.memory_space<vmem>>, vector<1x1x128xf32>
      tpu.vector_store %arg15[%c0_66, %c0_67, %c0_68], %285 {strides = array<i32>} : memref<1x1x128xf32, #tpu.memory_space<vmem>>, vector<1x1x128xf32>,
    } else {
    }
    return
  }
  func.func @transform_0(%arg0: i32, %arg1: i32) -> (i32, i32, i32, i32) {
    %c0_i32 = arith.constant 0 : i32
    %c0_i32_0 = arith.constant 0 : i32
    %c0_i32_1 = arith.constant 0 : i32
    return %arg0, %c0_i32, %c0_i32_0, %arg1 : i32, i32, i32, i32
  }
  func.func @transform_1(%arg0: i32, %arg1: i32) -> (i32, i32) {
    %c0_i32 = arith.constant 0 : i32
    %c0_i32_0 = arith.constant 0 : i32
    %c0_i32_1 = arith.constant 0 : i32
    return %c0_i32, %c0_i32_0 : i32, i32
  }
  func.func @transform_2(%arg0: i32, %arg1: i32) -> (i32, i32) {
    %c0_i32 = arith.constant 0 : i32
    %c0_i32_0 = arith.constant 0 : i32
    %c0_i32_1 = arith.constant 0 : i32
    return %c0_i32, %c0_i32_0 : i32, i32
  }
  func.func @transform_3(%arg0: i32, %arg1: i32) -> (i32, i32) {
    %c0_i32 = arith.constant 0 : i32
    %c0_i32_0 = arith.constant 0 : i32
    %c0_i32_1 = arith.constant 0 : i32
    return %c0_i32, %c0_i32_0 : i32, i32
  }
  func.func @transform_4(%arg0: i32, %arg1: i32) -> (i32, i32) {
    %c0_i32 = arith.constant 0 : i32
    %c0_i32_0 = arith.constant 0 : i32
    %c0_i32_1 = arith.constant 0 : i32
    return %c0_i32, %c0_i32_0 : i32, i32
  }
  func.func @transform_5(%arg0: i32, %arg1: i32) -> (i32, i32) {
    %c0_i32 = arith.constant 0 : i32
    %c0_i32_0 = arith.constant 0 : i32
    %c0_i32_1 = arith.constant 0 : i32
    return %c0_i32, %c0_i32_0 : i32, i32
  }
  func.func @transform_6(%arg0: i32, %arg1: i32) -> (i32, i32) {
    %c0_i32 = arith.constant 0 : i32
    %c0_i32_0 = arith.constant 0 : i32
    %c0_i32_1 = arith.constant 0 : i32
    return %c0_i32, %c0_i32_0 : i32, i32
  }
  func.func @transform_7(%arg0: i32, %arg1: i32) -> (i32, i32) {
    %c0_i32 = arith.constant 0 : i32
    %c0_i32_0 = arith.constant 0 : i32
    %c0_i32_1 = arith.constant 0 : i32
    return %c0_i32, %c0_i32_0 : i32, i32
  }
  func.func @transform_8(%arg0: i32, %arg1: i32) -> (i32, i32) {
    %c0_i32 = arith.constant 0 : i32
    %c0_i32_0 = arith.constant 0 : i32
    %c0_i32_1 = arith.constant 0 : i32
    return %c0_i32, %c0_i32_0 : i32, i32
  }
  func.func @transform_9(%arg0: i32, %arg1: i32) -> (i32, i32) {
    %c0_i32 = arith.constant 0 : i32
    %c0_i32_0 = arith.constant 0 : i32
    %c0_i32_1 = arith.constant 0 : i32
    return %c0_i32, %c0_i32_0 : i32, i32
  }
  func.func @transform_10(%arg0: i32, %arg1: i32) -> (i32, i32) {
    %c0_i32 = arith.constant 0 : i32
    %c0_i32_0 = arith.constant 0 : i32
    %c0_i32_1 = arith.constant 0 : i32
    return %c0_i32, %c0_i32_0 : i32, i32
  }
  func.func @transform_11(%arg0: i32, %arg1: i32) -> (i32, i32) {
    %c0_i32 = arith.constant 0 : i32
    %c0_i32_0 = arith.constant 0 : i32
    %c0_i32_1 = arith.constant 0 : i32
    return %c0_i32, %c0_i32_0 : i32, i32
  }
  func.func @transform_12(%arg0: i32, %arg1: i32) -> (i32, i32) {
    %c0_i32 = arith.constant 0 : i32
    %c0_i32_0 = arith.constant 0 : i32
    %c0_i32_1 = arith.constant 0 : i32
    return %c0_i32, %c0_i32_0 : i32, i32
  }
  func.func @transform_13(%arg0: i32, %arg1: i32) -> (i32, i32, i32) {
    %c0_i32 = arith.constant 0 : i32
    %c0_i32_0 = arith.constant 0 : i32
    %c0_i32_1 = arith.constant 0 : i32
    return %arg0, %c0_i32, %c0_i32_0 : i32, i32, i32
  }
}

</mosaic_0001>

<bundles_post_ra>
// kernel: tpu_custom_call.1
= control target key start
LH: loop header
LB: loop body
LE: loop exit
PB: predicated region body
PF: predicated region fallthrough
CT: control target
= control target key end

     0   :  { %s10390_s0 = inlined_call_operand.vmem [shape: f32[2,3,8,256], index: 0, kind: input, shape index: {}]   ;;  %s10391_s1 = inlined_call_operand.vmem [shape: f32[64,3], index: 1, kind: input, shape index: {}]   ;;  %s10392_s2 = inlined_call_operand.vmem [shape: f32[64,1], index: 2, kind: input, shape index: {}]   ;;  %s10393_s3 = inlined_call_operand.vmem [shape: bf16[128,64], index: 3, kind: input, shape index: {}]   ;;  %s10394_s4 = inlined_call_operand.vmem [shape: f32[128,1], index: 4, kind: input, shape index: {}]   ;;  %s10395_s5 = inlined_call_operand.hbm [shape: bf16[128,1024], index: 5, kind: input, shape index: {}]   ;;  %s10396_s6 = inlined_call_operand.vmem [shape: f32[1,1024], index: 6, kind: input, shape index: {}]   ;;  %s10397_s7 = inlined_call_operand.hbm [shape: bf16[1024,512], index: 7, kind: input, shape index: {}]   ;;  %s10398_s8 = inlined_call_operand.vmem [shape: f32[1,512], index: 8, kind: input, shape index: {}]   ;;  %s10399_s9 = inlined_call_operand.hbm [shape: bf16[512,256], index: 9, kind: input, shape index: {}]   ;;  %s10400_s10 = inlined_call_operand.vmem [shape: f32[1,256], index: 10, kind: input, shape index: {}]   ;;  %s10401_s11 = inlined_call_operand.vmem [shape: bf16[256,128], index: 11, kind: input, shape index: {}]   ;;  %s10402_s12 = inlined_call_operand.vmem [shape: f32[1,128], index: 12, kind: input, shape index: {}]   ;;  %s10403_s13 = inlined_call_operand.hbm [shape: f32[2,1,128], index: 13, kind: output, shape index: {}]  }
   0x1   :  { %10484 = sst [smem:[#allocation93_spill]] %s10392_s2 }
   0x2   :  { %10485 = sst [smem:[#allocation94_spill]] %s10393_s3 }
   0x3   :  { %10486 = sst [smem:[#allocation95_spill]] %s10394_s4 }
   0x4   :  { %10487 = sst [smem:[#allocation96_spill]] %s10396_s6 }
   0x5   :  { %10488 = sst [smem:[#allocation97_spill]] %s10398_s8 }
   0x6   :  { %10489 = sst [smem:[#allocation98_spill]] %s10400_s10 }
   0x7   :  { %10490 = sst [smem:[#allocation99_spill]] %s10401_s11 }
   0x8   :  { %10491 = sst [smem:[#allocation100_spill]] %s10402_s12 }
   0x9   :  { %10492 = sst [smem:[#allocation101_spill]] %s10403_s13 }
   0xa   :  { %18 = vsyncpa [#allocation5], 0 }
   0xb   :  { %19 = vsyncpa [#allocation8], 0 }
   0xc   :  { %20 = vsyncpa [#allocation6], 0 }
   0xd   :  { %22 = vsyncpa [#allocation6 + $0x1], 0  ;;  %s8244_s25 = smov 0   ;;  %s8246_s26 = smov 0  }
   0xe   :  { %s8248_s27 = smov 0   ;;  %s8250_s28 = smov 0  }
   0xf   :  { %s8252_s29 = smov 0   ;;  %s8254_s30 = smov 0  }
  0x10   :  { %s8256_s14 = smov 0   ;;  %s8258_s15 = smov 0  }
  0x11   :  { %s8260_s16 = smov 0   ;;  %s8262_s17 = smov 0  }
  0x12 LB: > { %10493 = sst [smem:[#allocation14_spill]] %s8121_s25  ;;  %s6471_s18 = sadd.s32 4294967295, %s8157_s17   ;;  %s8157_s17 = sphi %s8262_s17, %s28_s17   ;;  %s8153_s16 = sphi %s8260_s16, %s10712_s16   ;;  %s8149_s15 = sphi %s8258_s15, %s10711_s15   ;;  %s8145_s14 = sphi %s8256_s14, %s10710_s14   ;;  %s8141_s30 = sphi %s8254_s30, %s10709_s30   ;;  %s8137_s29 = sphi %s8252_s29, %s10708_s29   ;;  %s8133_s28 = sphi %s8250_s28, %s10707_s28   ;;  %s8129_s27 = sphi %s8248_s27, %s10701_s27   ;;  %s8125_s26 = sphi %s8246_s26, %s10706_s26   ;;  %s8121_s25 = sphi %s8244_s25, %s10705_s25  }
  0x13   : > { %10494 = sst [smem:[#allocation15_spill]] %s8129_s27  ;;  %s6472_s19 = sadd.s32 4294967294, %s8157_s17  }
  0x14   : > { %10495 = sst [smem:[#allocation16_spill]] %s8145_s14  ;;  %s37_s20 = sadd.s32 1, %s8149_s15 }
  0x15   : > { %s40_s21 = sadd.s32 1, %s8153_s16  ;;  %p38_p0 = scmp.ge.s32.totalorder %s37_s20, 2 }
  0x16   : > { %s49_s22 = sadd.s32 1, %s8137_s29  ;;  %p56_p1 = scmp.ne.s32.totalorder %s8137_s29, %s8133_s28 }
  0x17   : > { %p57_p2 = scmp.eq.s32.totalorder %s8157_s17, 0  ;;  %s10714_s20 = smov (%p38_p0, %s37_s20), 0 }
  0x18   : > { %10496 = sst [smem:[#allocation17_spill]] %s10714_s20  ;;  %s10716_s21 = smov (!%p38_p0, %s40_s21), %s8153_s16 }
  0x19   : > { %s45_s23 = ssub.s32 %s8149_s15, %s10714_s20  ;;  %p8307_p3 = por %p57_p2, %p56_p1 }
  0x1a   : > { %p42_p4 = scmp.ge.s32.totalorder %s10716_s21, 2  ;;  %s327_s13 = sadd.s32 1, %s8129_s27 }
  0x1b   : > { %s10497_s24 = scalar_select %p8307_p3, 1, 0 }
  0x1c   : > { %p337_p5 = scmp.ne.s32.totalorder %s8129_s27, %s8125_s26  ;;  %p338_p6 = scmp.eq.s32.totalorder %s6471_s18, 3 }
  0x1d   : > { %s10718_s21 = smov (%p42_p4, %s10716_s21), 0  ;;  %p343_p8 = scmp.ne.s32.totalorder %s8125_s26, %s8121_s25 }
  0x1e   : > { %10498 = sst [smem:[#allocation18_spill]] %s10718_s21  ;;  %p8316_p7 = por %p338_p6, %p337_p5 }
  0x1f   : > { %s44_s20 = ssub.s32 %s8153_s16, %s10718_s21  ;;  %p344_p9 = scmp.eq.s32.totalorder %s6472_s19, 3 }
  0x20   : > { %s10499_s14 = scalar_select %p8316_p7, 1, 0 }
  0x21   : > { %s46_s12 = sor.u32 %s45_s23, %s44_s20  ;;  %p325_p10 = scmp.eq.s32.totalorder %s44_s20, 0 }
  0x22   : > { %10500 = sst [smem:[#allocation19_spill]] %s10499_s14  ;;  %p47_p11 = scmp.eq.s32.totalorder %s46_s12, 0 }
  0x23   : > { %p8324_p12 = por %p344_p9, %p343_p8  ;;  %p6473_p13 = scmp.ge.s32.totalorder %s8157_s17, 1 }
  0x24   : > { %s8329_s11 = scalar_select %p325_p10, %s8129_s27, %s327_s13  }
  0x25   : > { %s10501_s10 = scalar_select %p8324_p12, 1, 0 }
  0x26   : > { %10503 = sst [smem:[#allocation21_spill]] %s8329_s11  ;;  %p351_p0 = scmp.lt.s32.totalorder %s8157_s17, 5 }
  0x27   : > { %10502 = sst [smem:[#allocation20_spill]] %s10501_s10  ;;  %p8336_p1 = scmp.eq.s32.totalorder %s6471_s18, 0 }
  0x28   : > { %s8332_s8 = scalar_select %p47_p11, %s8137_s29, %s49_s22  }
  0x29   : > { %s10505_s6 = scalar_select %p8336_p1, 1, 0 }
  0x2a   : > { %10504 = sst [smem:[#allocation22_spill]] %s8332_s8  ;;  %p8340_p2 = pnand %p6473_p13, %p351_p0 }
  0x2b   : > { %s8159_s12 = smov [#allocation7]   ;;  %s7955_s23 = scalar_lea.hbm %s10397_s7, 32768 }
  0x2c   : > { %s10506_s19 = scalar_select %p8340_p2, 1, 0 }
  0x2d   : > { %s391_s20 = sshll.u32 %s8159_s12, 4  ;;  %p7319_p4 = pneg %p8340_p2  ;;  %s392_s20 = int_to_ptr.vmem [resolvable:$true] %s391_s20 }
  0x2e   : > { %p7956_p6 = scmp.ne.s32.totalorder %s10397_s7, %s7955_s23  ;;  %p7962_p11 = scmp.lt.u32.totalorder %s7955_s23, %s10397_s7 }
  0x2f   : > { %p8348_p5 = pnand %p8336_p1, %p7319_p4 }
  0x31   : > { %p8360_p8 = pneg %p8348_p5 }
  0x33   : > { %p7958_p9 = pnand %p8360_p8, %p7956_p6 }
  0x35   : > { %p7959_p10 = pneg %p7958_p9 }
  0x37   : > { %p7964_p13 = pnand %p7962_p11, %p7959_p10 }
  0x39   : > { %7967 = shalt.err (!%p7964_p13)
}
  0x3a   : > { %s7968_s18 = scalar_lea.vmem %s392_s20, 32768  ;;  %p7976_p7 = scmp.lt.s32.totalorder %s392_s20, %s392_s20 }
  0x3b   : > { %p7969_p0 = scmp.ne.s32.totalorder %s392_s20, %s7968_s18  ;;  %p7977_p1 = scmp.lt.s32.totalorder %s7968_s18, %s7968_s18 }
  0x3d   : > { %p7971_p4 = pnand %p7969_p0, %p8360_p8  ;;  %p7978_p2 = por %p7977_p1, %p7976_p7 }
  0x3f   : > { %p7972_p12 = pneg %p7971_p4 }
  0x41   : > { %p7979_p3 = pnand %p7978_p2, %p7972_p12 }
  0x43   : > { %7982 = shalt.err (!%p7979_p3)
}
  0x44   : > { %s8160_s8 = smov 256   ;;  %s8161_s21 = smov 16  }
  0x45   : > { %7325 = dma.hbm_to_vmem [thread:$0]  (!%p8348_p5), %s10397_s7, 32768, %s392_s20, [#allocation8], %s8160_s8, %s8160_s8, %s8161_s21  }
  0x46   : > { %s8162_s22 = smov [#allocation4]   ;;  %s7983_s14 = scalar_lea.hbm %s10395_s5, 8192 }
  0x47   : > { %s375_s23 = sshll.u32 %s8162_s22, 4  ;;  %p7984_p3 = scmp.ne.s32.totalorder %s10395_s5, %s7983_s14  ;;  %s376_s23 = int_to_ptr.vmem [resolvable:$true] %s375_s23 }
  0x48   : > { %p7990_p1 = scmp.lt.u32.totalorder %s7983_s14, %s10395_s5 }
  0x49   : > { %p7986_p7 = pnand %p7984_p3, %p8360_p8 }
  0x4b   : > { %p7987_p12 = pneg %p7986_p7 }
  0x4d   : > { %p7992_p2 = pnand %p7990_p1, %p7987_p12 }
  0x4f   : > { %7995 = shalt.err (!%p7992_p2)
}
  0x50   : > { %s7996_s20 = scalar_lea.vmem %s376_s23, 8192  ;;  %p8004_p11 = scmp.lt.s32.totalorder %s376_s23, %s376_s23 }
  0x51   : > { %p7997_p6 = scmp.ne.s32.totalorder %s376_s23, %s7996_s20  ;;  %p8005_p13 = scmp.lt.s32.totalorder %s7996_s20, %s7996_s20 }
  0x53   : > { %p7999_p9 = pnand %p7997_p6, %p8360_p8  ;;  %p8006_p0 = por %p8005_p13, %p8004_p11 }
  0x55   : > { %p8000_p10 = pneg %p7999_p9 }
  0x57   : > { %p8007_p4 = pnand %p8006_p0, %p8000_p10 }
  0x59   : > { %8010 = shalt.err (!%p8007_p4)
}
  0x5a   : > { %s8163_s3 = smov 512   ;;  %s8164_s10 = smov 32  }
  0x5b   : > { %7322 = dma.hbm_to_vmem [thread:$0]  (!%p8348_p5), %s10395_s5, 8192, %s376_s23, [#allocation5], %s8163_s3, %s8163_s3, %s8164_s10  }
  0x5c   : > { %s8165_s25 = smov [#allocation9]   ;;  %s8011_s11 = scalar_lea.hbm %s10399_s9, 8192 }
  0x5d   : > { %s407_s14 = sshll.u32 %s8165_s25, 4  ;;  %p8012_p3 = scmp.ne.s32.totalorder %s10399_s9, %s8011_s11  ;;  %s408_s14 = int_to_ptr.vmem [resolvable:$true] %s407_s14 }
  0x5e   : > { %p8018_p1 = scmp.lt.u32.totalorder %s8011_s11, %s10399_s9 }
  0x5f   : > { %p8014_p7 = pnand %p8012_p3, %p8360_p8 }
  0x61   : > { %p8015_p12 = pneg %p8014_p7 }
  0x63   : > { %p8020_p2 = pnand %p8018_p1, %p8015_p12 }
  0x65   : > { %8023 = shalt.err (!%p8020_p2)
}
  0x66   : > { %s8024_s23 = scalar_lea.vmem %s408_s14, 8192  ;;  %p8032_p11 = scmp.lt.s32.totalorder %s408_s14, %s408_s14 }
  0x67   : > { %p8025_p6 = scmp.ne.s32.totalorder %s408_s14, %s8024_s23  ;;  %p8033_p13 = scmp.lt.s32.totalorder %s8024_s23, %s8024_s23 }
  0x69   : > { %p8027_p9 = pnand %p8025_p6, %p8360_p8  ;;  %p8034_p0 = por %p8033_p13, %p8032_p11 }
  0x6b   : > { %p8028_p10 = pneg %p8027_p9 }
  0x6d   : > { %p8035_p4 = pnand %p8034_p0, %p8028_p10 }
  0x6f   : > { %8038 = shalt.err (!%p8035_p4)
}
  0x70   : > { %s8166_s3 = smov 128   ;;  %s8167_s10 = smov 8  }
  0x71   : > { %7328 = dma.hbm_to_vmem [thread:$0]  (!%p8348_p5), %s10399_s9, 8192, %s408_s14, [#allocation8], %s8166_s3, %s8166_s3, %s8167_s10  }
  0x72   : > { %p6477_p3 = scmp.ge.s32.totalorder %s8157_s17, 4 }
  0x73   : > { %p10509_p7 = scmp.ne.s32.totalorder (!%p6477_p3), %s10497_s24, 0 }
  0x74   : > { %426 = sbr.rel (%p6477_p3) target bundleno = 132 (0x84), region = 64 }
  0x7b   : > { %429 = sbr.rel (!%p10509_p7) target bundleno = 132 (0x84), region = 68  ;;  %s431_s12 = sand.u32 (%p10509_p7), 1, %s8137_s29  }
  0x7c   : > { %s7303_s25 = smul.u32 (%p10509_p7), 6, %s8153_s16 }
  0x7d   : > { %s7302_s8 = smul.u32 (%p10509_p7), 24, %s431_s12 }
  0x7e   : > { %s435_s21 = sadd.s32 (%p10509_p7), %s8149_s15, %s7303_s25 }
  0x7f   : > { %s6478_s11 = sshll.u32 (%p10509_p7), %s435_s21, 3  ;;  %s433_s14 = scalar_lea.vmem (%p10509_p7), [#allocation3], %s7302_s8 }
  0x80   : > { %s437_s22 = scalar_lea.vmem (%p10509_p7), %s10390_s0, %s6478_s11 }
  0x81   : > { %v469_v0 = vld [vmem:[%s437_s22] sm:$0xff] (%p10509_p7)  ;;  %v471_v1 = vld [vmem:[%s437_s22 + $0x10] sm:$0xff] (%p10509_p7) }
  0x82   : > { %v473_v2 = vld [vmem:[%s437_s22 + $0x20] sm:$0xff]  ;;  %470 = vst [vmem:[%s433_s14] sm:$0xff] %v469_v0  ;;  %472 = vst [vmem:[%s433_s14 + $0x8] sm:$0xff] %v471_v1 }
  0x83   : > { %474 = vst [vmem:[%s433_s14 + $0x10] sm:$0xff] %v473_v2 }
  0x84 PF: > { %p10510_p5 = scmp.ne.s32.totalorder %s10506_s19, 0 }
  0x86   : > { %483 = sbr.rel (%p10510_p5) target bundleno = 2178 (0x882), region = 106 }
  0x8d   : > { %s486_s24 = sand.u32 1, %s8133_s28   ;;  %p10511_p8 = scmp.ne.s32.totalorder %s10505_s6, 0 }
  0x8e   : > { %s7304_s18 = smul.u32 24, %s486_s24 }
  0x90   : > { %s8424_s20 = scalar_lea.vmem [#allocation3], %s7304_s18 }
  0x91   : > { %8108 = dma.done.wait (%p10511_p8), [#allocation5], 8192  }
  0x92   : > { %8110 = vsyncadd (%p10511_p8), [#allocation5], 4294959104 }
  0x93   : > { %8112 = dma.done.wait (%p10511_p8), [#allocation8], 40960  }
  0x94   : > { %8114 = vsyncadd (%p10511_p8), [#allocation8], 4294926336  ;;  %s538_s19 = sand.u32 1, %s8125_s26   ;;  %p6483_p12 = scmp.ne.s32.totalorder %s8141_s30, 0 }
  0x95   : > { %s8437_s23 = scalar_lea.vmem [#allocation10], %s538_s19  ;;  %v8168_v3 = vmov (!%p6483_p12), -inf  }
  0x96   : > { %544 = sbr.rel (%p6483_p12) target bundleno = 157 (0x9d), region = 126  ;;  %545 = vst [vmem:[#allocation2] sm:$0xff] (!%p6483_p12), %v8168_v3 }
  0x9d PF: > { %v549_v4 = vld [vmem:[%s10391_s1] sm:$0xff]  ;;  %v8169_v5 = vmov 2   ;;  %v8170_v6 = vmov 1   ;;  %v551_v7 = vld [vmem:[%s10391_s1 + $0x10] sm:$0xff]  ;;  %v550_v8 = vld [vmem:[%s10391_s1 + $0x8] sm:$0xff]  ;;  %v10420_v12 = vmov 0   ;;  %v637_v39 = vlaneseq }
  0x9e   : > { %7435 = vset.pattern.permute.xlu0 %v8169_v5  ;;  %7434 = vset.pattern.permute.xlu1 %v8170_v6  ;;  %v554_v9 = vld [vmem:[%s10391_s1 + $0x28] sm:$0xff]  ;;  %v553_v10 = vld [vmem:[%s10391_s1 + $0x20] sm:$0xff]  ;;  %v556_v11 = vld [vmem:[%s10391_s1 + $0x38] sm:$0xff]  ;;  %s10512_s18 = sld [smem:[#allocation93_spill]]  ;;  %s10513_s11 = sld [smem:[#allocation95_spill]]  ;;  %vm933_vm0 = vcmask 523264  }
  0x9f   : > { %702 = vperm.xlu0 %7435, %v549_v4   ;;  %650 = vperm.xlu1 %7434, %v549_v4   ;;  %v552_v13 = vld [vmem:[%s10391_s1 + $0x18] sm:$0xff]  ;;  %v555_v16 = vld [vmem:[%s10391_s1 + $0x30] sm:$0xff]  ;;  %s10514_s8 = sld [smem:[#allocation94_spill]]  ;;  %v8556_v41 = vshrl.u32 %v637_v39, 7  ;;  %v546_v58 = vld [vmem:[%s8424_s20] sm:$0xff]  ;;  %s10670_s21 = sld [smem:[#allocation96_spill]] }
  0xa0   : > { %v547_v44 = vld [vmem:[%s8424_s20 + $0x8] sm:$0xff]  ;;  %v548_v57 = vld [vmem:[%s8424_s20 + $0x10] sm:$0xff]  ;;  %p6620_p1 = scmp.ne.s32.totalorder %s8141_s30, 1 }
  0xa1   : > { %10515 = vst [vmem:[#allocation23_spill] sm:$0xff] %v8556_v41  ;;  %v8559_v42 = vsub.s32 4, %v8556_v41  ;;  %v8562_v43 = vsub.s32 5, %v8556_v41  ;;  %v8566_v45 = vsub.s32 6, %v8556_v41  ;;  %v8569_v46 = vsub.s32 7, %v8556_v41  ;;  %s10688_s13 = sld [smem:[#allocation97_spill]] (!%p6620_p1) }
  0xa2   : > { %v8572_v47 = vsub.s32 0, %v8556_v41  ;;  %v8575_v48 = vsub.s32 1, %v8556_v41  ;;  %v8578_v49 = vsub.s32 2, %v8556_v41  ;;  %v8587_v54 = vsub.s32 3, %v8556_v41  ;;  %s10689_s24 = sld [smem:[#allocation99_spill]] (!%p6620_p1)  ;;  %s10690_s6 = sld [smem:[#allocation98_spill]] (!%p6620_p1) }
  0xa3   : > { %710 = vperm.xlu0 %7435, %v551_v7   ;;  %654 = vperm.xlu1 %7434, %v550_v8   ;;  %10516 = vst [vmem:[#allocation24_spill] sm:$0xff] %v8559_v42  ;;  %10517 = vst [vmem:[#allocation25_spill] sm:$0xff] %v8562_v43  ;;  %v8581_v50 = vrot.slane %v547_v44, %v8559_v42  ;;  %v8584_v51 = vrot.slane %v547_v44, %v8562_v43  ;;  %s10691_s4 = sld [smem:[#allocation100_spill]] (!%p6620_p1) }
  0xa4   : > { %v557_v14 = vld [vmem:[%s10512_s18] sm:$0xff]  ;;  %v558_v15 = vld [vmem:[%s10512_s18 + $0x8] sm:$0xff]  ;;  %v564_v18 = vld [vmem:[%s10512_s18 + $0x38] sm:$0xff]  ;;  %10518 = vst [vmem:[#allocation26_spill] sm:$0xff] %v8566_v45  ;;  %v8590_v55 = vrot.slane %v547_v44, %v8566_v45  ;;  %v8593_v56 = vrot.slane %v547_v44, %v8569_v46  ;;  %v8598_v59 = vrot.slane %v547_v44, %v8572_v47  ;;  %v8601_v60 = vrot.slane %v547_v44, %v8575_v48 }
  0xa5   : > { %v561_v17 = vld [vmem:[%s10512_s18 + $0x20] sm:$0xff]  ;;  %v582_v19 = vld [vmem:[%s10513_s11 + $0x8] sm:$0xff]  ;;  %v584_v20 = vld [vmem:[%s10513_s11 + $0x18] sm:$0xff]  ;;  %10519 = vst [vmem:[#allocation27_spill] sm:$0xff] %v8569_v46  ;;  %v8604_v61 = vrot.slane %v547_v44, %v8578_v49  ;;  %v8613_v2 = vrot.slane %v548_v57, %v8572_v47  ;;  %v8616_v3 = vrot.slane %v547_v44, %v8587_v54 }
  0xa6   : > { %v559_v21 = vld [vmem:[%s10512_s18 + $0x10] sm:$0xff]  ;;  %v586_v22 = vld [vmem:[%s10513_s11 + $0x28] sm:$0xff]  ;;  %v560_v23 = vld [vmem:[%s10512_s18 + $0x18] sm:$0xff]  ;;  %10520 = vst [vmem:[#allocation28_spill] sm:$0xff] %v8572_v47 }
  0xa7   : > { %722 = vperm.xlu0 %7435, %v554_v9   ;;  %7436 = vset.pattern.permute.xlu1 %v8169_v5  ;;  %v588_v24 = vld [vmem:[%s10513_s11 + $0x38] sm:$0xff]  ;;  %v590_v25 = vld [vmem:[%s10513_s11 + $0x48] sm:$0xff]  ;;  %v563_v30 = vld [vmem:[%s10512_s18 + $0x30] sm:$0xff]  ;;  %10521 = vst [vmem:[#allocation29_spill] sm:$0xff] %v8575_v48 }
  0xa8   : > { %706 = vperm.xlu1 %7436, %v550_v8   ;;  %v592_v26 = vld [vmem:[%s10513_s11 + $0x58] sm:$0xff]  ;;  %v594_v27 = vld [vmem:[%s10513_s11 + $0x68] sm:$0xff]  ;;  %v581_v31 = vld [vmem:[%s10513_s11] sm:$0xff]  ;;  %10522 = vst [vmem:[#allocation30_spill] sm:$0xff] %v8578_v49 }
  0xa9   : > { %v596_v28 = vld [vmem:[%s10513_s11 + $0x78] sm:$0xff]  ;;  %v562_v29 = vld [vmem:[%s10512_s18 + $0x28] sm:$0xff]  ;;  %v583_v32 = vld [vmem:[%s10513_s11 + $0x10] sm:$0xff]  ;;  %10523 = vst [vmem:[#allocation31_spill] sm:$0xff] %v8581_v50 }
  0xaa   : > { %v7449_v33 = vld [vmem:[%s10514_s8] sm:$0xff]   ;;  %v587_v35 = vld [vmem:[%s10513_s11 + $0x30] sm:$0xff]  ;;  %10524 = vst [vmem:[#allocation32_spill] sm:$0xff] %v8584_v51  ;;  %10525 = vst [vmem:[#allocation33_spill] sm:$0xff] %v8587_v54 }
  0xab   : > { %7443 = vset.pattern.permute.xlu0 %v8170_v6  ;;  %v585_v34 = vld [vmem:[%s10513_s11 + $0x20] sm:$0xff]  ;;  %7086 = vmatprep.mubr.msk.bf16.mxu0 %vm933_vm0, %v7449_v33  ;;  %v591_v37 = vld [vmem:[%s10513_s11 + $0x50] sm:$0xff]  ;;  %10526 = vst [vmem:[#allocation34_spill] sm:$0xff] %v8590_v55  ;;  %10527 = vst [vmem:[#allocation35_spill] sm:$0xff] %v8593_v56 }
  0xac   : > { %666 = vperm.xlu0 %7443, %v553_v10   ;;  %7437 = vset.pattern.permute.xlu1 %v10420_v12  ;;  %v589_v36 = vld [vmem:[%s10513_s11 + $0x40] sm:$0xff]  ;;  %v595_v40 = vld [vmem:[%s10513_s11 + $0x70] sm:$0xff] }
  0xad   : > { %609 = vperm.xlu1 %7437, %v551_v7   ;;  %7110 = vmatprep.mubr.msk.bf16.mxu1 %vm933_vm0, %v7449_v33  ;;  %v593_v38 = vld [vmem:[%s10513_s11 + $0x60] sm:$0xff] }
  0xb0   : > { %678 = vperm.xlu0 %7443, %v556_v11  }
  0xb1   : > { %7438 = vset.pattern.permute.xlu1 %v8170_v6 }
  0xb2   : > { %658 = vperm.xlu1 %7438, %v551_v7   ;;  %v8628_v7 = vrot.slane %v548_v57, %v8575_v48 }
  0xb4   : > { %7446 = vset.pattern.permute.xlu0 %v10420_v12 }
  0xb5   : > { %599 = vperm.xlu0 %7446, %v549_v4  }
  0xb6   : > { %662 = vperm.xlu1 %7438, %v552_v13  }
  0xb9   : > { %604 = vperm.xlu0 %7446, %v550_v8   ;;  %v8631_v8 = vrot.slane %v548_v57, %v8578_v49 }
  0xba   : > { %7439 = vset.pattern.permute.xlu1 %v8169_v5 }
  0xbb   : > { %714 = vperm.xlu1 %7439, %v552_v13  }
  0xbd   : > { %614 = vperm.xlu0 %7446, %v552_v13   ;;  %v8643_v13 = vrot.slane %v546_v58, %v8587_v54 }
  0xbf   : > { %7440 = vset.pattern.permute.xlu1 %v10420_v12 }
  0xc0   : > { %755 = vperm.xlu1 %7440, %v557_v14   ;;  %v8646_v14 = vrot.slane %v546_v58, %v8559_v42 }
  0xc1   : > { %760 = vperm.xlu0 %7446, %v558_v15  }
  0xc4   : > { %619 = vperm.xlu1 %7440, %v553_v10  }
  0xc5   : > { %629 = vperm.xlu0 %7446, %v555_v16  }
  0xc8   : > { %624 = vperm.xlu1 %7440, %v554_v9  }
  0xc9   : > { %775 = vperm.xlu0 %7446, %v561_v17  }
  0xcc   : > { %7441 = vset.pattern.permute.xlu1 %v8170_v6 }
  0xcd   : > { %790 = vperm.xlu0 %7446, %v564_v18   ;;  %670 = vperm.xlu1 %7441, %v554_v9   ;;  %v8634_v9 = vrot.slane %v548_v57, %v8587_v54  ;;  %v8658_v18 = vrot.slane %v548_v57, %v8562_v43 }
  0xcf   : > { %10533 = vst [vmem:[#allocation41_spill] sm:$0xff] %v8658_v18 }
  0xd1   : > { %820 = vperm.xlu0 %7446, %v582_v19   ;;  %7442 = vset.pattern.permute.xlu1 %v8169_v5 }
  0xd2   : > { %718 = vperm.xlu1 %7442, %v553_v10   ;;  %v8637_v10 = vrot.slane %v546_v58, %v8575_v48 }
  0xd5   : > { %830 = vperm.xlu0 %7446, %v584_v20   ;;  %v8663_v20 = vrot.slane %v546_v58, %v8562_v43 }
  0xd6   : > { %7444 = vset.pattern.permute.xlu1 %v10420_v12 }
  0xd7   : > { %765 = vperm.xlu1 %7444, %v559_v21   ;;  %v8666_v21 = vrot.slane %v546_v58, %v8566_v45 }
  0xd9   : > { %840 = vperm.xlu0 %7446, %v586_v22   ;;  %10534 = vst [vmem:[#allocation42_spill] sm:$0xff] %v8666_v21 }
  0xdb   : > { %770 = vperm.xlu1 %7444, %v560_v23  }
  0xdd   : > { %850 = vperm.xlu0 %7446, %v588_v24  }
  0xdf   : > { %634 = vperm.xlu1 %7444, %v556_v11  }
  0xe1   : > { %860 = vperm.xlu0 %7446, %v590_v25  }
  0xe3   : > { %7445 = vset.pattern.permute.xlu1 %v8170_v6  ;;  %v8625_v6 = vrot.slane %v546_v58, %v8572_v47 }
  0xe4   : > { %674 = vperm.xlu1 %7445, %v555_v16  }
  0xe5   : > { %870 = vperm.xlu0 %7446, %v592_v26   ;;  %v8678_v26 = vrot.slane %v548_v57, %v8566_v45 }
  0xe7   : > { %10537 = vst [vmem:[#allocation45_spill] sm:$0xff] %v8678_v26 }
  0xe8   : > { %7447 = vset.pattern.permute.xlu1 %v8169_v5 }
  0xe9   : > { %880 = vperm.xlu0 %7446, %v594_v27   ;;  %726 = vperm.xlu1 %7447, %v555_v16   ;;  %v8652_v16 = vrot.slane %v548_v57, %v8559_v42  ;;  %v8681_v27 = vrot.slane %v546_v58, %v8569_v46 }
  0xeb   : > { %10531 = vst [vmem:[#allocation39_spill] sm:$0xff] %v8652_v16  ;;  %10538 = vst [vmem:[#allocation46_spill] sm:$0xff] %v8681_v27 }
  0xed   : > { %890 = vperm.xlu0 %7446, %v596_v28   ;;  %730 = vperm.xlu1 %7447, %v556_v11   ;;  %v8640_v11 = vrot.slane %v546_v58, %v8578_v49  ;;  %v8684_v28 = vrot.slane %v548_v57, %v8569_v46 }
  0xef   : > { %10539 = vst [vmem:[#allocation47_spill] sm:$0xff] %v8684_v28 }
  0xf1   : > { %7448 = vset.pattern.permute.xlu1 %v10420_v12 }
  0xf2   : > { %780 = vperm.xlu1 %7448, %v562_v29  }
  0xf6   : > { %785 = vperm.xlu1 %7448, %v563_v30  }
  0xfa   : > { %815 = vperm.xlu1 %7448, %v581_v31  }
  0xfe   : > { %825 = vperm.xlu1 %7448, %v583_v32  }
 0x102   : > { %835 = vperm.xlu1 %7448, %v585_v34  }
 0x106   : > { %845 = vperm.xlu1 %7448, %v587_v35  }
 0x10a   : > { %855 = vperm.xlu1 %7448, %v589_v36  }
 0x10e   : > { %865 = vperm.xlu1 %7448, %v591_v37  }
 0x112   : > { %875 = vperm.xlu1 %7448, %v593_v38  }
 0x116   : > { %885 = vperm.xlu1 %7448, %v595_v40  }
 0x11e   : > { %v651_v52 = vpop.permute.xlu1 %650  ;;  %v703_v53 = vpop.permute.xlu0 %702 }
 0x11f   : > { %v8607_v62 = vmul.f32 %v8581_v50, %v651_v52  ;;  %v8610_v63 = vmul.f32 %v8584_v51, %v651_v52  ;;  %v8619_v4 = vmul.f32 %v8590_v55, %v651_v52  ;;  %v8622_v5 = vmul.f32 %v8593_v56, %v651_v52 }
 0x120   : > { %v8675_v25 = vmul.f32 %v8598_v59, %v651_v52  ;;  %v8687_v29 = vmul.f32 %v8613_v2, %v703_v53  ;;  %v8690_v30 = vmul.f32 %v8601_v60, %v651_v52  ;;  %v8693_v31 = vmul.f32 %v8628_v7, %v703_v53 }
 0x121   : > { %10528 = vst [vmem:[#allocation36_spill] sm:$0xff] %v8610_v63  ;;  %10529 = vst [vmem:[#allocation37_spill] sm:$0xff] %v8619_v4  ;;  %v8696_v32 = vmul.f32 %v8604_v61, %v651_v52  ;;  %v8699_v33 = vmul.f32 %v8631_v8, %v703_v53  ;;  %v8702_v34 = vmul.f32 %v8616_v3, %v651_v52 }
 0x122   : > { %v655_v0 = vpop.permute.xlu1 %654  ;;  %v711_v1 = vpop.permute.xlu0 %710  ;;  %10530 = vst [vmem:[#allocation38_spill] sm:$0xff] %v8622_v5  ;;  %v8705_v35 = vmul.f32 %v8634_v9, %v703_v53  ;;  %v8708_v36 = vmul.f32 %v8652_v16, %v703_v53  ;;  %v8714_v38 = vmul.f32 %v8658_v18, %v703_v53  ;;  %v8717_v39 = vmul.f32 %v8678_v26, %v703_v53 }
 0x123   : > { %v8649_v15 = vmul.f32 %v8581_v50, %v655_v0  ;;  %v8655_v17 = vmul.f32 %v8584_v51, %v655_v0  ;;  %v8669_v22 = vmul.f32 %v8590_v55, %v655_v0  ;;  %v8672_v23 = vmul.f32 %v8593_v56, %v655_v0 }
 0x124   : > { %v8711_v37 = vmul.f32 %v8598_v59, %v655_v0  ;;  %10540 = vst [vmem:[#allocation48_spill] sm:$0xff] %v8714_v38  ;;  %10541 = vst [vmem:[#allocation49_spill] sm:$0xff] %v8717_v39  ;;  %v8720_v40 = vmul.f32 %v8684_v28, %v703_v53  ;;  %v8723_v52 = vmul.f32 %v8601_v60, %v655_v0 }
 0x125   : > { %10532 = vst [vmem:[#allocation40_spill] sm:$0xff] %v8655_v17  ;;  %10535 = vst [vmem:[#allocation43_spill] sm:$0xff] %v8669_v22  ;;  %v8726_v57 = vmul.f32 %v8613_v2, %v711_v1  ;;  %v8729_v58 = vmul.f32 %v8628_v7, %v711_v1  ;;  %v8732_v12 = vmul.f32 %v8604_v61, %v655_v0 }
 0x126   : > { %v8660_v19 = vpop.permute.xlu0 %722  ;;  %10536 = vst [vmem:[#allocation44_spill] sm:$0xff] %v8672_v23  ;;  %10542 = vst [vmem:[#allocation50_spill] sm:$0xff] %v8720_v40  ;;  %v8737_v46 = vmul.f32 %v8616_v3, %v655_v0  ;;  %v1310_v53 = vmul.f32 %v8631_v8, %v711_v1  ;;  %v1511_v45 = vmul.f32 %v8634_v9, %v711_v1 }
 0x127   : > { %v707_v24 = vpop.permute.xlu1 %706  ;;  %v8742_v43 = vmul.f32 %v8652_v16, %v711_v1  ;;  %v8746_v42 = vmul.f32 %v8613_v2, %v8660_v19  ;;  %v8749_v54 = vmul.f32 %v8658_v18, %v711_v1  ;;  %v8752_v48 = vmul.f32 %v8678_v26, %v711_v1 }
 0x128   : > { %v8755_v0 = vmul.f32 %v8684_v28, %v711_v1  ;;  %v8759_v49 = vmul.f32 %v8628_v7, %v8660_v19  ;;  %v8763_v47 = vmul.f32 %v8631_v8, %v8660_v19  ;;  %v8777_v1 = vmul.f32 %v8628_v7, %v707_v24 }
 0x129   : > { %10544 = vst [vmem:[#allocation52_spill] sm:$0xff] %v8742_v43  ;;  %10545 = vst [vmem:[#allocation53_spill] sm:$0xff] %v8746_v42  ;;  %v8784_v39 = vmul.f32 %v8634_v9, %v8660_v19  ;;  %v8787_v22 = vmul.f32 %v8634_v9, %v707_v24  ;;  %v8790_v4 = vmul.f32 %v8652_v16, %v707_v24 }
 0x12a   : > { %10546 = vst [vmem:[#allocation54_spill] sm:$0xff] %v8749_v54  ;;  %10547 = vst [vmem:[#allocation55_spill] sm:$0xff] %v8752_v48  ;;  %v8774_v48 = vmul.f32 %v8613_v2, %v707_v24  ;;  %v8793_v27 = vmul.f32 %v8658_v18, %v707_v24  ;;  %v8801_v54 = vmul.f32 %v8658_v18, %v8660_v19 }
 0x12b   : > { %v667_v44 = vpop.permute.xlu0 %666  ;;  %10548 = vst [vmem:[#allocation56_spill] sm:$0xff] %v8755_v0  ;;  %10549 = vst [vmem:[#allocation57_spill] sm:$0xff] %v8759_v49  ;;  %v8780_v0 = vmul.f32 %v8631_v8, %v707_v24  ;;  %v8833_v17 = vmul.f32 %v8684_v28, %v707_v24 }
 0x12c   : > { %v8734_v41 = vpop.permute.xlu1 %609  ;;  %10550 = vst [vmem:[#allocation58_spill] sm:$0xff] %v8763_v47  ;;  %v8766_v40 = vmul.f32 %v8581_v50, %v667_v44  ;;  %v8769_v23 = vmul.f32 %v8584_v51, %v667_v44  ;;  %10554 = vst [vmem:[#allocation62_spill] sm:$0xff] %v8784_v39  ;;  %v8804_v39 = vmul.f32 %v8678_v26, %v707_v24 }
 0x12d   : > { %10543 = vst [vmem:[#allocation51_spill] sm:$0xff] %v8734_v41  ;;  %10555 = vst [vmem:[#allocation63_spill] sm:$0xff] %v8793_v27  ;;  %v8807_v47 = vmul.f32 %v8590_v55, %v667_v44  ;;  %v8810_v43 = vmul.f32 %v8593_v56, %v667_v44  ;;  %v1278_v49 = vmul.f32 %v8640_v11, %v8734_v41 }
 0x12e   : > { %10551 = vst [vmem:[#allocation59_spill] sm:$0xff] %v8766_v40  ;;  %10552 = vst [vmem:[#allocation60_spill] sm:$0xff] %v8769_v23  ;;  %v8797_v23 = vmul.f32 %v8652_v16, %v8660_v19  ;;  %v8860_v24 = vmul.f32 %v8684_v28, %v8660_v19 }
 0x12f   : > { %v8771_v5 = vpop.permute.xlu0 %678  ;;  %10557 = vst [vmem:[#allocation65_spill] sm:$0xff] %v8801_v54  ;;  %10558 = vst [vmem:[#allocation66_spill] sm:$0xff] %v8804_v39 }
 0x130   : > { %10553 = vst [vmem:[#allocation61_spill] sm:$0xff] %v8771_v5  ;;  %10556 = vst [vmem:[#allocation64_spill] sm:$0xff] %v8797_v23  ;;  %v1479_v23 = vmul.f32 %v8643_v13, %v8734_v41 }
 0x131   : > { %v659_v40 = vpop.permute.xlu1 %658  ;;  %10559 = vst [vmem:[#allocation67_spill] sm:$0xff] %v8807_v47  ;;  %10560 = vst [vmem:[#allocation68_spill] sm:$0xff] %v8810_v43 }
 0x132   : > { %v1290_v16 = vmul.f32 %v8604_v61, %v659_v40  ;;  %v1491_v18 = vmul.f32 %v8616_v3, %v659_v40  ;;  %v8819_v54 = vmul.f32 %v8581_v50, %v659_v40  ;;  %v8822_v39 = vmul.f32 %v8584_v51, %v659_v40  ;;  %10565 = vst [vmem:[#allocation73_spill] sm:$0xff] %v8833_v17 }
 0x133   : > { %v8825_v47 = vmul.f32 %v8590_v55, %v659_v40  ;;  %v8828_v43 = vmul.f32 %v8593_v56, %v659_v40  ;;  %v8837_v50 = vmul.f32 %v8678_v26, %v8660_v19  ;;  %10569 = vst [vmem:[#allocation77_spill] sm:$0xff] %v8860_v24  ;;  %v8867_v17 = vmul.f32 %v8616_v3, %v667_v44 }
 0x134   : > { %10561 = vst [vmem:[#allocation69_spill] sm:$0xff] %v8822_v39  ;;  %v8830_v42 = vpop.permute.xlu0 %599  ;;  %v1298_v27 = vadd.f32 %v1290_v16, %v1278_v49  ;;  %v1499_v38 = vadd.f32 %v1491_v18, %v1479_v23  ;;  %v8850_v16 = vmul.f32 %v8598_v59, %v667_v44  ;;  %v8853_v18 = vmul.f32 %v8601_v60, %v667_v44 }
 0x135   : > { %10562 = vst [vmem:[#allocation70_spill] sm:$0xff] %v8825_v47  ;;  %10563 = vst [vmem:[#allocation71_spill] sm:$0xff] %v8828_v43  ;;  %v8839_v63 = vpop.permute.xlu1 %662  ;;  %v641_v55 = vmul.f32 %v8625_v6, %v8830_v42  ;;  %v1075_v56 = vmul.f32 %v8637_v10, %v8830_v42  ;;  %v1276_v43 = vmul.f32 %v8640_v11, %v8830_v42 }
 0x136   : > { %10564 = vst [vmem:[#allocation72_spill] sm:$0xff] %v8830_v42  ;;  %10566 = vst [vmem:[#allocation74_spill] sm:$0xff] %v8837_v50  ;;  %v1477_v49 = vmul.f32 %v8643_v13, %v8830_v42  ;;  %v8856_v23 = vmul.f32 %v8604_v61, %v667_v44  ;;  %v643_v50 = vmul.f32 %v8625_v6, %v8734_v41 }
 0x137   : > { %10567 = vst [vmem:[#allocation75_spill] sm:$0xff] %v8853_v18  ;;  %v1296_v26 = vadd.f32 %v8696_v32, %v1276_v43  ;;  %v1077_v39 = vmul.f32 %v8637_v10, %v8734_v41  ;;  %v8875_v18 = vadd.f32 %v1511_v45, %v1499_v38  ;;  %v8879_v19 = vmul.f32 %v8646_v14, %v8734_v41 }
 0x138   : > { %10568 = vst [vmem:[#allocation76_spill] sm:$0xff] %v8856_v23  ;;  %v1497_v47 = vadd.f32 %v8702_v34, %v1477_v49  ;;  %v8869_v51 = vpop.permute.xlu0 %604  ;;  %v8873_v23 = vadd.f32 %v1310_v53, %v1298_v27  ;;  %v693_v32 = vadd.f32 %v8675_v25, %v641_v55  ;;  %v1095_v44 = vadd.f32 %v8690_v30, %v1075_v56 }
 0x139   : > { %10570 = vst [vmem:[#allocation78_spill] sm:$0xff] %v8869_v51  ;;  %10571 = vst [vmem:[#allocation79_spill] sm:$0xff] %v8875_v18  ;;  %v642_v43 = vmul.f32 %v8625_v6, %v8869_v51  ;;  %v1076_v34 = vmul.f32 %v8637_v10, %v8869_v51  ;;  %v1277_v45 = vmul.f32 %v8640_v11, %v8869_v51 }
 0x13a   : > { %v8887_v49 = vpop.permute.xlu1 %714  ;;  %v1316_v27 = vadd.f32 %v8699_v33, %v1296_v26  ;;  %v1478_v38 = vmul.f32 %v8643_v13, %v8869_v51  ;;  %v1517_v53 = vadd.f32 %v8705_v35, %v1497_v47  ;;  %v687_v25 = vmul.f32 %v8598_v59, %v659_v40 }
 0x13b   : > { %v694_v24 = vadd.f32 %v8711_v37, %v642_v43  ;;  %v1096_v55 = vadd.f32 %v8723_v52, %v1076_v34  ;;  %v1089_v56 = vmul.f32 %v8601_v60, %v659_v40  ;;  %v1297_v28 = vadd.f32 %v8732_v12, %v1277_v45 }
 0x13c   : > { %v8899_v30 = vpop.permute.xlu0 %614  ;;  %v1498_v18 = vadd.f32 %v8737_v46, %v1478_v38  ;;  %v8905_v26 = vmul.f32 %v8663_v20, %v8734_v41  ;;  %v8909_v47 = vmul.f32 %v8666_v21, %v8734_v41  ;;  %v8913_v33 = vmul.f32 %v8598_v59, %v8771_v5 }
 0x13d   : > { %v8917_v35 = vmul.f32 %v8601_v60, %v8771_v5  ;;  %v8921_v12 = vmul.f32 %v8604_v61, %v8771_v5  ;;  %v8925_v46 = vmul.f32 %v8616_v3, %v8771_v5  ;;  %v745_v37 = vadd.f32 %v8687_v29, %v693_v32 }
 0x13e   : > { %10572 = vst [vmem:[#allocation80_spill] sm:$0xff] %v8909_v47  ;;  %v1115_v40 = vadd.f32 %v8693_v31, %v1095_v44  ;;  %v1317_v52 = vadd.f32 %v8780_v0, %v1297_v28  ;;  %v1518_v43 = vadd.f32 %v8787_v22, %v1498_v18  ;;  %v746_v45 = vadd.f32 %v8774_v48, %v694_v24 }
 0x13f   : > { %10573 = vst [vmem:[#allocation81_spill] sm:$0xff] %v8921_v12  ;;  %10574 = vst [vmem:[#allocation82_spill] sm:$0xff] %v8925_v46  ;;  %v8931_v34 = vpop.permute.xlu1 %755  ;;  %v1116_v38 = vadd.f32 %v8777_v1, %v1096_v55  ;;  %v695_v47 = vadd.f32 %v687_v25, %v643_v50  ;;  %v1097_v21 = vadd.f32 %v1089_v56, %v1077_v39 }
 0x140   : > { %10575 = vst [vmem:[#allocation83_spill] sm:$0xff] %v8931_v34  ;;  %v8935_v41 = vpop.permute.xlu0 %760  ;;  %v793_v5 = vadd.f32 %v8931_v34, %v745_v37  ;;  %v1123_v29 = vadd.f32 %v1115_v40, %v8931_v34  ;;  %v1324_v31 = vadd.f32 %v1316_v27, %v8931_v34  ;;  %v1525_v28 = vadd.f32 %v1517_v53, %v8931_v34 }
 0x141   : > { %10576 = vst [vmem:[#allocation84_spill] sm:$0xff] %v8935_v41  ;;  %v794_v22 = vadd.f32 %v8935_v41, %v746_v45  ;;  %v1124_v0 = vadd.f32 %v1116_v38, %v8935_v41  ;;  %v644_v48 = vmul.f32 %v8625_v6, %v8899_v30  ;;  %v688_v50 = vmul.f32 %v8598_v59, %v8839_v63 }
 0x142   : > { %v801_v39 = vmax.f32 %v793_v5, 0.0  ;;  %v1131_v1 = vmax.f32 %v1123_v29, 0.0  ;;  %v1325_v18 = vadd.f32 %v1317_v52, %v8935_v41  ;;  %v1332_v24 = vmax.f32 %v1324_v31, 0.0 }
 0x143   : > { %v8948_v32 = vpop.permute.xlu1 %619  ;;  %v802_v44 = vmax.f32 %v794_v22, 0.0  ;;  %v1132_v27 = vmax.f32 %v1124_v0, 0.0  ;;  %v8951_v53 = vadd.f32 %v8726_v57, %v695_v47  ;;  %v1526_v55 = vadd.f32 %v1518_v43, %v8935_v41 }
 0x144   : > { %10577 = vst [vmem:[#allocation85_spill] sm:$0xff] %v8948_v32  ;;  %v1078_v25 = vmul.f32 %v8637_v10, %v8899_v30  ;;  %v1090_v56 = vmul.f32 %v8601_v60, %v8839_v63  ;;  %v1333_v5 = vmax.f32 %v1325_v18, 0.0  ;;  %v1533_v37 = vmax.f32 %v1525_v28, 0.0 }
 0x145   : > { %v809_v40 = vpack.c.bf16 %v802_v44, %v801_v39  ;;  %v1139_v52 = vpack.c.bf16 %v1132_v27, %v1131_v1  ;;  %v8959_v45 = vadd.f32 %v8729_v58, %v1097_v21  ;;  %v1291_v38 = vmul.f32 %v8604_v61, %v8839_v63 }
 0x146   : > { %v696_v57 = vadd.f32 %v688_v50, %v644_v48  ;;  %v8963_v47 = vpack.c.bf16 %v1333_v5, %v1332_v24  ;;  %v1534_v43 = vmax.f32 %v1526_v55, 0.0  ;;  %v1678_v29 = vmul.f32 %v8646_v14, %v8830_v42 }
 0x147   : > { %v8967_v31 = vpop.permute.xlu1 %624  ;;  %7078 = vmatprep.subr.bf16.mxu0 %v809_v40  ;;  %7102 = vmatprep.subr.bf16.mxu1 %v1139_v52  ;;  %v1279_v28 = vmul.f32 %v8640_v11, %v8899_v30  ;;  %v1492_v21 = vmul.f32 %v8616_v3, %v8839_v63  ;;  %v1679_v58 = vmul.f32 %v8646_v14, %v8869_v51 }
 0x148   : > { %10578 = vst [vmem:[#allocation86_spill] sm:$0xff] %v8963_v47  ;;  %10579 = vst [vmem:[#allocation87_spill] sm:$0xff] %v8967_v31  ;;  %7079 = vmatpush3.bf16.msra.mxu0 %v809_v40  ;;  %7103 = vmatpush3.bf16.msra.mxu1 %v1139_v52  ;;  %v740_v22 = vmul.f32 %v8613_v2, %v8887_v49  ;;  %v1098_v0 = vadd.f32 %v1090_v56, %v1078_v25  ;;  %v8994_v25 = vpop.permute.xlu0 %629  ;;  %v10593_v47 = vld [vmem:[#allocation31_spill] sm:$0xff] }
 0x149   : > { %v8977_v48 = vpack.c.bf16 %v1534_v43, %v1533_v37  ;;  %v1110_v50 = vmul.f32 %v8628_v7, %v8887_v49  ;;  %v645_v39 = vmul.f32 %v8625_v6, %v8948_v32  ;;  %v1311_v1 = vmul.f32 %v8631_v8, %v8887_v49  ;;  %10581 = vst [vmem:[#allocation89_spill] sm:$0xff] %v8994_v25 }
 0x14a   : > { %v1480_v18 = vmul.f32 %v8643_v13, %v8899_v30  ;;  %v8987_v24 = vadd.f32 %v740_v22, %v696_v57  ;;  %v1079_v44 = vmul.f32 %v8637_v10, %v8948_v32  ;;  %v1512_v27 = vmul.f32 %v8634_v9, %v8887_v49 }
 0x14b   : > { %10580 = vst [vmem:[#allocation88_spill] sm:$0xff] %v8977_v48  ;;  %v1698_v55 = vadd.f32 %v8607_v62, %v1678_v29  ;;  %v1299_v56 = vadd.f32 %v1291_v38, %v1279_v28  ;;  %v1699_v5 = vadd.f32 %v8649_v15, %v1679_v58  ;;  %v1879_v37 = vmul.f32 %v8663_v20, %v8830_v42 }
 0x14c   : > { %v1880_v40 = vmul.f32 %v8663_v20, %v8869_v51  ;;  %v9001_v52 = vpop.permute.xlu1 %670  ;;  %v9003_v57 = vadd.f32 %v1110_v50, %v1098_v0  ;;  %v9007_v43 = vmul.f32 %v8625_v6, %v8994_v25  ;;  %v1700_v38 = vadd.f32 %v8819_v54, %v8879_v19  ;;  %v10585_v50 = vld [vmem:[#allocation36_spill] sm:$0xff]  ;;  %v10587_v19 = vld [vmem:[#allocation75_spill] sm:$0xff] }
 0x14d   : > { %10582 = vst [vmem:[#allocation90_spill] sm:$0xff] %v9001_v52  ;;  %v1718_v62 = vadd.f32 %v8708_v36, %v1698_v55  ;;  %v697_v15 = vadd.f32 %v8850_v16, %v645_v39  ;;  %v9015_v29 = vmul.f32 %v8637_v10, %v8994_v25  ;;  %v1500_v28 = vadd.f32 %v1492_v21, %v1480_v18  ;;  %v10586_v36 = vld [vmem:[#allocation40_spill] sm:$0xff] }
 0x14e   : > { %10583 = vst [vmem:[#allocation91_spill] sm:$0xff] %v9007_v43  ;;  %v1280_v58 = vmul.f32 %v8640_v11, %v8948_v32  ;;  %v1719_v22 = vadd.f32 %v8790_v4, %v1699_v5  ;;  %v1899_v51 = vadd.f32 %v10585_v50, %v1879_v37  ;;  %v1900_v55 = vadd.f32 %v10586_v36, %v1880_v40  ;;  %v10588_v5 = vld [vmem:[#allocation48_spill] sm:$0xff]  ;;  %v10589_v37 = vld [vmem:[#allocation63_spill] sm:$0xff] }
 0x14f   : > { %10584 = vst [vmem:[#allocation92_spill] sm:$0xff] %v9015_v29  ;;  %v1726_v0 = vadd.f32 %v1718_v62, %v8931_v34  ;;  %v646_v54 = vmul.f32 %v8625_v6, %v8967_v31  ;;  %v1080_v16 = vmul.f32 %v8637_v10, %v8967_v31  ;;  %v1099_v39 = vadd.f32 %v10587_v19, %v1079_v44 }
 0x150   : > { %v9028_v21 = vadd.f32 %v1311_v1, %v1299_v56  ;;  %v690_v18 = vmul.f32 %v8598_v59, %v9001_v52  ;;  %v1727_v4 = vadd.f32 %v1719_v22, %v8935_v41  ;;  %v1919_v62 = vadd.f32 %v10588_v5, %v1899_v51  ;;  %v10591_v56 = vld [vmem:[#allocation76_spill] sm:$0xff] }
 0x151   : > { %v1920_v50 = vadd.f32 %v10589_v37, %v1900_v55  ;;  %v9035_v40 = vpop.permute.xlu1 %718  ;;  %v1092_v36 = vmul.f32 %v8601_v60, %v9001_v52  ;;  %v9039_v48 = vadd.f32 %v1512_v27, %v1500_v28  ;;  %v1281_v1 = vmul.f32 %v8640_v11, %v8967_v31 }
 0x152   : > { %10590 = vst [vmem:[#allocation36_spill] sm:$0xff] %v9035_v40  ;;  %v1734_v44 = vmax.f32 %v1726_v0, 0.0  ;;  %v1300_v19 = vadd.f32 %v10591_v56, %v1280_v58  ;;  %v1481_v22 = vmul.f32 %v8643_v13, %v8948_v32  ;;  %v1482_v51 = vmul.f32 %v8643_v13, %v8967_v31 }
 0x153   : > { %v1681_v55 = vmul.f32 %v8646_v14, %v8899_v30  ;;  %v1293_v5 = vmul.f32 %v8604_v61, %v9001_v52  ;;  %v1735_v27 = vmax.f32 %v1727_v4, 0.0  ;;  %v1927_v28 = vadd.f32 %v1919_v62, %v8931_v34 }
 0x154   : > { %v1928_v37 = vadd.f32 %v1920_v50, %v8935_v41  ;;  %v698_v0 = vadd.f32 %v690_v18, %v646_v54  ;;  %v1494_v58 = vmul.f32 %v8616_v3, %v9001_v52  ;;  %v9058_v56 = vmul.f32 %v8640_v11, %v8994_v25 }
 0x155   : > { %v1693_v42 = vmul.f32 %v10593_v47, %v8839_v63  ;;  %v741_v46 = vmul.f32 %v8613_v2, %v9035_v40  ;;  %v1100_v12 = vadd.f32 %v1092_v36, %v1080_v16  ;;  %v1111_v4 = vmul.f32 %v8628_v7, %v9035_v40 }
 0x156   : > { %10592 = vst [vmem:[#allocation40_spill] sm:$0xff] %v9058_v56  ;;  %v9066_v62 = vpack.c.bf16 %v1735_v27, %v1734_v44  ;;  %v9068_v54 = vpop.permute.xlu1 %765  ;;  %v1312_v18 = vmul.f32 %v8631_v8, %v9035_v40  ;;  %v1935_v50 = vmax.f32 %v1927_v28, 0.0  ;;  %v1936_v41 = vmax.f32 %v1928_v37, 0.0  ;;  %v10596_v44 = vld [vmem:[#allocation53_spill] sm:$0xff]  ;;  %v10597_v28 = vld [vmem:[#allocation39_spill] sm:$0xff] }
 0x157   : > { %v1701_v34 = vadd.f32 %v1693_v42, %v1681_v55  ;;  %v1301_v56 = vadd.f32 %v1293_v5, %v1281_v1  ;;  %v1501_v29 = vadd.f32 %v8867_v17, %v1481_v22  ;;  %v1513_v43 = vmul.f32 %v8634_v9, %v9035_v40  ;;  %v10598_v55 = vld [vmem:[#allocation57_spill] sm:$0xff] }
 0x158   : > { %10594 = vst [vmem:[#allocation75_spill] sm:$0xff] %v9066_v62  ;;  %v9077_v16 = vmul.f32 %v8643_v13, %v8994_v25  ;;  %v795_v36 = vadd.f32 %v9068_v54, %v8951_v53  ;;  %v9082_v27 = vadd.f32 %v10596_v44, %v698_v0  ;;  %v1502_v62 = vadd.f32 %v1494_v58, %v1482_v51  ;;  %v10601_v53 = vld [vmem:[#allocation52_spill] sm:$0xff] }
 0x159   : > { %v1713_v42 = vmul.f32 %v10597_v28, %v8887_v49  ;;  %v1125_v17 = vadd.f32 %v8959_v45, %v9068_v54  ;;  %v749_v1 = vadd.f32 %v741_v46, %v697_v15  ;;  %v1119_v22 = vadd.f32 %v1111_v4, %v1099_v39 }
 0x15a   : > { %10595 = vst [vmem:[#allocation48_spill] sm:$0xff] %v9077_v16  ;;  %v9089_v5 = vadd.f32 %v10598_v55, %v1100_v12  ;;  %v9091_v37 = vpop.permute.xlu1 %770  ;;  %v1320_v25 = vadd.f32 %v1312_v18, %v1300_v19  ;;  %v9093_v16 = vpack.c.bf16 %v1936_v41, %v1935_v50  ;;  %v1720_v0 = vadd.f32 %v10601_v53, %v1700_v38  ;;  %v10602_v41 = vld [vmem:[#allocation69_spill] sm:$0xff]  ;;  %v9106_v38 = vpop.permute.xlu0 %775  ;;  %v10603_v18 = vld [vmem:[#allocation32_spill] sm:$0xff]  ;;  %v10604_v50 = vld [vmem:[#allocation58_spill] sm:$0xff] }
 0x15b   : > { %10599 = vst [vmem:[#allocation63_spill] sm:$0xff] %v9091_v37  ;;  %v1721_v44 = vadd.f32 %v1713_v42, %v1701_v34  ;;  %v796_v51 = vadd.f32 %v9091_v37, %v8987_v24  ;;  %v1126_v58 = vadd.f32 %v9003_v57, %v9091_v37  ;;  %v1521_v45 = vadd.f32 %v1513_v43, %v1501_v29  ;;  %v10605_v42 = vld [vmem:[#allocation62_spill] sm:$0xff] }
 0x15c   : > { %10600 = vst [vmem:[#allocation76_spill] sm:$0xff] %v9093_v16  ;;  %v1882_v46 = vmul.f32 %v8663_v20, %v8899_v30  ;;  %v803_v12 = vmax.f32 %v795_v36, 0.0  ;;  %v1728_v15 = vadd.f32 %v1720_v0, %v9068_v54  ;;  %v1901_v19 = vadd.f32 %v10602_v41, %v8905_v26 }
 0x15d   : > { %v1729_v39 = vadd.f32 %v1721_v44, %v9091_v37  ;;  %v804_v34 = vmax.f32 %v796_v51, 0.0  ;;  %v1133_v4 = vmax.f32 %v1125_v17, 0.0  ;;  %v1134_v24 = vmax.f32 %v1126_v58, 0.0 }
 0x15e   : > { %v1894_v57 = vmul.f32 %v10603_v18, %v8839_v63  ;;  %v9110_v43 = vpop.permute.xlu1 %634  ;;  %v9113_v29 = vadd.f32 %v9106_v38, %v749_v1  ;;  %v9116_v36 = vadd.f32 %v10604_v50, %v1301_v56  ;;  %v9119_v55 = vadd.f32 %v10605_v42, %v1502_v62 }
 0x15f   : > { %v1737_v26 = vmax.f32 %v1729_v39, 0.0  ;;  %v810_v53 = vpack.c.bf16 %v804_v34, %v803_v12  ;;  %v1140_v0 = vpack.c.bf16 %v1134_v24, %v1133_v4  ;;  %v1736_v44 = vmax.f32 %v1728_v15, 0.0  ;;  %v10609_v15 = vld [vmem:[#allocation54_spill] sm:$0xff] }
 0x160   : > { %v1902_v17 = vadd.f32 %v1894_v57, %v1882_v46  ;;  %v9122_v51 = vadd.f32 %v1119_v22, %v9106_v38  ;;  %v9126_v58 = vadd.f32 %v8873_v23, %v9068_v54  ;;  %v9129_v1 = vadd.f32 %v1320_v25, %v9106_v38  ;;  %v10607_v22 = vld [vmem:[#allocation41_spill] sm:$0xff]  ;;  %v10608_v23 = vld [vmem:[#allocation79_spill] sm:$0xff] }
 0x161   : > { %v9132_v56 = vadd.f32 %v1521_v45, %v9106_v38  ;;  %7080 = vmatprep.subr.bf16.mxu0 %v810_v53  ;;  %7104 = vmatprep.subr.bf16.mxu1 %v1140_v0  ;;  %v9136_v62 = vadd.f32 %v9028_v21, %v9091_v37  ;;  %v9138_v46 = vpack.c.bf16 %v1737_v26, %v1736_v44 }
 0x162   : > { %v1914_v12 = vmul.f32 %v10607_v22, %v8887_v49  ;;  %7081 = vmatpush3.bf16.msra.mxu0 %v810_v53  ;;  %7105 = vmatpush3.bf16.msra.mxu1 %v1140_v0  ;;  %v9144_v25 = vadd.f32 %v10608_v23, %v9068_v54  ;;  %v9148_v45 = vadd.f32 %v9039_v48, %v9091_v37  ;;  %v10610_v23 = vld [vmem:[#allocation59_spill] sm:$0xff] }
 0x163   : > { %10606 = vst [vmem:[#allocation31_spill] sm:$0xff] %v9138_v46  ;;  %v1921_v39 = vadd.f32 %v10609_v15, %v1901_v19  ;;  %v9151_v41 = vpop.permute.xlu1 %674  ;;  %v1682_v34 = vmul.f32 %v8646_v14, %v8948_v32  ;;  %v1683_v4 = vmul.f32 %v8646_v14, %v8967_v31  ;;  %v1695_v24 = vmul.f32 %v10593_v47, %v9001_v52  ;;  %v10611_v19 = vld [vmem:[#allocation64_spill] sm:$0xff] }
 0x164   : > { %v1922_v21 = vadd.f32 %v1914_v12, %v1902_v17  ;;  %v648_v44 = vmul.f32 %v8625_v6, %v9110_v43  ;;  %v1082_v17 = vmul.f32 %v8637_v10, %v9110_v43  ;;  %v1714_v42 = vmul.f32 %v10597_v28, %v9035_v40 }
 0x165   : > { %v1929_v26 = vadd.f32 %v1921_v39, %v9068_v54  ;;  %v1703_v0 = vadd.f32 %v1695_v24, %v1683_v4  ;;  %v1702_v15 = vadd.f32 %v10610_v23, %v1682_v34  ;;  %v1884_v6 = vmul.f32 %v8663_v20, %v8967_v31  ;;  %v10613_v23 = vld [vmem:[#allocation60_spill] sm:$0xff] }
 0x166   : > { %v1930_v53 = vadd.f32 %v1922_v21, %v9091_v37  ;;  %v1883_v21 = vmul.f32 %v8663_v20, %v8948_v32  ;;  %v1896_v10 = vmul.f32 %v10603_v18, %v9001_v52  ;;  %v1915_v34 = vmul.f32 %v10607_v22, %v9035_v40  ;;  %v10619_v52 = vld [vmem:[#allocation81_spill] sm:$0xff]  ;;  %v10620_v32 = vld [vmem:[#allocation82_spill] sm:$0xff] }
 0x167   : > { %v1937_v48 = vmax.f32 %v1929_v26, 0.0  ;;  %v1723_v39 = vadd.f32 %v10611_v19, %v1703_v0  ;;  %v691_v4 = vmul.f32 %v8598_v59, %v9151_v41  ;;  %v1093_v24 = vmul.f32 %v8601_v60, %v9151_v41 }
 0x168   : > { %v1938_v50 = vmax.f32 %v1930_v53, 0.0  ;;  %v9175_v57 = vpop.permute.xlu1 %726  ;;  %v1294_v19 = vmul.f32 %v8604_v61, %v9151_v41  ;;  %v1495_v26 = vmul.f32 %v8616_v3, %v9151_v41  ;;  %v1722_v0 = vadd.f32 %v1714_v42, %v1702_v15  ;;  %v10614_v42 = vld [vmem:[#allocation65_spill] sm:$0xff] }
 0x169   : > { %v1903_v12 = vadd.f32 %v10613_v23, %v1883_v21  ;;  %v1904_v46 = vadd.f32 %v1896_v10, %v1884_v6  ;;  %v700_v22 = vadd.f32 %v8913_v33, %v648_v44  ;;  %v1102_v16 = vadd.f32 %v8917_v35, %v1082_v17  ;;  %v10615_v44 = vld [vmem:[#allocation91_spill] sm:$0xff]  ;;  %v10616_v21 = vld [vmem:[#allocation92_spill] sm:$0xff] }
 0x16a   : > { %v9193_v53 = vpack.c.bf16 %v1938_v50, %v1937_v48  ;;  %v1283_v59 = vmul.f32 %v8640_v11, %v9110_v43  ;;  %v1484_v60 = vmul.f32 %v8643_v13, %v9110_v43  ;;  %v743_v3 = vmul.f32 %v8613_v2, %v9175_v57  ;;  %v10617_v10 = vld [vmem:[#allocation40_spill] sm:$0xff] }
 0x16b   : > { %v1113_v50 = vmul.f32 %v8628_v7, %v9175_v57  ;;  %v1923_v48 = vadd.f32 %v1915_v34, %v1903_v12  ;;  %v1924_v15 = vadd.f32 %v10614_v42, %v1904_v46  ;;  %v1314_v13 = vmul.f32 %v8631_v8, %v9175_v57  ;;  %v10618_v34 = vld [vmem:[#allocation48_spill] sm:$0xff] }
 0x16c   : > { %10612 = vst [vmem:[#allocation53_spill] sm:$0xff] %v9193_v53  ;;  %v9202_v61 = vpop.permute.xlu1 %730  ;;  %v1515_v35 = vmul.f32 %v8634_v9, %v9175_v57  ;;  %v699_v17 = vadd.f32 %v691_v4, %v10615_v44  ;;  %v1101_v6 = vadd.f32 %v1093_v24, %v10616_v21  ;;  %v1302_v12 = vadd.f32 %v1294_v19, %v10617_v10 }
 0x16d   : > { %v744_v33 = vmul.f32 %v8613_v2, %v9202_v61  ;;  %v1114_v11 = vmul.f32 %v8628_v7, %v9202_v61  ;;  %v1503_v46 = vadd.f32 %v1495_v26, %v10618_v34  ;;  %v1315_v2 = vmul.f32 %v8631_v8, %v9202_v61 }
 0x16e   : > { %v1730_v7 = vadd.f32 %v1722_v0, %v9106_v38  ;;  %v751_v53 = vadd.f32 %v743_v3, %v699_v17  ;;  %v1121_v40 = vadd.f32 %v1113_v50, %v1101_v6  ;;  %v1303_v31 = vadd.f32 %v10619_v52, %v1283_v59 }
 0x16f   : > { %v752_v23 = vadd.f32 %v744_v33, %v700_v22  ;;  %v1122_v42 = vadd.f32 %v1114_v11, %v1102_v16  ;;  %v1504_v37 = vadd.f32 %v10620_v32, %v1484_v60  ;;  %v1322_v24 = vadd.f32 %v1314_v13, %v1302_v12  ;;  %v9231_v22 = vpop.permute.xlu0 %790 }
 0x170   : > { %v1516_v19 = vmul.f32 %v8634_v9, %v9202_v61  ;;  %v1523_v26 = vadd.f32 %v1515_v35, %v1503_v46  ;;  %v1931_v16 = vadd.f32 %v1923_v48, %v9106_v38  ;;  %v1323_v60 = vadd.f32 %v1315_v2, %v1303_v31 }
 0x171   : > { %v9226_v4 = vpop.permute.xlu1 %780  ;;  %v800_v59 = vadd.f32 %v9231_v22, %v752_v23  ;;  %v1130_v9 = vadd.f32 %v1122_v42, %v9231_v22  ;;  %v1738_v3 = vmax.f32 %v1730_v7, 0.0  ;;  %v10622_v17 = vmax.f32 %v9122_v51, 0.0 }
 0x172   : > { %v798_v8 = vadd.f32 %v9226_v4, %v9082_v27  ;;  %v1128_v0 = vadd.f32 %v9089_v5, %v9226_v4  ;;  %v1329_v32 = vadd.f32 %v9116_v36, %v9226_v4  ;;  %v1530_v52 = vadd.f32 %v9119_v55, %v9226_v4 }
 0x173   : > { %v1524_v13 = vadd.f32 %v1516_v19, %v1504_v37  ;;  %v1731_v5 = vadd.f32 %v1723_v39, %v9226_v4  ;;  %v1932_v36 = vadd.f32 %v1924_v15, %v9226_v4  ;;  %v1939_v35 = vmax.f32 %v1931_v16, 0.0 }
 0x174   : > { %v806_v50 = vmax.f32 %v798_v8, 0.0  ;;  %v1136_v48 = vmax.f32 %v1128_v0, 0.0  ;;  %v1337_v33 = vmax.f32 %v1329_v32, 0.0  ;;  %v1538_v11 = vmax.f32 %v1530_v52, 0.0  ;;  %v10626_v0 = vld [vmem:[#allocation61_spill] sm:$0xff] }
 0x175   : > { %v9243_v27 = vpop.permute.xlu1 %785  ;;  %v10621_v55 = vmax.f32 %v9113_v29, 0.0  ;;  %v808_v10 = vmax.f32 %v800_v59, 0.0  ;;  %v1138_v12 = vmax.f32 %v1130_v9, 0.0  ;;  %v10623_v34 = vmax.f32 %v9129_v1, 0.0  ;;  %v9286_v52 = vld [vmem:[%s10514_s8 + $0x8] sm:$0xff]  }
 0x176   : > { %v1141_v21 = vpack.c.bf16 %v1136_v48, %v10622_v17  ;;  %v799_v31 = vadd.f32 %v9243_v27, %v751_v53  ;;  %v1129_v6 = vadd.f32 %v1121_v40, %v9243_v27  ;;  %v10624_v39 = vmax.f32 %v9132_v56, 0.0 }
 0x177   : > { %v811_v44 = vpack.c.bf16 %v806_v50, %v10621_v55  ;;  %v9255_v37 = vpack.c.bf16 %v1337_v33, %v10623_v34  ;;  %v1739_v51 = vmax.f32 %v1731_v5, 0.0  ;;  %v1940_v23 = vmax.f32 %v1932_v36, 0.0  ;;  %v10630_v50 = vld [vmem:[#allocation89_spill] sm:$0xff]  ;;  %v10632_v5 = vld [vmem:[#allocation42_spill] sm:$0xff] }
 0x178   : > { %v9259_v15 = vpack.c.bf16 %v1538_v11, %v10624_v39  ;;  %7106 = vmatprep.subr.bf16.mxu1 %v1141_v21  ;;  %v807_v29 = vmax.f32 %v799_v31, 0.0  ;;  %v1137_v46 = vmax.f32 %v1129_v6, 0.0  ;;  %v1334_v40 = vmax.f32 %v9126_v58, 0.0  ;;  %v10631_v11 = vld [vmem:[#allocation72_spill] sm:$0xff]  ;;  %v10636_v31 = vld [vmem:[#allocation37_spill] sm:$0xff] }
 0x179   : > { %7082 = vmatprep.subr.bf16.mxu0 %v811_v44  ;;  %7107 = vmatpush3.bf16.msra.mxu1 %v1141_v21  ;;  %v1535_v53 = vmax.f32 %v9144_v25, 0.0  ;;  %v1330_v1 = vadd.f32 %v1322_v24, %v9243_v27  ;;  %v1531_v42 = vadd.f32 %v1523_v26, %v9243_v27  ;;  %v9265_v7 = vpack.c.bf16 %v1739_v51, %v1738_v3  ;;  %v10627_v25 = vld [vmem:[#allocation51_spill] sm:$0xff]  ;;  %v10628_v24 = vld [vmem:[#allocation46_spill] sm:$0xff]  ;;  %v10638_v51 = vld [vmem:[#allocation49_spill] sm:$0xff] }
 0x17a   : > { %7083 = vmatpush3.bf16.msra.mxu0 %v811_v44  ;;  %v812_v2 = vpack.c.bf16 %v808_v10, %v807_v29  ;;  %v1142_v56 = vpack.c.bf16 %v1138_v12, %v1137_v46  ;;  %v9267_v19 = vpack.c.bf16 %v1940_v23, %v1939_v35  ;;  %v10625_v16 = vmax.f32 %v9136_v62, 0.0  ;;  %v10633_v35 = vld [vmem:[#allocation86_spill] sm:$0xff]  ;;  %v10637_v29 = vld [vmem:[#allocation43_spill] sm:$0xff] }
 0x17b   : > { %v9273_v32 = vmul.f32 %v10593_v47, %v10626_v0  ;;  %v9277_v58 = vmul.f32 %v10603_v18, %v10626_v0  ;;  %v9281_v26 = vmul.f32 %v10628_v24, %v10627_v25  ;;  %v10629_v62 = vmax.f32 %v9148_v45, 0.0  ;;  %v10634_v45 = vld [vmem:[#allocation88_spill] sm:$0xff]  ;;  %v10635_v44 = vld [vmem:[#allocation78_spill] sm:$0xff] }
 0x17c   : > { %v1341_v8 = vpack.c.bf16 %v10625_v16, %v1334_v40  ;;  %7084 = vmatprep.subr.bf16.mxu0 %v812_v2  ;;  %7108 = vmatprep.subr.bf16.mxu1 %v1142_v56  ;;  %v1331_v9 = vadd.f32 %v1323_v60, %v9231_v22  ;;  %v1532_v3 = vadd.f32 %v1524_v13, %v9231_v22  ;;  %v1338_v60 = vmax.f32 %v1330_v1, 0.0  ;;  %v10639_v40 = vld [vmem:[#allocation38_spill] sm:$0xff]  ;;  %v10640_v1 = vld [vmem:[#allocation44_spill] sm:$0xff] }
 0x17d   : > { %v1542_v59 = vpack.c.bf16 %v10629_v62, %v1535_v53  ;;  %7109 = vmatpush3.bf16.msra.mxu1 %v1142_v56  ;;  %v9294_v48 = vmul.f32 %v8646_v14, %v10630_v50  ;;  %v9298_v33 = vmul.f32 %v8646_v14, %v9110_v43  ;;  %v2080_v36 = vmul.f32 %v10632_v5, %v10631_v11  ;;  %v9313_v14 = vld [vmem:[%s10514_s8 + $0x10] sm:$0xff]  }
 0x17e   : > { %7085 = vmatpush3.bf16.msra.mxu0 %v812_v2  ;;  %7150 = vmatprep.subr.bf16.mxu1 %v10634_v45  ;;  %v1539_v55 = vmax.f32 %v1531_v42, 0.0  ;;  %v9306_v13 = vmul.f32 %v10593_v47, %v9151_v41  ;;  %v2081_v17 = vmul.f32 %v10632_v5, %v10635_v44  ;;  %v9317_v21 = vmul.f32 %v10597_v28, %v9175_v57  ;;  %v10641_v16 = vld [vmem:[#allocation66_spill] sm:$0xff] }
 0x17f   : > { %7126 = vmatprep.subr.bf16.mxu0 %v10633_v35  ;;  %v2100_v6 = vadd.f32 %v10636_v31, %v2080_v36  ;;  %v2281_v10 = vmul.f32 %v10628_v24, %v10631_v11  ;;  %v2282_v47 = vmul.f32 %v10628_v24, %v10635_v44  ;;  %v1339_v12 = vmax.f32 %v1331_v9, 0.0  ;;  %v10643_v9 = vld [vmem:[#allocation50_spill] sm:$0xff]  ;;  %v10644_v11 = vld [vmem:[#allocation73_spill] sm:$0xff] }
 0x180   : > { %7111 = vmatmul.mubr.msk.bf16.vlgmr.msra.gmra.mrb[0].mxu1 %vm933_vm0, %v9286_v52  ;;  %v1540_v34 = vmax.f32 %v1532_v3, 0.0  ;;  %v9330_v39 = vmul.f32 %v10597_v28, %v9202_v61  ;;  %v2101_v46 = vadd.f32 %v10637_v29, %v2081_v17  ;;  %v10642_v28 = vld [vmem:[#allocation83_spill] sm:$0xff]  ;;  %v2083_v17 = vmul.f32 %v10632_v5, %v8899_v30  ;;  %v10647_v29 = vld [vmem:[#allocation80_spill] sm:$0xff] }
 0x181   : > { %7087 = vmatmul.mubr.msk.bf16.vlgmr.msra.gmra.mrb[0].mxu0 %vm933_vm0, %v9286_v52  ;;  %7151 = vmatpush3.bf16.msra.mxu1 %v10634_v45  ;;  %v2120_v23 = vadd.f32 %v10638_v51, %v2100_v6  ;;  %v2301_v53 = vadd.f32 %v10639_v40, %v2281_v10  ;;  %v2302_v42 = vadd.f32 %v10640_v1, %v2282_v47  ;;  %v10646_v47 = vld [vmem:[#allocation34_spill] sm:$0xff] }
 0x182   : > { %7127 = vmatpush3.bf16.msra.mxu0 %v10633_v35  ;;  %7152 = vmatprep.subr.bf16.mxu1 %v1542_v59  ;;  %v1343_v2 = vpack.c.bf16 %v1339_v12, %v1338_v60  ;;  %v1544_v56 = vpack.c.bf16 %v1540_v34, %v1539_v55  ;;  %v2121_v25 = vadd.f32 %v10641_v16, %v2101_v46  ;;  %v9349_v35 = vld [vmem:[%s10514_s8 + $0x18] sm:$0xff]   ;;  %v10645_v55 = vld [vmem:[#allocation84_spill] sm:$0xff]  ;;  %v10649_v46 = vld [vmem:[#allocation45_spill] sm:$0xff] }
 0x183   : > { %7128 = vmatprep.subr.bf16.mxu0 %v1341_v8  ;;  %7090 = vmatprep.mubr.msk.bf16.mxu0 %vm933_vm0, %v9313_v14  ;;  %v2128_v62 = vadd.f32 %v2120_v23, %v10642_v28  ;;  %v2321_v3 = vadd.f32 %v10643_v9, %v2301_v53  ;;  %v2322_v36 = vadd.f32 %v10644_v11, %v2302_v42  ;;  %v9379_v23 = vld [vmem:[%s10514_s8 + $0x20] sm:$0xff]  }
 0x184   : > { %7114 = vmatprep.mubr.msk.bf16.mxu1 %vm933_vm0, %v9313_v14  ;;  %v9353_v45 = vmul.f32 %v8663_v20, %v10630_v50  ;;  %v9357_v60 = vmul.f32 %v8663_v20, %v9110_v43  ;;  %v2129_v44 = vadd.f32 %v2121_v25, %v10645_v55  ;;  %v2095_v12 = vmul.f32 %v10646_v47, %v8839_v63  ;;  %v10650_v16 = vld [vmem:[#allocation55_spill] sm:$0xff] }
 0x185   : > { %7153 = vmatpush3.bf16.msra.mxu1 %v1542_v59  ;;  %v2136_v31 = vmax.f32 %v2128_v62, 0.0  ;;  %v2329_v6 = vadd.f32 %v2321_v3, %v10642_v28  ;;  %v2330_v10 = vadd.f32 %v2322_v36, %v10645_v55  ;;  %v9370_v20 = vmul.f32 %v10603_v18, %v9151_v41  ;;  %v10651_v28 = vld [vmem:[#allocation35_spill] sm:$0xff] }
 0x186   : > { %7129 = vmatpush3.bf16.msra.mxu0 %v1341_v8  ;;  %7154 = vmatprep.subr.bf16.mxu1 %v9259_v15  ;;  %v2137_v34 = vmax.f32 %v2129_v44, 0.0  ;;  %v10648_v8 = vld [vmem:[#allocation70_spill] sm:$0xff]  ;;  %v2115_v51 = vmul.f32 %v10649_v46, %v8887_v49  ;;  %v2103_v1 = vadd.f32 %v2095_v12, %v2083_v17  ;;  %v2284_v42 = vmul.f32 %v10628_v24, %v8899_v30  ;;  %v10652_v3 = vld [vmem:[#allocation71_spill] sm:$0xff] }
 0x187   : > { %7130 = vmatprep.subr.bf16.mxu0 %v9255_v37  ;;  %v2102_v59 = vadd.f32 %v10648_v8, %v10647_v29  ;;  %v2337_v40 = vmax.f32 %v2329_v6, 0.0  ;;  %v2338_v53 = vmax.f32 %v2330_v10, 0.0  ;;  %v2296_v62 = vmul.f32 %v10651_v28, %v8839_v63  ;;  %v10653_v44 = vld [vmem:[#allocation47_spill] sm:$0xff]  ;;  %v10656_v6 = vld [vmem:[#allocation85_spill] sm:$0xff]  ;;  %v10658_v8 = vld [vmem:[#allocation90_spill] sm:$0xff] }
 0x188   : > { %7115 = vmatmul.mubr.msk.bf16.gmra.mrb[4].mxu1 %vm933_vm0, %v9349_v35  ;;  %v9387_v18 = vpack.c.bf16 %v2137_v34, %v2136_v31  ;;  %v2123_v30 = vadd.f32 %v2115_v51, %v2103_v1  ;;  %v2303_v11 = vadd.f32 %v10652_v3, %v9281_v26  ;;  %v2316_v17 = vmul.f32 %v10653_v44, %v8887_v49  ;;  %v10654_v63 = vld [vmem:[#allocation63_spill] sm:$0xff]  ;;  %v9412_v10 = vld [vmem:[%s10514_s8 + $0x28] sm:$0xff]   ;;  %v9421_v51 = vld [vmem:[%s10514_s8 + $0x30] sm:$0xff]  }
 0x189   : > { %7091 = vmatmul.mubr.msk.bf16.gmra.mrb[4].mxu0 %vm933_vm0, %v9349_v35  ;;  %v2122_v25 = vadd.f32 %v10650_v16, %v2102_v59  ;;  %7155 = vmatpush3.bf16.msra.mxu1 %v9259_v15  ;;  %v9394_v9 = vpack.c.bf16 %v2338_v53, %v2337_v40  ;;  %v2304_v55 = vadd.f32 %v2296_v62, %v2284_v42  ;;  %v10655_v15 = vld [vmem:[#allocation56_spill] sm:$0xff]  ;;  %v10657_v34 = vld [vmem:[#allocation87_spill] sm:$0xff] }
 0x18a   : > { %7131 = vmatpush3.bf16.msra.mxu0 %v9255_v37  ;;  %7156 = vmatprep.subr.bf16.mxu1 %v1544_v56  ;;  %v2131_v37 = vadd.f32 %v2123_v30, %v10654_v63  ;;  %v2323_v31 = vadd.f32 %v10655_v15, %v2303_v11  ;;  %v2084_v26 = vmul.f32 %v10632_v5, %v10656_v6  ;;  %v10659_v1 = vld [vmem:[#allocation67_spill] sm:$0xff]  ;;  %v10660_v16 = vld [vmem:[#allocation36_spill] sm:$0xff] }
 0x18b   : > { %7132 = vmatprep.subr.bf16.mxu0 %v1343_v2  ;;  %v2130_v36 = vadd.f32 %v2122_v25, %v9068_v54  ;;  %7094 = vmatprep.mubr.msk.bf16.mxu0 %vm933_vm0, %v9379_v23  ;;  %v2324_v49 = vadd.f32 %v2316_v17, %v2304_v55  ;;  %v2085_v29 = vmul.f32 %v10632_v5, %v10657_v34  ;;  %v10661_v62 = vld [vmem:[#allocation75_spill] sm:$0xff]  ;;  %v10662_v30 = vld [vmem:[#allocation76_spill] sm:$0xff] }
 0x18c   : > { %7118 = vmatprep.mubr.msk.bf16.mxu1 %vm933_vm0, %v9379_v23  ;;  %v2097_v59 = vmul.f32 %v10646_v47, %v10658_v8  ;;  %v2139_v40 = vmax.f32 %v2131_v37, 0.0  ;;  %v2331_v53 = vadd.f32 %v2323_v31, %v9068_v54  ;;  %v2104_v42 = vadd.f32 %v10659_v1, %v2084_v26  ;;  %v10663_v37 = vld [vmem:[#allocation74_spill] sm:$0xff]  ;;  %v10664_v31 = vld [vmem:[#allocation68_spill] sm:$0xff] }
 0x18d   : > { %v2138_v12 = vmax.f32 %v2130_v36, 0.0  ;;  %7157 = vmatpush3.bf16.msra.mxu1 %v1544_v56  ;;  %v2116_v25 = vmul.f32 %v10649_v46, %v10660_v16  ;;  %v2285_v3 = vmul.f32 %v10628_v24, %v10656_v6  ;;  %v2286_v54 = vmul.f32 %v10628_v24, %v10657_v34 }
 0x18e   : > { %7133 = vmatpush3.bf16.msra.mxu0 %v1343_v2  ;;  %7198 = vmatprep.subr.bf16.mxu1 %v10662_v30  ;;  %v2332_v2 = vadd.f32 %v2324_v49, %v10654_v63  ;;  %v2105_v56 = vadd.f32 %v2097_v59, %v2085_v29  ;;  %v2339_v36 = vmax.f32 %v2331_v53, 0.0  ;;  %v2298_v15 = vmul.f32 %v10651_v28, %v10658_v8 }
 0x18f   : > { %7174 = vmatprep.subr.bf16.mxu0 %v10661_v62  ;;  %v9432_v11 = vpack.c.bf16 %v2139_v40, %v2138_v12  ;;  %v2124_v55 = vadd.f32 %v2116_v25, %v2104_v42  ;;  %v2305_v6 = vadd.f32 %v10664_v31, %v2285_v3  ;;  %v2317_v12 = vmul.f32 %v10653_v44, %v10660_v16  ;;  %v9465_v16 = vld [vmem:[%s10514_s8 + $0x38] sm:$0xff]  }
 0x190   : > { %7119 = vmatmul.mubr.msk.bf16.gmra.mrb[8].mxu1 %vm933_vm0, %v9412_v10  ;;  %v2340_v17 = vmax.f32 %v2332_v2, 0.0  ;;  %v2125_v63 = vadd.f32 %v10663_v37, %v2105_v56  ;;  %v2086_v49 = vmul.f32 %v10632_v5, %v10630_v50  ;;  %v2306_v8 = vadd.f32 %v2298_v15, %v2286_v54  ;;  %v10665_v2 = vld [vmem:[#allocation77_spill] sm:$0xff] }
 0x191   : > { %7095 = vmatmul.mubr.msk.bf16.gmra.mrb[8].mxu0 %vm933_vm0, %v9412_v10  ;;  %7122 = vmatprep.mubr.msk.bf16.mxu1 %vm933_vm0, %v9421_v51  ;;  %v2132_v26 = vadd.f32 %v2124_v55, %v9106_v38  ;;  %v2087_v59 = vmul.f32 %v10632_v5, %v9110_v43  ;;  %v2325_v53 = vadd.f32 %v2317_v12, %v2305_v6  ;;  %v10666_v12 = vld [vmem:[#allocation41_spill] sm:$0xff] }
 0x192   : > { %7098 = vmatprep.mubr.msk.bf16.mxu0 %vm933_vm0, %v9421_v51  ;;  %v9453_v34 = vpack.c.bf16 %v2340_v17, %v2339_v36  ;;  %v2133_v29 = vadd.f32 %v2125_v63, %v9226_v4  ;;  %v2098_v1 = vmul.f32 %v10646_v47, %v9151_v41  ;;  %v2099_v42 = vmul.f32 %v10646_v47, %v10626_v0 }
 0x193   : > { %v2140_v40 = vmax.f32 %v2132_v26, 0.0  ;;  %v2326_v56 = vadd.f32 %v10665_v2, %v2306_v8  ;;  %v2118_v3 = vmul.f32 %v10649_v46, %v9175_v57  ;;  %v2119_v5 = vmul.f32 %v10649_v46, %v9202_v61 }
 0x194   : > { %v2141_v25 = vmax.f32 %v2133_v29, 0.0  ;;  %v2333_v36 = vadd.f32 %v2325_v53, %v9106_v38  ;;  %v2106_v55 = vadd.f32 %v2098_v1, %v2086_v49  ;;  %v2107_v54 = vadd.f32 %v2099_v42, %v2087_v59 }
 0x195   : > { %v2287_v47 = vmul.f32 %v10628_v24, %v10630_v50  ;;  %v2334_v37 = vadd.f32 %v2326_v56, %v9226_v4  ;;  %v2288_v63 = vmul.f32 %v10628_v24, %v9110_v43  ;;  %v2299_v15 = vmul.f32 %v10651_v28, %v9151_v41  ;;  %v9495_v24 = vld [vmem:[%s10514_s8] sm:$0xff]  }
 0x196   : > { %v9475_v17 = vpack.c.bf16 %v2141_v25, %v2140_v40  ;;  %v2341_v31 = vmax.f32 %v2333_v36, 0.0  ;;  %v2126_v6 = vadd.f32 %v2118_v3, %v2106_v55  ;;  %v2127_v46 = vadd.f32 %v2119_v5, %v2107_v54 }
 0x197   : > { %v2300_v38 = vmul.f32 %v10651_v28, %v10626_v0  ;;  %v2342_v50 = vmax.f32 %v2334_v37, 0.0  ;;  %v2307_v4 = vadd.f32 %v2299_v15, %v2287_v47  ;;  %v2319_v43 = vmul.f32 %v10653_v44, %v9175_v57 }
 0x198   : > { %7123 = vmatmul.mubr.msk.bf16.gmra.mrb[12].mxu1 %vm933_vm0, %v9465_v16  ;;  %v2320_v41 = vmul.f32 %v10653_v44, %v9202_v61  ;;  %v2134_v0 = vadd.f32 %v2126_v6, %v9243_v27  ;;  %v2135_v28 = vadd.f32 %v2127_v46, %v9231_v22  ;;  %v1917_v49 = vmul.f32 %v10666_v12, %v9175_v57 }
 0x199   : > { %7099 = vmatmul.mubr.msk.bf16.gmra.mrb[12].mxu0 %vm933_vm0, %v9465_v16  ;;  %7158 = vmatprep.mubr.msk.bf16.mxu1 %vm933_vm0, %v9495_v24  ;;  %v2308_v26 = vadd.f32 %v2300_v38, %v2288_v63  ;;  %v1918_v44 = vmul.f32 %v10666_v12, %v9202_v61  ;;  %v9507_v29 = vpack.c.bf16 %v2342_v50, %v2341_v31 }
 0x19a   : > { %7134 = vmatprep.mubr.msk.bf16.mxu0 %vm933_vm0, %v9495_v24  ;;  %v2327_v8 = vadd.f32 %v2319_v43, %v2307_v4  ;;  %v1704_v59 = vadd.f32 %v9306_v13, %v9294_v48  ;;  %v2142_v40 = vmax.f32 %v2134_v0, 0.0  ;;  %v2143_v53 = vmax.f32 %v2135_v28, 0.0 }
 0x19b   : > { %v2328_v1 = vadd.f32 %v2320_v41, %v2308_v26  ;;  %v1705_v42 = vadd.f32 %v9273_v32, %v9298_v33  ;;  %v1905_v25 = vadd.f32 %v9370_v20, %v9353_v45  ;;  %v1906_v57 = vadd.f32 %v9277_v58, %v9357_v60  ;;  %v10668_v45 = vld [vmem:[#allocation53_spill] sm:$0xff] }
 0x19c   : > { %v2335_v61 = vadd.f32 %v2327_v8, %v9243_v27  ;;  %v1724_v2 = vadd.f32 %v9317_v21, %v1704_v59  ;;  %v9519_v56 = vpack.c.bf16 %v2143_v53, %v2142_v40 }
 0x19d   : > { %v2336_v48 = vadd.f32 %v2328_v1, %v9231_v22  ;;  %v1725_v13 = vadd.f32 %v9330_v39, %v1705_v42  ;;  %v1925_v3 = vadd.f32 %v1917_v49, %v1905_v25  ;;  %v1926_v5 = vadd.f32 %v1918_v44, %v1906_v57  ;;  %v10667_v39 = vld [vmem:[#allocation31_spill] sm:$0xff] }
 0x19e   : > { %v2343_v36 = vmax.f32 %v2335_v61, 0.0  ;;  %v1732_v58 = vadd.f32 %v1724_v2, %v9243_v27 }
 0x19f   : > { %v2344_v32 = vmax.f32 %v2336_v48, 0.0  ;;  %v1933_v33 = vadd.f32 %v1925_v3, %v9243_v27  ;;  %v1733_v60 = vadd.f32 %v1725_v13, %v9231_v22  ;;  %v1934_v20 = vadd.f32 %v1926_v5, %v9231_v22 }
 0x1a0   : > { %7159 = vmatmul.mubr.msk.bf16.vlgmr.msra.gmra.mrb[16].mxu1 %vm933_vm0, %v9286_v52  ;;  %v1740_v27 = vmax.f32 %v1732_v58, 0.0 }
 0x1a1   : > { %7135 = vmatmul.mubr.msk.bf16.vlgmr.msra.gmra.mrb[16].mxu0 %vm933_vm0, %v9286_v52  ;;  %7199 = vmatpush3.bf16.msra.mxu1 %v10662_v30  ;;  %v2348_v21 = vpack.c.bf16 %v2344_v32, %v2343_v36  ;;  %v1941_v55 = vmax.f32 %v1933_v33, 0.0  ;;  %v1942_v30 = vmax.f32 %v1934_v20, 0.0 }
 0x1a2   : > { %7175 = vmatpush3.bf16.msra.mxu0 %v10661_v62  ;;  %7200 = vmatprep.subr.bf16.mxu1 %v10668_v45  ;;  %v1741_v62 = vmax.f32 %v1733_v60, 0.0 }
 0x1a3   : > { %7176 = vmatprep.subr.bf16.mxu0 %v10667_v39  ;;  %7138 = vmatprep.mubr.msk.bf16.mxu0 %vm933_vm0, %v9313_v14  ;;  %v1946_v54 = vpack.c.bf16 %v1942_v30, %v1941_v55 }
 0x1a4   : > { %7162 = vmatprep.mubr.msk.bf16.mxu1 %vm933_vm0, %v9313_v14  ;;  %v1745_v22 = vpack.c.bf16 %v1741_v62, %v1740_v27 }
 0x1a5   : > { %7201 = vmatpush3.bf16.msra.mxu1 %v10668_v45 }
 0x1a6   : > { %7177 = vmatpush3.bf16.msra.mxu0 %v10667_v39  ;;  %7202 = vmatprep.subr.bf16.mxu1 %v9267_v19 }
 0x1a7   : > { %7178 = vmatprep.subr.bf16.mxu0 %v9265_v7 }
 0x1a8   : > { %7163 = vmatmul.mubr.msk.bf16.gmra.mrb[20].mxu1 %vm933_vm0, %v9349_v35 }
 0x1a9   : > { %7139 = vmatmul.mubr.msk.bf16.gmra.mrb[20].mxu0 %vm933_vm0, %v9349_v35  ;;  %7203 = vmatpush3.bf16.msra.mxu1 %v9267_v19  ;;  %v9645_v19 = vpop.permute.xlu0 %820 }
 0x1aa   : > { %7179 = vmatpush3.bf16.msra.mxu0 %v9265_v7  ;;  %7204 = vmatprep.subr.bf16.mxu1 %v1946_v54  ;;  %v10669_v7 = vmov 0  }
 0x1ab   : > { %7180 = vmatprep.subr.bf16.mxu0 %v1745_v22  ;;  %7142 = vmatprep.mubr.msk.bf16.mxu0 %vm933_vm0, %v9379_v23 }
 0x1ac   : > { %7166 = vmatprep.mubr.msk.bf16.mxu1 %vm933_vm0, %v9379_v23 }
 0x1ad   : > { %7205 = vmatpush3.bf16.msra.mxu1 %v1946_v54 }
 0x1ae   : > { %7181 = vmatpush3.bf16.msra.mxu0 %v1745_v22  ;;  %7246 = vmatprep.subr.bf16.mxu1 %v9394_v9 }
 0x1af   : > { %7222 = vmatprep.subr.bf16.mxu0 %v9387_v18 }
 0x1b0   : > { %7167 = vmatmul.mubr.msk.bf16.gmra.mrb[24].mxu1 %vm933_vm0, %v9412_v10 }
 0x1b1   : > { %7143 = vmatmul.mubr.msk.bf16.gmra.mrb[24].mxu0 %vm933_vm0, %v9412_v10  ;;  %7170 = vmatprep.mubr.msk.bf16.mxu1 %vm933_vm0, %v9421_v51 }
 0x1b2   : > { %7146 = vmatprep.mubr.msk.bf16.mxu0 %vm933_vm0, %v9421_v51 }
 0x1b8   : > { %7171 = vmatmul.mubr.msk.bf16.gmra.mrb[28].mxu1 %vm933_vm0, %v9465_v16 }
 0x1b9   : > { %7147 = vmatmul.mubr.msk.bf16.gmra.mrb[28].mxu0 %vm933_vm0, %v9465_v16  ;;  %7206 = vmatprep.mubr.msk.bf16.mxu1 %vm933_vm0, %v9495_v24 }
 0x1ba   : > { %7182 = vmatprep.mubr.msk.bf16.mxu0 %vm933_vm0, %v9495_v24 }
 0x1c0   : > { %7207 = vmatmul.mubr.msk.bf16.vlgmr.msra.gmra.mrb[32].mxu1 %vm933_vm0, %v9286_v52 }
 0x1c1   : > { %7183 = vmatmul.mubr.msk.bf16.vlgmr.msra.gmra.mrb[32].mxu0 %vm933_vm0, %v9286_v52  ;;  %7247 = vmatpush3.bf16.msra.mxu1 %v9394_v9 }
 0x1c2   : > { %7223 = vmatpush3.bf16.msra.mxu0 %v9387_v18  ;;  %7248 = vmatprep.subr.bf16.mxu1 %v9453_v34 }
 0x1c3   : > { %7224 = vmatprep.subr.bf16.mxu0 %v9432_v11  ;;  %7186 = vmatprep.mubr.msk.bf16.mxu0 %vm933_vm0, %v9313_v14 }
 0x1c4   : > { %7210 = vmatprep.mubr.msk.bf16.mxu1 %vm933_vm0, %v9313_v14 }
 0x1c5   : > { %7249 = vmatpush3.bf16.msra.mxu1 %v9453_v34 }
 0x1c6   : > { %7225 = vmatpush3.bf16.msra.mxu0 %v9432_v11  ;;  %7250 = vmatprep.subr.bf16.mxu1 %v9507_v29 }
 0x1c7   : > { %7226 = vmatprep.subr.bf16.mxu0 %v9475_v17 }
 0x1c8   : > { %7211 = vmatmul.mubr.msk.bf16.gmra.mrb[36].mxu1 %vm933_vm0, %v9349_v35 }
 0x1c9   : > { %7187 = vmatmul.mubr.msk.bf16.gmra.mrb[36].mxu0 %vm933_vm0, %v9349_v35  ;;  %7251 = vmatpush3.bf16.msra.mxu1 %v9507_v29 }
 0x1ca   : > { %7227 = vmatpush3.bf16.msra.mxu0 %v9475_v17  ;;  %7252 = vmatprep.subr.bf16.mxu1 %v2348_v21 }
 0x1cb   : > { %7228 = vmatprep.subr.bf16.mxu0 %v9519_v56  ;;  %7190 = vmatprep.mubr.msk.bf16.mxu0 %vm933_vm0, %v9379_v23 }
 0x1cc   : > { %7214 = vmatprep.mubr.msk.bf16.mxu1 %vm933_vm0, %v9379_v23 }
 0x1cd   : > { %7253 = vmatpush3.bf16.msra.mxu1 %v2348_v21 }
 0x1ce   : > { %7229 = vmatpush3.bf16.msra.mxu0 %v9519_v56 }
 0x1d0   : > { %7215 = vmatmul.mubr.msk.bf16.gmra.mrb[40].mxu1 %vm933_vm0, %v9412_v10 }
 0x1d1   : > { %7191 = vmatmul.mubr.msk.bf16.gmra.mrb[40].mxu0 %vm933_vm0, %v9412_v10  ;;  %7218 = vmatprep.mubr.msk.bf16.mxu1 %vm933_vm0, %v9421_v51 }
 0x1d2   : > { %7194 = vmatprep.mubr.msk.bf16.mxu0 %vm933_vm0, %v9421_v51 }
 0x1d8   : > { %7219 = vmatmul.mubr.msk.bf16.gmra.mrb[44].mxu1 %vm933_vm0, %v9465_v16 }
 0x1d9   : > { %7195 = vmatmul.mubr.msk.bf16.gmra.mrb[44].mxu0 %vm933_vm0, %v9465_v16  ;;  %7254 = vmatprep.mubr.msk.bf16.mxu1 %vm933_vm0, %v9495_v24 }
 0x1da   : > { %7230 = vmatprep.mubr.msk.bf16.mxu0 %vm933_vm0, %v9495_v24 }
 0x1e0   : > { %7255 = vmatmul.mubr.msk.bf16.vlgmr.msra.gmra.mrb[48].mxu1 %vm933_vm0, %v9286_v52 }
 0x1e1   : > { %7231 = vmatmul.mubr.msk.bf16.vlgmr.msra.gmra.mrb[48].mxu0 %vm933_vm0, %v9286_v52  ;;  %7258 = vmatprep.mubr.msk.bf16.mxu1 %vm933_vm0, %v9313_v14  ;;  %v9647_v52 = vpop.permute.xlu1 %815 }
 0x1e2   : > { %7234 = vmatprep.mubr.msk.bf16.mxu0 %vm933_vm0, %v9313_v14  ;;  %v9649_v14 = vpop.permute.xlu0 %830 }
 0x1e8   : > { %7259 = vmatmul.mubr.msk.bf16.gmra.mrb[52].mxu1 %vm933_vm0, %v9349_v35 }
 0x1e9   : > { %7235 = vmatmul.mubr.msk.bf16.gmra.mrb[52].mxu0 %vm933_vm0, %v9349_v35  ;;  %7262 = vmatprep.mubr.msk.bf16.mxu1 %vm933_vm0, %v9379_v23  ;;  %v9651_v35 = vpop.permute.xlu1 %825 }
 0x1ea   : > { %7238 = vmatprep.mubr.msk.bf16.mxu0 %vm933_vm0, %v9379_v23  ;;  %v9653_v23 = vpop.permute.xlu0 %840 }
 0x1ed   : > { %v9655_v18 = vpop.permute.xlu1 %835 }
 0x1ee   : > { %v9657_v9 = vpop.permute.xlu0 %850 }
 0x1f0   : > { %7263 = vmatmul.mubr.msk.bf16.gmra.mrb[56].mxu1 %vm933_vm0, %v9412_v10 }
 0x1f1   : > { %7239 = vmatmul.mubr.msk.bf16.gmra.mrb[56].mxu0 %vm933_vm0, %v9412_v10  ;;  %7266 = vmatprep.mubr.msk.bf16.mxu1 %vm933_vm0, %v9421_v51  ;;  %v9659_v10 = vpop.permute.xlu1 %845 }
 0x1f2   : > { %7242 = vmatprep.mubr.msk.bf16.mxu0 %vm933_vm0, %v9421_v51  ;;  %v9661_v51 = vpop.permute.xlu0 %860 }
 0x1f5   : > { %v9663_v11 = vpop.permute.xlu1 %855 }
 0x1f6   : > { %v9677_v53 = vpop.permute.xlu0 %870 }
 0x1f8   : > { %7267 = vmatmul.mubr.msk.bf16.gmra.mrb[60].mxu1 %vm933_vm0, %v9465_v16 }
 0x1f9   : > { %7243 = vmatmul.mubr.msk.bf16.gmra.mrb[60].mxu0 %vm933_vm0, %v9465_v16  ;;  %3089 = vmatprep.mubr.bf16.mxu1 %v10669_v7  ;;  %v9679_v1 = vpop.permute.xlu1 %865 }
 0x1fa   : > { %2976 = vmatprep.mubr.bf16.mxu0 %v10669_v7 }
 0x253   : > { %v7112_v16 = vpop.f32.mrb[0].mxu1 }
 0x254   : > { %v7088_v34 = vpop.f32.mrb[0].mxu0  ;;  %v1186_v17 = vadd.f32 %v7112_v16, %v9651_v35  ;;  %v1177_v63 = vpop.f32.mrb[1].mxu1 }
 0x255   : > { %v1001_v47 = vadd.f32 %v7088_v34, %v9651_v35  ;;  %v992_v37 = vpop.f32.mrb[1].mxu0  ;;  %v1178_v31 = vadd.f32 %v1177_v63, %v9647_v52  ;;  %v7113_v46 = vpop.f32.mrb[2].mxu1 }
 0x256   : > { %v993_v15 = vadd.f32 %v992_v37, %v9647_v52  ;;  %v7089_v6 = vpop.f32.mrb[2].mxu0  ;;  %v1242_v50 = vmax.f32 %v1186_v17, 0.0  ;;  %v1189_v43 = vadd.f32 %v7113_v46, %v9649_v14  ;;  %v1180_v24 = vpop.f32.mrb[3].mxu1 }
 0x257   : > { %v1057_v38 = vmax.f32 %v1001_v47, 0.0  ;;  %v1004_v4 = vadd.f32 %v7089_v6, %v9649_v14  ;;  %v995_v41 = vpop.f32.mrb[3].mxu0  ;;  %v1240_v28 = vmax.f32 %v1178_v31, 0.0  ;;  %v1181_v12 = vadd.f32 %v1180_v24, %v9645_v19  ;;  %v9697_v17 = vpop.permute.xlu0 %880 }
 0x258   : > { %v1055_v0 = vmax.f32 %v993_v15, 0.0  ;;  %v996_v26 = vadd.f32 %v995_v41, %v9645_v19  ;;  %v1243_v29 = vmax.f32 %v1189_v43, 0.0  ;;  %v9699_v37 = vpop.permute.xlu1 %875 }
 0x259   : > { %v9673_v49 = vmax.f32 %v1057_v38, %v1242_v50  ;;  %v1058_v44 = vmax.f32 %v1004_v4, 0.0  ;;  %v1241_v40 = vmax.f32 %v1181_v12, 0.0 }
 0x25a   : > { %v9675_v8 = vmax.f32 %v1055_v0, %v1240_v28  ;;  %v1056_v59 = vmax.f32 %v996_v26, 0.0 }
 0x25b   : > { %v9681_v42 = vmax.f32 %v1058_v44, %v1243_v29  ;;  %v7116_v61 = vpop.f32.mrb[4].mxu1 }
 0x25c   : > { %v9683_v25 = vmax.f32 %v1056_v59, %v1241_v40  ;;  %v7092_v57 = vpop.f32.mrb[4].mxu0  ;;  %v1202_v56 = vadd.f32 %v7116_v61, %v9659_v10  ;;  %v1193_v13 = vpop.f32.mrb[5].mxu1 }
 0x25d   : > { %v1017_v2 = vadd.f32 %v7092_v57, %v9659_v10  ;;  %v1008_v48 = vpop.f32.mrb[5].mxu0  ;;  %v1194_v5 = vadd.f32 %v1193_v13, %v9655_v18  ;;  %v7117_v32 = vpop.f32.mrb[6].mxu1 }
 0x25e   : > { %v1009_v3 = vadd.f32 %v1008_v48, %v9655_v18  ;;  %v7093_v36 = vpop.f32.mrb[6].mxu0  ;;  %v1246_v33 = vmax.f32 %v1202_v56, 0.0  ;;  %v1205_v39 = vadd.f32 %v7117_v32, %v9657_v9  ;;  %v1196_v60 = vpop.f32.mrb[7].mxu1 }
 0x25f   : > { %v1061_v58 = vmax.f32 %v1017_v2, 0.0  ;;  %v1020_v21 = vadd.f32 %v7093_v36, %v9657_v9  ;;  %v1011_v45 = vpop.f32.mrb[7].mxu0  ;;  %v1244_v27 = vmax.f32 %v1194_v5, 0.0  ;;  %v1197_v62 = vadd.f32 %v1196_v60, %v9653_v23  ;;  %v9717_v32 = vpop.permute.xlu0 %890 }
 0x260   : > { %v1059_v20 = vmax.f32 %v1009_v3, 0.0  ;;  %v1012_v55 = vadd.f32 %v1011_v45, %v9653_v23  ;;  %v1247_v54 = vmax.f32 %v1205_v39, 0.0 }
 0x261   : > { %v9693_v30 = vmax.f32 %v1061_v58, %v1246_v33  ;;  %v1062_v22 = vmax.f32 %v1020_v21, 0.0  ;;  %v1245_v47 = vmax.f32 %v1197_v62, 0.0  ;;  %v9719_v58 = vpop.permute.xlu1 %885 }
 0x262   : > { %v9695_v34 = vmax.f32 %v1059_v20, %v1244_v27  ;;  %v1060_v16 = vmax.f32 %v1012_v55, 0.0 }
 0x263   : > { %v9701_v63 = vmax.f32 %v1062_v22, %v1247_v54  ;;  %v7120_v6 = vpop.f32.mrb[8].mxu1 }
 0x264   : > { %v9703_v15 = vmax.f32 %v1060_v16, %v1245_v47  ;;  %v7096_v31 = vpop.f32.mrb[8].mxu0  ;;  %v1218_v38 = vadd.f32 %v7120_v6, %v9679_v1  ;;  %v1209_v4 = vpop.f32.mrb[9].mxu1 }
 0x265   : > { %v1033_v46 = vadd.f32 %v7096_v31, %v9679_v1  ;;  %v1024_v50 = vpop.f32.mrb[9].mxu0  ;;  %v1210_v41 = vadd.f32 %v1209_v4, %v9663_v11  ;;  %v7121_v0 = vpop.f32.mrb[10].mxu1 }
 0x266   : > { %v1025_v43 = vadd.f32 %v1024_v50, %v9663_v11  ;;  %v7097_v24 = vpop.f32.mrb[10].mxu0  ;;  %v1250_v26 = vmax.f32 %v1218_v38, 0.0  ;;  %v1221_v44 = vadd.f32 %v7121_v0, %v9677_v53  ;;  %v1212_v59 = vpop.f32.mrb[11].mxu1 }
 0x267   : > { %v1065_v28 = vmax.f32 %v1033_v46, 0.0  ;;  %v1036_v12 = vadd.f32 %v7097_v24, %v9677_v53  ;;  %v1027_v29 = vpop.f32.mrb[11].mxu0  ;;  %v1248_v57 = vmax.f32 %v1210_v41, 0.0  ;;  %v1213_v2 = vadd.f32 %v1212_v59, %v9661_v51 }
 0x268   : > { %v1063_v40 = vmax.f32 %v1025_v43, 0.0  ;;  %v1028_v61 = vadd.f32 %v1027_v29, %v9661_v51  ;;  %v1251_v13 = vmax.f32 %v1221_v44, 0.0 }
 0x269   : > { %v9713_v56 = vmax.f32 %v1065_v28, %v1250_v26  ;;  %v1066_v48 = vmax.f32 %v1036_v12, 0.0  ;;  %v1249_v36 = vmax.f32 %v1213_v2, 0.0 }
 0x26a   : > { %v9715_v3 = vmax.f32 %v1063_v40, %v1248_v57  ;;  %v1064_v5 = vmax.f32 %v1028_v61, 0.0 }
 0x26b   : > { %v9721_v33 = vmax.f32 %v1066_v48, %v1251_v13  ;;  %v7124_v45 = vpop.f32.mrb[12].mxu1 }
 0x26c   : > { %v9723_v21 = vmax.f32 %v1064_v5, %v1249_v36  ;;  %v7100_v39 = vpop.f32.mrb[12].mxu0  ;;  %v1234_v20 = vadd.f32 %v7124_v45, %v9719_v58  ;;  %v1225_v55 = vpop.f32.mrb[13].mxu1 }
 0x26d   : > { %v1049_v60 = vadd.f32 %v7100_v39, %v9719_v58  ;;  %v1040_v27 = vpop.f32.mrb[13].mxu0  ;;  %v1226_v22 = vadd.f32 %v1225_v55, %v9699_v37  ;;  %v7125_v16 = vpop.f32.mrb[14].mxu1 }
 0x26e   : > { %v1041_v62 = vadd.f32 %v1040_v27, %v9699_v37  ;;  %v7101_v54 = vpop.f32.mrb[14].mxu0  ;;  %v1254_v31 = vmax.f32 %v1234_v20, 0.0  ;;  %v1237_v46 = vadd.f32 %v7125_v16, %v9717_v32  ;;  %v1228_v50 = vpop.f32.mrb[15].mxu1 }
 0x26f   : > { %v1069_v47 = vmax.f32 %v1049_v60, 0.0  ;;  %v1052_v6 = vadd.f32 %v7101_v54, %v9717_v32  ;;  %v1043_v38 = vpop.f32.mrb[15].mxu0  ;;  %v1252_v43 = vmax.f32 %v1226_v22, 0.0  ;;  %v1229_v24 = vadd.f32 %v1228_v50, %v9697_v17 }
 0x270   : > { %v1067_v4 = vmax.f32 %v1041_v62, 0.0  ;;  %v1044_v41 = vadd.f32 %v1043_v38, %v9697_v17  ;;  %v1255_v26 = vmax.f32 %v1237_v46, 0.0 }
 0x271   : > { %v9733_v0 = vmax.f32 %v1069_v47, %v1254_v31  ;;  %v1070_v28 = vmax.f32 %v1052_v6, 0.0  ;;  %v1253_v29 = vmax.f32 %v1229_v24, 0.0  ;;  %v2518_v24 = vld [vmem:[#allocation4] sm:$0xff] }
 0x272   : > { %v9735_v12 = vmax.f32 %v1067_v4, %v1252_v43  ;;  %v1068_v44 = vmax.f32 %v1044_v41, 0.0 }
 0x273   : > { %v9737_v59 = vmax.f32 %v1070_v28, %v1255_v26  ;;  %v7160_v61 = vpop.f32.mrb[16].mxu1  ;;  %v2522_v28 = vld [vmem:[#allocation4 + $0x20] sm:$0xff]  ;;  %v2519_v26 = vld [vmem:[#allocation4 + $0x8] sm:$0xff] }
 0x274   : > { %v9739_v40 = vmax.f32 %v1068_v44, %v1253_v29  ;;  %v7136_v57 = vpop.f32.mrb[16].mxu0  ;;  %v1588_v48 = vadd.f32 %v7160_v61, %v9651_v35  ;;  %v1579_v5 = vpop.f32.mrb[17].mxu1  ;;  %v6557_v61 = vcombine.high %v2518_v24, %v2522_v28 }
 0x275   : > { %v1387_v2 = vadd.f32 %v7136_v57, %v9651_v35  ;;  %v1378_v13 = vpop.f32.mrb[17].mxu0  ;;  %v1580_v39 = vadd.f32 %v1579_v5, %v9647_v52  ;;  %v7161_v60 = vpop.f32.mrb[18].mxu1  ;;  %v6556_v57 = vcombine.low %v2518_v24, %v2522_v28 }
 0x276   : > { %v1379_v36 = vadd.f32 %v1378_v13, %v9647_v52  ;;  %v7137_v45 = vpop.f32.mrb[18].mxu0  ;;  %v1591_v55 = vadd.f32 %v7161_v60, %v9649_v14  ;;  %v1582_v22 = vpop.f32.mrb[19].mxu1  ;;  %v1644_v6 = vmax.f32 %v1588_v48, 0.0  ;;  %v2526_v13 = vld [vmem:[#allocation4 + $0x40] sm:$0xff]  ;;  %2944 = vmatprep.subr.bf16.mxu0 %v6557_v61 }
 0x277   : > { %v1443_v20 = vmax.f32 %v1387_v2, 0.0  ;;  %v1390_v27 = vadd.f32 %v7137_v45, %v9649_v14  ;;  %v1381_v62 = vpop.f32.mrb[19].mxu0  ;;  %v1583_v47 = vadd.f32 %v1582_v22, %v9645_v19  ;;  %v1642_v46 = vmax.f32 %v1580_v39, 0.0  ;;  %v2523_v2 = vld [vmem:[#allocation4 + $0x28] sm:$0xff]  ;;  %2945 = vmatpush1.bf16.msra.mxu0 %v6556_v57  ;;  %v2534_v61 = vld [vmem:[#allocation4 + $0x80] sm:$0xff] }
 0x278   : > { %v1441_v54 = vmax.f32 %v1379_v36, 0.0  ;;  %v1382_v16 = vadd.f32 %v1381_v62, %v9645_v19  ;;  %v1645_v4 = vmax.f32 %v1591_v55, 0.0  ;;  %v6558_v39 = vcombine.low %v2519_v26, %v2523_v2 }
 0x279   : > { %v1459_v31 = vmax.f32 %v9673_v49, %v1443_v20  ;;  %v1444_v38 = vmax.f32 %v1390_v27, 0.0  ;;  %v1643_v41 = vmax.f32 %v1583_v47, 0.0  ;;  %v2530_v49 = vld [vmem:[#allocation4 + $0x60] sm:$0xff]  ;;  %v6559_v45 = vcombine.high %v2519_v26, %v2523_v2 }
 0x27a   : > { %v1457_v50 = vmax.f32 %v9675_v8, %v1441_v54  ;;  %v1442_v43 = vmax.f32 %v1382_v16, 0.0  ;;  %v6564_v62 = vcombine.low %v2526_v13, %v2530_v49  ;;  %v2538_v2 = vld [vmem:[#allocation4 + $0xa0] sm:$0xff] }
 0x27b   : > { %v9751_v44 = vmax.f32 %v1459_v31, %v1644_v6  ;;  %v1460_v29 = vmax.f32 %v9681_v42, %v1444_v38  ;;  %v7164_v36 = vpop.f32.mrb[20].mxu1  ;;  %3057 = vmatprep.subr.bf16.mxu1 %v6559_v45  ;;  %v2535_v45 = vld [vmem:[#allocation4 + $0x88] sm:$0xff] }
 0x27c   : > { %v9754_v48 = vmax.f32 %v1457_v50, %v1642_v46  ;;  %v1458_v5 = vmax.f32 %v9683_v25, %v1442_v43  ;;  %v7140_v8 = vpop.f32.mrb[20].mxu0  ;;  %v1604_v27 = vadd.f32 %v7164_v36, %v9659_v10  ;;  %v1595_v55 = vpop.f32.mrb[21].mxu1  ;;  %3058 = vmatpush1.bf16.msra.mxu1 %v6558_v39  ;;  %v2527_v43 = vld [vmem:[#allocation4 + $0x48] sm:$0xff]  ;;  %v6565_v36 = vcombine.high %v2526_v13, %v2530_v49 }
 0x27d   : > { %v9757_v60 = vmax.f32 %v1460_v29, %v1645_v4  ;;  %v1403_v20 = vadd.f32 %v7140_v8, %v9659_v10  ;;  %v1394_v42 = vpop.f32.mrb[21].mxu0  ;;  %v1596_v25 = vadd.f32 %v1595_v55, %v9655_v18  ;;  %v7165_v47 = vpop.f32.mrb[22].mxu1  ;;  %v6573_v49 = vcombine.high %v2534_v61, %v2538_v2 }
 0x27e   : > { %v9761_v22 = vmax.f32 %v1458_v5, %v1643_v41  ;;  %v1395_v54 = vadd.f32 %v1394_v42, %v9655_v18  ;;  %v7141_v16 = vpop.f32.mrb[22].mxu0  ;;  %v1648_v6 = vmax.f32 %v1604_v27, 0.0  ;;  %v1607_v38 = vadd.f32 %v7165_v47, %v9657_v9  ;;  %v1598_v4 = vpop.f32.mrb[23].mxu1  ;;  %v2531_v41 = vld [vmem:[#allocation4 + $0x68] sm:$0xff]  ;;  %2946 = vmatprep.subr.bf16.mxu0 %v6565_v36 }
 0x27f   : > { %v1447_v31 = vmax.f32 %v1403_v20, 0.0  ;;  %v1406_v46 = vadd.f32 %v7141_v16, %v9657_v9  ;;  %v1397_v50 = vpop.f32.mrb[23].mxu0  ;;  %v1646_v28 = vmax.f32 %v1596_v25, 0.0  ;;  %v1599_v29 = vadd.f32 %v1598_v4, %v9653_v23  ;;  %v2539_v20 = vld [vmem:[#allocation4 + $0xa8] sm:$0xff]  ;;  %2947 = vmatpush1.bf16.msra.mxu0 %v6564_v62 }
 0x280   : > { %v1445_v24 = vmax.f32 %v1395_v54, 0.0  ;;  %v1398_v26 = vadd.f32 %v1397_v50, %v9653_v23  ;;  %v1649_v8 = vmax.f32 %v1607_v38, 0.0  ;;  %v6566_v55 = vcombine.low %v2527_v43, %v2531_v41  ;;  %2948 = vmatprep.subr.bf16.mxu0 %v6573_v49  ;;  %v2554_v49 = vld [vmem:[#allocation4 + $0x120] sm:$0xff] }
 0x281   : > { %v1463_v57 = vmax.f32 %v9693_v30, %v1447_v31  ;;  %v1448_v5 = vmax.f32 %v1406_v46, 0.0  ;;  %v1647_v42 = vmax.f32 %v1599_v29, 0.0  ;;  %v6567_v16 = vcombine.high %v2527_v43, %v2531_v41  ;;  %v2546_v29 = vld [vmem:[#allocation4 + $0xe0] sm:$0xff] }
 0x282   : > { %v1461_v27 = vmax.f32 %v9695_v34, %v1445_v24  ;;  %v1446_v39 = vmax.f32 %v1398_v26, 0.0  ;;  %v6572_v47 = vcombine.low %v2534_v61, %v2538_v2  ;;  %v6574_v46 = vcombine.low %v2535_v45, %v2539_v20  ;;  %v2542_v26 = vld [vmem:[#allocation4 + $0xc0] sm:$0xff] }
 0x283   : > { %v9771_v54 = vmax.f32 %v1463_v57, %v1648_v6  ;;  %v1464_v25 = vmax.f32 %v9701_v63, %v1448_v5  ;;  %v7168_v13 = vpop.f32.mrb[24].mxu1  ;;  %3059 = vmatprep.subr.bf16.mxu1 %v6567_v16  ;;  %v6575_v43 = vcombine.high %v2535_v45, %v2539_v20 }
 0x284   : > { %v9774_v50 = vmax.f32 %v1461_v27, %v1646_v28  ;;  %v1462_v30 = vmax.f32 %v9703_v15, %v1446_v39  ;;  %v7144_v31 = vpop.f32.mrb[24].mxu0  ;;  %v1620_v6 = vadd.f32 %v7168_v13, %v9679_v1  ;;  %v1611_v63 = vpop.f32.mrb[25].mxu1  ;;  %3060 = vmatpush1.bf16.msra.mxu1 %v6566_v55  ;;  %2949 = vmatpush1.bf16.msra.mxu0 %v6572_v47  ;;  %v2547_v55 = vld [vmem:[#allocation4 + $0xe8] sm:$0xff]  ;;  %v2550_v13 = vld [vmem:[#allocation4 + $0x100] sm:$0xff] }
 0x285   : > { %v9777_v34 = vmax.f32 %v1464_v25, %v1649_v8  ;;  %v1419_v38 = vadd.f32 %v7144_v31, %v9679_v1  ;;  %v1410_v4 = vpop.f32.mrb[25].mxu0  ;;  %v1612_v15 = vadd.f32 %v1611_v63, %v9663_v11  ;;  %v7169_v62 = vpop.f32.mrb[26].mxu1  ;;  %3061 = vmatprep.subr.bf16.mxu1 %v6575_v43  ;;  %v6580_v31 = vcombine.low %v2542_v26, %v2546_v29 }
 0x286   : > { %v9781_v41 = vmax.f32 %v1462_v30, %v1647_v42  ;;  %v1411_v24 = vadd.f32 %v1410_v4, %v9663_v11  ;;  %v7145_v28 = vpop.f32.mrb[26].mxu0  ;;  %v1652_v2 = vmax.f32 %v1620_v6, 0.0  ;;  %v1623_v5 = vadd.f32 %v7169_v62, %v9677_v53  ;;  %v1614_v36 = vpop.f32.mrb[27].mxu1  ;;  %v2543_v42 = vld [vmem:[#allocation4 + $0xc8] sm:$0xff] }
 0x287   : > { %v1451_v61 = vmax.f32 %v1419_v38, 0.0  ;;  %v1422_v57 = vadd.f32 %v7145_v28, %v9677_v53  ;;  %v1413_v8 = vpop.f32.mrb[27].mxu0  ;;  %v1650_v20 = vmax.f32 %v1612_v15, 0.0  ;;  %v1615_v39 = vadd.f32 %v1614_v36, %v9661_v51 }
 0x288   : > { %v1449_v45 = vmax.f32 %v1411_v24, 0.0  ;;  %v1414_v27 = vadd.f32 %v1413_v8, %v9661_v51  ;;  %v1653_v30 = vmax.f32 %v1623_v5, 0.0  ;;  %3062 = vmatpush1.bf16.msra.mxu1 %v6574_v46  ;;  %v6581_v63 = vcombine.high %v2542_v26, %v2546_v29 }
 0x289   : > { %v1467_v25 = vmax.f32 %v9713_v56, %v1451_v61  ;;  %v1452_v16 = vmax.f32 %v1422_v57, 0.0  ;;  %v1651_v4 = vmax.f32 %v1615_v39, 0.0  ;;  %v6582_v47 = vcombine.low %v2543_v42, %v2547_v55 }
 0x28a   : > { %v1465_v38 = vmax.f32 %v9715_v3, %v1449_v45  ;;  %v1450_v6 = vmax.f32 %v1414_v27, 0.0  ;;  %v6583_v15 = vcombine.high %v2543_v42, %v2547_v55  ;;  %2950 = vmatprep.subr.bf16.mxu0 %v6581_v63  ;;  %v6588_v57 = vcombine.low %v2550_v13, %v2554_v49  ;;  %v2555_v27 = vld [vmem:[#allocation4 + $0x128] sm:$0xff] }
 0x28b   : > { %v9791_v43 = vmax.f32 %v1467_v25, %v1652_v2  ;;  %v1468_v24 = vmax.f32 %v9721_v33, %v1452_v16  ;;  %v7172_v61 = vpop.f32.mrb[28].mxu1  ;;  %v6589_v5 = vcombine.high %v2550_v13, %v2554_v49  ;;  %2951 = vmatpush1.bf16.msra.mxu0 %v6580_v31 }
 0x28c   : > { %v9794_v28 = vmax.f32 %v1465_v38, %v1650_v20  ;;  %v1466_v56 = vmax.f32 %v9723_v21, %v1450_v6  ;;  %v7148_v62 = vpop.f32.mrb[28].mxu0  ;;  %v1636_v26 = vadd.f32 %v7172_v61, %v9719_v58  ;;  %v1627_v2 = vpop.f32.mrb[29].mxu1  ;;  %3063 = vmatprep.subr.bf16.mxu1 %v6583_v15  ;;  %v2551_v20 = vld [vmem:[#allocation4 + $0x108] sm:$0xff]  ;;  %v2558_v6 = vld [vmem:[#allocation4 + $0x140] sm:$0xff] }
 0x28d   : > { %v9797_v3 = vmax.f32 %v1468_v24, %v1653_v30  ;;  %v1435_v46 = vadd.f32 %v7148_v62, %v9719_v58  ;;  %v1426_v29 = vpop.f32.mrb[29].mxu0  ;;  %v1628_v21 = vadd.f32 %v1627_v2, %v9699_v37  ;;  %v7173_v45 = vpop.f32.mrb[30].mxu1  ;;  %3064 = vmatpush1.bf16.msra.mxu1 %v6582_v47  ;;  %2952 = vmatprep.subr.bf16.mxu0 %v6589_v5  ;;  %v2563_v62 = vld [vmem:[#allocation4 + $0x168] sm:$0xff] }
 0x28e   : > { %v9801_v33 = vmax.f32 %v1466_v56, %v1651_v4  ;;  %v1427_v8 = vadd.f32 %v1426_v29, %v9699_v37  ;;  %v7149_v36 = vpop.f32.mrb[30].mxu0  ;;  %v1656_v42 = vmax.f32 %v1636_v26, 0.0  ;;  %v1639_v25 = vadd.f32 %v7173_v45, %v9717_v32  ;;  %v1630_v30 = vpop.f32.mrb[31].mxu1  ;;  %v2562_v4 = vld [vmem:[#allocation4 + $0x160] sm:$0xff]  ;;  %v2559_v56 = vld [vmem:[#allocation4 + $0x148] sm:$0xff] }
 0x28f   : > { %v1455_v39 = vmax.f32 %v1435_v46, 0.0  ;;  %v1438_v55 = vadd.f32 %v7149_v36, %v9717_v32  ;;  %v1429_v16 = vpop.f32.mrb[31].mxu0  ;;  %v1654_v13 = vmax.f32 %v1628_v21, 0.0  ;;  %v1631_v38 = vadd.f32 %v1630_v30, %v9697_v17  ;;  %2953 = vmatpush1.bf16.msra.mxu0 %v6588_v57 }
 0x290   : > { %v1453_v31 = vmax.f32 %v1427_v8, 0.0  ;;  %v1430_v49 = vadd.f32 %v1429_v16, %v9697_v17  ;;  %v1657_v47 = vmax.f32 %v1639_v25, 0.0  ;;  %v6590_v15 = vcombine.low %v2551_v20, %v2555_v27 }
 0x291   : > { %v1471_v63 = vmax.f32 %v9733_v0, %v1455_v39  ;;  %v1456_v24 = vmax.f32 %v1438_v55, 0.0  ;;  %v1655_v46 = vmax.f32 %v1631_v38, 0.0  ;;  %v6591_v26 = vcombine.high %v2551_v20, %v2555_v27 }
 0x292   : > { %v1469_v61 = vmax.f32 %v9735_v12, %v1453_v31  ;;  %v1454_v5 = vmax.f32 %v1430_v49, 0.0  ;;  %v6596_v8 = vcombine.low %v2558_v6, %v2562_v4  ;;  %v6597_v21 = vcombine.high %v2558_v6, %v2562_v4  ;;  %v2570_v49 = vld [vmem:[#allocation4 + $0x1a0] sm:$0xff] }
 0x293   : > { %v9811_v29 = vmax.f32 %v1471_v63, %v1656_v42  ;;  %v1472_v2 = vmax.f32 %v9737_v59, %v1456_v24  ;;  %v7208_v39 = vpop.f32.mrb[32].mxu1  ;;  %3065 = vmatprep.subr.bf16.mxu1 %v6591_v26  ;;  %v6598_v57 = vcombine.low %v2559_v56, %v2563_v62  ;;  %v6599_v55 = vcombine.high %v2559_v56, %v2563_v62 }
 0x294   : > { %v9814_v36 = vmax.f32 %v1469_v61, %v1654_v13  ;;  %v1470_v0 = vmax.f32 %v9739_v40, %v1454_v5  ;;  %v7184_v45 = vpop.f32.mrb[32].mxu0  ;;  %v1990_v20 = vadd.f32 %v7208_v39, %v9651_v35  ;;  %v1981_v42 = vpop.f32.mrb[33].mxu1  ;;  %3066 = vmatpush1.bf16.msra.mxu1 %v6590_v15  ;;  %2954 = vmatprep.subr.bf16.mxu0 %v6597_v21  ;;  %v2566_v13 = vld [vmem:[#allocation4 + $0x180] sm:$0xff]  ;;  %v2567_v61 = vld [vmem:[#allocation4 + $0x188] sm:$0xff] }
 0x295   : > { %v9817_v25 = vmax.f32 %v1472_v2, %v1657_v47  ;;  %v1789_v12 = vadd.f32 %v7184_v45, %v9651_v35  ;;  %v1780_v27 = vpop.f32.mrb[33].mxu0  ;;  %v1982_v40 = vadd.f32 %v1981_v42, %v9647_v52  ;;  %v7209_v31 = vpop.f32.mrb[34].mxu1  ;;  %3067 = vmatprep.subr.bf16.mxu1 %v6599_v55  ;;  %2955 = vmatpush1.bf16.msra.mxu0 %v6596_v8  ;;  %v2571_v5 = vld [vmem:[#allocation4 + $0x1a8] sm:$0xff] }
 0x296   : > { %v9821_v59 = vmax.f32 %v1470_v0, %v1655_v46  ;;  %v1781_v16 = vadd.f32 %v1780_v27, %v9647_v52  ;;  %v7185_v30 = vpop.f32.mrb[34].mxu0  ;;  %v1993_v4 = vadd.f32 %v7209_v31, %v9649_v14  ;;  %v1984_v24 = vpop.f32.mrb[35].mxu1  ;;  %v2046_v47 = vmax.f32 %v1990_v20, 0.0 }
 0x297   : > { %v1845_v38 = vmax.f32 %v1789_v12, 0.0  ;;  %v1792_v6 = vadd.f32 %v7185_v30, %v9649_v14  ;;  %v1783_v63 = vpop.f32.mrb[35].mxu0  ;;  %v1985_v62 = vadd.f32 %v1984_v24, %v9645_v19  ;;  %v2044_v26 = vmax.f32 %v1982_v40, 0.0 }
 0x298   : > { %v1843_v15 = vmax.f32 %v1781_v16, 0.0  ;;  %v1784_v56 = vadd.f32 %v1783_v63, %v9645_v19  ;;  %3068 = vmatpush1.bf16.msra.mxu1 %v6598_v57  ;;  %v6604_v8 = vcombine.low %v2566_v13, %v2570_v49  ;;  %v2047_v0 = vmax.f32 %v1993_v4, 0.0 }
 0x299   : > { %v1861_v46 = vmax.f32 %v9751_v44, %v1845_v38  ;;  %v1846_v2 = vmax.f32 %v1792_v6, 0.0  ;;  %v6605_v39 = vcombine.high %v2566_v13, %v2570_v49  ;;  %v6606_v20 = vcombine.low %v2567_v61, %v2571_v5 }
 0x29a   : > { %v1859_v21 = vmax.f32 %v9754_v48, %v1843_v15  ;;  %v1844_v45 = vmax.f32 %v1784_v56, 0.0  ;;  %v6607_v27 = vcombine.high %v2567_v61, %v2571_v5  ;;  %v2045_v44 = vmax.f32 %v1985_v62, 0.0 }
 0x29b   : > { %v9831_v55 = vmax.f32 %v1861_v46, %v2046_v47  ;;  %v1862_v12 = vmax.f32 %v9757_v60, %v1846_v2  ;;  %v7212_v30 = vpop.f32.mrb[36].mxu1  ;;  %2956 = vmatprep.subr.bf16.mxu0 %v6605_v39 }
 0x29c   : > { %v9834_v42 = vmax.f32 %v1859_v21, %v2044_v26  ;;  %v1860_v16 = vmax.f32 %v9761_v22, %v1844_v45  ;;  %v7188_v40 = vpop.f32.mrb[36].mxu0  ;;  %v2006_v31 = vadd.f32 %v7212_v30, %v9659_v10  ;;  %v1997_v49 = vpop.f32.mrb[37].mxu1  ;;  %3069 = vmatprep.subr.bf16.mxu1 %v6607_v27  ;;  %2957 = vmatpush1.bf16.msra.mxu0 %v6604_v8 }
 0x29d   : > { %v9837_v57 = vmax.f32 %v1862_v12, %v2047_v0  ;;  %v1805_v48 = vadd.f32 %v7188_v40, %v9659_v10  ;;  %v1796_v13 = vpop.f32.mrb[37].mxu0  ;;  %v1998_v22 = vadd.f32 %v1997_v49, %v9655_v18  ;;  %v7213_v4 = vpop.f32.mrb[38].mxu1  ;;  %3070 = vmatpush1.bf16.msra.mxu1 %v6606_v20 }
 0x29e   : > { %v9841_v60 = vmax.f32 %v1860_v16, %v2045_v44  ;;  %v1797_v38 = vadd.f32 %v1796_v13, %v9655_v18  ;;  %v7189_v6 = vpop.f32.mrb[38].mxu0  ;;  %v2009_v47 = vadd.f32 %v7213_v4, %v9657_v9  ;;  %v2000_v56 = vpop.f32.mrb[39].mxu1  ;;  %v2050_v26 = vmax.f32 %v2006_v31, 0.0 }
 0x29f   : > { %v1849_v63 = vmax.f32 %v1805_v48, 0.0  ;;  %v1808_v24 = vadd.f32 %v7189_v6, %v9657_v9  ;;  %v1799_v15 = vpop.f32.mrb[39].mxu0  ;;  %v2001_v5 = vadd.f32 %v2000_v56, %v9653_v23  ;;  %v2048_v21 = vmax.f32 %v1998_v22, 0.0 }
 0x2a0   : > { %v1847_v62 = vmax.f32 %v1797_v38, 0.0  ;;  %v1800_v61 = vadd.f32 %v1799_v15, %v9653_v23  ;;  %v2051_v12 = vmax.f32 %v2009_v47, 0.0 }
 0x2a1   : > { %v1865_v46 = vmax.f32 %v9771_v54, %v1849_v63  ;;  %v1850_v2 = vmax.f32 %v1808_v24, 0.0  ;;  %v2049_v16 = vmax.f32 %v2001_v5, 0.0 }
 0x2a2   : > { %v1863_v8 = vmax.f32 %v9774_v50, %v1847_v62  ;;  %v1848_v0 = vmax.f32 %v1800_v61, 0.0 }
 0x2a3   : > { %v9851_v45 = vmax.f32 %v1865_v46, %v2050_v26  ;;  %v1866_v39 = vmax.f32 %v9777_v34, %v1850_v2  ;;  %v7216_v40 = vpop.f32.mrb[40].mxu1 }
 0x2a4   : > { %v9854_v20 = vmax.f32 %v1863_v8, %v2048_v21  ;;  %v1864_v27 = vmax.f32 %v9781_v41, %v1848_v0  ;;  %v7192_v44 = vpop.f32.mrb[40].mxu0  ;;  %v2022_v50 = vadd.f32 %v7216_v40, %v9679_v1  ;;  %v2013_v31 = vpop.f32.mrb[41].mxu1 }
 0x2a5   : > { %v9857_v30 = vmax.f32 %v1866_v39, %v2051_v12  ;;  %v1821_v54 = vadd.f32 %v7192_v44, %v9679_v1  ;;  %v1812_v48 = vpop.f32.mrb[41].mxu0  ;;  %v2014_v49 = vadd.f32 %v2013_v31, %v9663_v11  ;;  %v7217_v22 = vpop.f32.mrb[42].mxu1 }
 0x2a6   : > { %v9861_v13 = vmax.f32 %v1864_v27, %v2049_v16  ;;  %v1813_v34 = vadd.f32 %v1812_v48, %v9663_v11  ;;  %v7193_v38 = vpop.f32.mrb[42].mxu0  ;;  %v2025_v4 = vadd.f32 %v7217_v22, %v9677_v53  ;;  %v2016_v24 = vpop.f32.mrb[43].mxu1  ;;  %v2054_v61 = vmax.f32 %v2022_v50, 0.0 }
 0x2a7   : > { %v1853_v41 = vmax.f32 %v1821_v54, 0.0  ;;  %v1824_v6 = vadd.f32 %v7193_v38, %v9677_v53  ;;  %v1815_v63 = vpop.f32.mrb[43].mxu0  ;;  %v2017_v56 = vadd.f32 %v2016_v24, %v9661_v51  ;;  %v2052_v26 = vmax.f32 %v2014_v49, 0.0 }
 0x2a8   : > { %v1851_v47 = vmax.f32 %v1813_v34, 0.0  ;;  %v1816_v15 = vadd.f32 %v1815_v63, %v9661_v51  ;;  %v2055_v0 = vmax.f32 %v2025_v4, 0.0 }
 0x2a9   : > { %v1869_v62 = vmax.f32 %v9791_v43, %v1853_v41  ;;  %v1854_v5 = vmax.f32 %v1824_v6, 0.0  ;;  %v2053_v27 = vmax.f32 %v2017_v56, 0.0 }
 0x2aa   : > { %v1867_v46 = vmax.f32 %v9794_v28, %v1851_v47  ;;  %v1852_v2 = vmax.f32 %v1816_v15, 0.0 }
 0x2ab   : > { %v9871_v8 = vmax.f32 %v1869_v62, %v2054_v61  ;;  %v1870_v21 = vmax.f32 %v9797_v3, %v1854_v5  ;;  %v7220_v44 = vpop.f32.mrb[44].mxu1 }
 0x2ac   : > { %v9874_v39 = vmax.f32 %v1867_v46, %v2052_v26  ;;  %v1868_v12 = vmax.f32 %v9801_v33, %v1852_v2  ;;  %v7196_v16 = vpop.f32.mrb[44].mxu0  ;;  %v2038_v28 = vadd.f32 %v7220_v44, %v9719_v58  ;;  %v2029_v50 = vpop.f32.mrb[45].mxu1 }
 0x2ad   : > { %v9877_v40 = vmax.f32 %v1870_v21, %v2055_v0  ;;  %v1837_v43 = vadd.f32 %v7196_v16, %v9719_v58  ;;  %v1828_v54 = vpop.f32.mrb[45].mxu0  ;;  %v2030_v31 = vadd.f32 %v2029_v50, %v9699_v37  ;;  %v7221_v49 = vpop.f32.mrb[46].mxu1 }
 0x2ae   : > { %v9881_v48 = vmax.f32 %v1868_v12, %v2053_v27  ;;  %v1829_v3 = vadd.f32 %v1828_v54, %v9699_v37  ;;  %v7197_v34 = vpop.f32.mrb[46].mxu0  ;;  %v2041_v22 = vadd.f32 %v7221_v49, %v9717_v32  ;;  %v2032_v6 = vpop.f32.mrb[47].mxu1  ;;  %v2058_v15 = vmax.f32 %v2038_v28, 0.0 }
 0x2af   : > { %v1857_v33 = vmax.f32 %v1837_v43, 0.0  ;;  %v1840_v38 = vadd.f32 %v7197_v34, %v9717_v32  ;;  %v1831_v41 = vpop.f32.mrb[47].mxu0  ;;  %v2033_v24 = vadd.f32 %v2032_v6, %v9697_v17  ;;  %v2056_v61 = vmax.f32 %v2030_v31, 0.0 }
 0x2b0   : > { %v1855_v4 = vmax.f32 %v1829_v3, 0.0  ;;  %v1832_v63 = vadd.f32 %v1831_v41, %v9697_v17  ;;  %v2059_v2 = vmax.f32 %v2041_v22, 0.0 }
 0x2b1   : > { %v1873_v47 = vmax.f32 %v9811_v29, %v1857_v33  ;;  %v1858_v56 = vmax.f32 %v1840_v38, 0.0  ;;  %v2057_v12 = vmax.f32 %v2033_v24, 0.0 }
 0x2b2   : > { %v1871_v62 = vmax.f32 %v9814_v36, %v1855_v4  ;;  %v1856_v5 = vmax.f32 %v1832_v63, 0.0 }
 0x2b3   : > { %v9891_v46 = vmax.f32 %v1873_v47, %v2058_v15  ;;  %v1874_v26 = vmax.f32 %v9817_v25, %v1858_v56  ;;  %v7256_v16 = vpop.f32.mrb[48].mxu1 }
 0x2b4   : > { %v9894_v21 = vmax.f32 %v1871_v62, %v2056_v61  ;;  %v1872_v0 = vmax.f32 %v9821_v59, %v1856_v5  ;;  %v7232_v27 = vpop.f32.mrb[48].mxu0  ;;  %v2392_v36 = vadd.f32 %v7256_v16, %v9651_v35  ;;  %v2383_v28 = vpop.f32.mrb[49].mxu1 }
 0x2b5   : > { %v9897_v44 = vmax.f32 %v1874_v26, %v2059_v2  ;;  %v2191_v29 = vadd.f32 %v7232_v27, %v9651_v35  ;;  %v2182_v43 = vpop.f32.mrb[49].mxu0  ;;  %v2384_v50 = vadd.f32 %v2383_v28, %v9647_v52  ;;  %v7257_v31 = vpop.f32.mrb[50].mxu1 }
 0x2b6   : > { %v9901_v54 = vmax.f32 %v1872_v0, %v2057_v12  ;;  %v2183_v25 = vadd.f32 %v2182_v43, %v9647_v52  ;;  %v7233_v3 = vpop.f32.mrb[50].mxu0  ;;  %v2395_v49 = vadd.f32 %v7257_v31, %v9649_v14  ;;  %v2386_v38 = vpop.f32.mrb[51].mxu1  ;;  %v2448_v4 = vmax.f32 %v2392_v36, 0.0  ;;  %v2578_v43 = vld [vmem:[#allocation4 + $0x1e0] sm:$0xff] }
 0x2b7   : > { %v2247_v59 = vmax.f32 %v2191_v29, 0.0  ;;  %v2194_v34 = vadd.f32 %v7233_v3, %v9649_v14  ;;  %v2185_v33 = vpop.f32.mrb[51].mxu0  ;;  %v2387_v41 = vadd.f32 %v2386_v38, %v9645_v19  ;;  %v2446_v24 = vmax.f32 %v2384_v50, 0.0 }
 0x2b8   : > { %v2245_v22 = vmax.f32 %v2183_v25, 0.0  ;;  %v2186_v35 = vadd.f32 %v2185_v33, %v9645_v19  ;;  %v2449_v62 = vmax.f32 %v2395_v49, 0.0  ;;  %v2575_v33 = vld [vmem:[#allocation4 + $0x1c8] sm:$0xff] }
 0x2b9   : > { %v2263_v6 = vmax.f32 %v9831_v55, %v2247_v59  ;;  %v2248_v63 = vmax.f32 %v2194_v34, 0.0  ;;  %v2447_v5 = vmax.f32 %v2387_v41, 0.0 }
 0x2ba   : > { %v2261_v52 = vmax.f32 %v9834_v42, %v2245_v22  ;;  %v2246_v47 = vmax.f32 %v2186_v35, 0.0 }
 0x2bb   : > { %v2464_v15 = vmax.f32 %v2263_v6, %v2448_v4  ;;  %v2264_v56 = vmax.f32 %v9837_v57, %v2248_v63  ;;  %v7260_v2 = vpop.f32.mrb[52].mxu1 }
 0x2bc   : > { %v2462_v14 = vmax.f32 %v2261_v52, %v2446_v24  ;;  %v2262_v61 = vmax.f32 %v9841_v60, %v2246_v47  ;;  %v7236_v26 = vpop.f32.mrb[52].mxu0  ;;  %v2408_v55 = vadd.f32 %v7260_v2, %v9659_v10  ;;  %v2399_v42 = vpop.f32.mrb[53].mxu1  ;;  %v2574_v60 = vld [vmem:[#allocation4 + $0x1c0] sm:$0xff] }
 0x2bd   : > { %v9913_v0 = vmax.f32 %v2264_v56, %v2449_v62  ;;  %v2207_v19 = vadd.f32 %v7236_v26, %v9659_v10  ;;  %v2198_v12 = vpop.f32.mrb[53].mxu0  ;;  %v2400_v57 = vadd.f32 %v2399_v42, %v9655_v18  ;;  %v7261_v36 = vpop.f32.mrb[54].mxu1  ;;  %v6612_v41 = vcombine.low %v2574_v60, %v2578_v43 }
 0x2be   : > { %v2463_v27 = vmax.f32 %v2262_v61, %v2447_v5  ;;  %v2199_v16 = vadd.f32 %v2198_v12, %v9655_v18  ;;  %v7237_v29 = vpop.f32.mrb[54].mxu0  ;;  %2478 = vxpose.xlu1.b32.start [1/16] %v2462_v14, 128  ;;  %v2411_v50 = vadd.f32 %v7261_v36, %v9657_v9  ;;  %v2402_v31 = vpop.f32.mrb[55].mxu1  ;;  %v2452_v10 = vmax.f32 %v2408_v55, 0.0  ;;  %v2579_v18 = vld [vmem:[#allocation4 + $0x1e8] sm:$0xff] }
 0x2bf   : > { %v2251_v28 = vmax.f32 %v2207_v19, 0.0  ;;  %v2210_v25 = vadd.f32 %v7237_v29, %v9657_v9  ;;  %v2201_v3 = vpop.f32.mrb[55].mxu0  ;;  %v2403_v49 = vadd.f32 %v2402_v31, %v9653_v23  ;;  %v2450_v22 = vmax.f32 %v2400_v57, 0.0 }
 0x2c0   : > { %v2249_v59 = vmax.f32 %v2199_v16, 0.0  ;;  %v2202_v34 = vadd.f32 %v2201_v3, %v9653_v23  ;;  %v2453_v4 = vmax.f32 %v2411_v50, 0.0  ;;  %v6613_v9 = vcombine.high %v2574_v60, %v2578_v43  ;;  %v9939_v16 = vld [vmem:[#allocation4 + $0x30] sm:$0xff]  ;;  %v9945_v50 = vld [vmem:[#allocation4 + $0x18] sm:$0xff] }
 0x2c1   : > { %v2267_v38 = vmax.f32 %v9851_v45, %v2251_v28  ;;  %v2252_v35 = vmax.f32 %v2210_v25, 0.0  ;;  %v6614_v47 = vcombine.low %v2575_v33, %v2579_v18  ;;  %v6615_v56 = vcombine.high %v2575_v33, %v2579_v18 }
 0x2c2   : > { %v2265_v6 = vmax.f32 %v9854_v20, %v2249_v59  ;;  %v2250_v63 = vmax.f32 %v2202_v34, 0.0  ;;  %2479 = vxpose.xlu1.b32.cont [2/16] %v2463_v27, 128  ;;  %v2451_v14 = vmax.f32 %v2403_v49, 0.0  ;;  %2958 = vmatprep.subr.bf16.mxu0 %v6613_v9  ;;  %v9937_v27 = vld [vmem:[#allocation4 + $0x10] sm:$0xff] }
 0x2c3   : > { %v9925_v52 = vmax.f32 %v2267_v38, %v2452_v10  ;;  %v2268_v24 = vmax.f32 %v9857_v30, %v2252_v35  ;;  %v7264_v61 = vpop.f32.mrb[56].mxu1  ;;  %3071 = vmatprep.subr.bf16.mxu1 %v6615_v56  ;;  %2959 = vmatpush1.bf16.msra.mxu0 %v6612_v41  ;;  %v6560_v59 = vcombine.low %v9937_v27, %v9939_v16 }
 0x2c4   : > { %v2466_v23 = vmax.f32 %v2265_v6, %v2450_v22  ;;  %v2266_v62 = vmax.f32 %v9861_v13, %v2250_v63  ;;  %v7240_v45 = vpop.f32.mrb[56].mxu0  ;;  %v2424_v26 = vadd.f32 %v7264_v61, %v9679_v1  ;;  %v2415_v19 = vpop.f32.mrb[57].mxu1  ;;  %3072 = vmatpush1.bf16.msra.mxu1 %v6614_v47 }
 0x2c5   : > { %v9929_v5 = vmax.f32 %v2268_v24, %v2453_v4  ;;  %v2223_v20 = vadd.f32 %v7240_v45, %v9679_v1  ;;  %v2214_v2 = vpop.f32.mrb[57].mxu0  ;;  %v2416_v13 = vadd.f32 %v2415_v19, %v9663_v11  ;;  %v7265_v42 = vpop.f32.mrb[58].mxu1 }
 0x2c6   : > { %v9933_v30 = vmax.f32 %v2266_v62, %v2451_v14  ;;  %v2215_v55 = vadd.f32 %v2214_v2, %v9663_v11  ;;  %v7241_v12 = vpop.f32.mrb[58].mxu0  ;;  %2480 = vxpose.xlu1.b32.cont [3/16] %v2464_v15, 128  ;;  %v2427_v29 = vadd.f32 %v7265_v42, %v9677_v53  ;;  %v2418_v60 = vpop.f32.mrb[59].mxu1  ;;  %v2456_v43 = vmax.f32 %v2424_v26, 0.0  ;;  %v9947_v15 = vld [vmem:[#allocation4 + $0x38] sm:$0xff] }
 0x2c7   : > { %v2255_v57 = vmax.f32 %v2223_v20, 0.0  ;;  %v2226_v1 = vadd.f32 %v7241_v12, %v9677_v53  ;;  %v2217_v36 = vpop.f32.mrb[59].mxu0  ;;  %v2419_v11 = vadd.f32 %v2418_v60, %v9661_v51  ;;  %v2454_v31 = vmax.f32 %v2416_v13, 0.0 }
 0x2c8   : > { %v2253_v28 = vmax.f32 %v2215_v55, 0.0  ;;  %v2218_v25 = vadd.f32 %v2217_v36, %v9661_v51  ;;  %v2457_v34 = vmax.f32 %v2427_v29, 0.0  ;;  %v6561_v51 = vcombine.high %v9937_v27, %v9939_v16  ;;  %v2549_v27 = vld [vmem:[#allocation4 + $0xf8] sm:$0xff] }
 0x2c9   : > { %v2271_v3 = vmax.f32 %v9871_v8, %v2255_v57  ;;  %v2256_v10 = vmax.f32 %v2226_v1, 0.0  ;;  %v6562_v8 = vcombine.low %v9945_v50, %v9947_v15  ;;  %v6563_v38 = vcombine.high %v9945_v50, %v9947_v15 }
 0x2ca   : > { %v2269_v53 = vmax.f32 %v9874_v39, %v2253_v28  ;;  %v2254_v49 = vmax.f32 %v2218_v25, 0.0  ;;  %2481 = vxpose.xlu1.b32.cont [4/16] %v9913_v0, 128  ;;  %v2455_v39 = vmax.f32 %v2419_v11, 0.0  ;;  %3170 = vmatprep.subr.bf16.mxu0 %v6561_v51  ;;  %v2536_v11 = vld [vmem:[#allocation4 + $0x90] sm:$0xff] }
 0x2cb   : > { %v2472_v33 = vmax.f32 %v2271_v3, %v2456_v43  ;;  %v2272_v18 = vmax.f32 %v9877_v40, %v2256_v10  ;;  %v7268_v6 = vpop.f32.mrb[60].mxu1  ;;  %3283 = vmatprep.subr.bf16.mxu1 %v6563_v38  ;;  %v2541_v10 = vld [vmem:[#allocation4 + $0xb8] sm:$0xff]  ;;  %v2548_v38 = vld [vmem:[#allocation4 + $0xf0] sm:$0xff] }
 0x2cc   : > { %v2470_v22 = vmax.f32 %v2269_v53, %v2454_v31  ;;  %v2270_v35 = vmax.f32 %v9881_v48, %v2254_v49  ;;  %v7244_v41 = vpop.f32.mrb[60].mxu0  ;;  %v2440_v63 = vadd.f32 %v7268_v6, %v9719_v58  ;;  %v2431_v40 = vpop.f32.mrb[61].mxu1  ;;  %v2537_v31 = vld [vmem:[#allocation4 + $0x98] sm:$0xff] }
 0x2cd   : > { %v2473_v0 = vmax.f32 %v2272_v18, %v2457_v34  ;;  %v2239_v4 = vadd.f32 %v7244_v41, %v9719_v58  ;;  %v2230_v9 = vpop.f32.mrb[61].mxu0  ;;  %v2432_v56 = vadd.f32 %v2431_v40, %v9699_v37  ;;  %v7269_v14 = vpop.f32.mrb[62].mxu1  ;;  %v2544_v18 = vld [vmem:[#allocation4 + $0xd0] sm:$0xff]  ;;  %v2553_v6 = vld [vmem:[#allocation4 + $0x118] sm:$0xff] }
 0x2ce   : > { %v2471_v24 = vmax.f32 %v2270_v35, %v2455_v39  ;;  %v2231_v47 = vadd.f32 %v2230_v9, %v9699_v37  ;;  %v7245_v62 = vpop.f32.mrb[62].mxu0  ;;  %2482 = vxpose.xlu1.b32.cont [5/16] %v2466_v23, 128  ;;  %v2443_v61 = vadd.f32 %v7269_v14, %v9717_v32  ;;  %v2434_v26 = vpop.f32.mrb[63].mxu1  ;;  %v2460_v13 = vmax.f32 %v2440_v63, 0.0  ;;  %v2552_v39 = vld [vmem:[#allocation4 + $0x110] sm:$0xff]  ;;  %v2565_v14 = vld [vmem:[#allocation4 + $0x178] sm:$0xff] }
 0x2cf   : > { %v2259_v48 = vmax.f32 %v2239_v4, 0.0  ;;  %v2242_v45 = vadd.f32 %v7245_v62, %v9717_v32  ;;  %v2233_v20 = vpop.f32.mrb[63].mxu0  ;;  %v2435_v19 = vadd.f32 %v2434_v26, %v9697_v17  ;;  %v2458_v42 = vmax.f32 %v2432_v56, 0.0  ;;  %v2556_v41 = vld [vmem:[#allocation4 + $0x130] sm:$0xff]  ;;  %v2561_v62 = vld [vmem:[#allocation4 + $0x158] sm:$0xff] }
 0x2d0   : > { %v2257_v2 = vmax.f32 %v2231_v47, 0.0  ;;  %v2234_v58 = vadd.f32 %v2233_v20, %v9697_v17  ;;  %v2461_v1 = vmax.f32 %v2443_v61, 0.0  ;;  %v6584_v63 = vcombine.low %v2544_v18, %v2548_v38  ;;  %v2560_v47 = vld [vmem:[#allocation4 + $0x150] sm:$0xff] }
 0x2d1   : > { %v2275_v55 = vmax.f32 %v9891_v46, %v2259_v48  ;;  %v2260_v12 = vmax.f32 %v2242_v45, 0.0  ;;  %v2459_v60 = vmax.f32 %v2435_v19, 0.0  ;;  %v6593_v40 = vcombine.high %v2552_v39, %v2556_v41  ;;  %v2564_v56 = vld [vmem:[#allocation4 + $0x170] sm:$0xff] }
 0x2d2   : > { %v2273_v37 = vmax.f32 %v9894_v21, %v2257_v2  ;;  %v2258_v23 = vmax.f32 %v2234_v58, 0.0  ;;  %2483 = vxpose.xlu1.b32.cont [6/16] %v9933_v30, 128  ;;  %v2528_v21 = vld [vmem:[#allocation4 + $0x50] sm:$0xff]  ;;  %v2529_v30 = vld [vmem:[#allocation4 + $0x58] sm:$0xff]  ;;  %v6592_v61 = vcombine.low %v2552_v39, %v2556_v41  ;;  %v6601_v26 = vcombine.high %v2560_v47, %v2564_v56 }
 0x2d3   : > { %v2476_v57 = vmax.f32 %v2275_v55, %v2460_v13  ;;  %v2276_v32 = vmax.f32 %v9897_v44, %v2260_v12  ;;  %v2532_v44 = vld [vmem:[#allocation4 + $0x70] sm:$0xff]  ;;  %v6603_v2 = vcombine.high %v2561_v62, %v2565_v14  ;;  %v2569_v55 = vld [vmem:[#allocation4 + $0x198] sm:$0xff] }
 0x2d4   : > { %v2474_v29 = vmax.f32 %v2273_v37, %v2458_v42  ;;  %v2274_v36 = vmax.f32 %v9901_v54, %v2258_v23  ;;  %v2533_v54 = vld [vmem:[#allocation4 + $0x78] sm:$0xff]  ;;  %v6568_v34 = vcombine.low %v2528_v21, %v2532_v44  ;;  %v2568_v58 = vld [vmem:[#allocation4 + $0x190] sm:$0xff]  ;;  %v6600_v37 = vcombine.low %v2560_v47, %v2564_v56 }
 0x2d5   : > { %v2477_v43 = vmax.f32 %v2276_v32, %v2461_v1  ;;  %v6571_v3 = vcombine.high %v2529_v30, %v2533_v54  ;;  %v6570_v49 = vcombine.low %v2529_v30, %v2533_v54  ;;  %v2572_v19 = vld [vmem:[#allocation4 + $0x1b0] sm:$0xff]  ;;  %v2573_v13 = vld [vmem:[#allocation4 + $0x1b8] sm:$0xff]  ;;  %v6602_v42 = vcombine.low %v2561_v62, %v2565_v14 }
 0x2d6   : > { %v2475_v17 = vmax.f32 %v2274_v36, %v2459_v60  ;;  %2484 = vxpose.xlu1.b32.cont [7/16] %v9925_v52, 128  ;;  %v6569_v52 = vcombine.high %v2528_v21, %v2532_v44  ;;  %v6609_v23 = vcombine.high %v2568_v58, %v2572_v19  ;;  %v2576_v32 = vld [vmem:[#allocation4 + $0x1d0] sm:$0xff]  ;;  %v2581_v36 = vld [vmem:[#allocation4 + $0x1f8] sm:$0xff] }
 0x2d7   : > { %v2580_v1 = vld [vmem:[#allocation4 + $0x1f0] sm:$0xff] }
 0x2d8   : > { %v6617_v21 = vcombine.high %v2576_v32, %v2580_v1  ;;  %v6616_v54 = vcombine.low %v2576_v32, %v2580_v1 }
 0x2da   : > { %2485 = vxpose.xlu1.b32.cont [8/16] %v9929_v5, 128  ;;  %v2540_v5 = vld [vmem:[#allocation4 + $0xb0] sm:$0xff] }
 0x2db   : > { %v6577_v51 = vcombine.high %v2536_v11, %v2540_v5  ;;  %v6576_v15 = vcombine.low %v2536_v11, %v2540_v5 }
 0x2de   : > { %2486 = vxpose.xlu1.b32.cont [9/16] %v2470_v22, 128  ;;  %v2545_v22 = vld [vmem:[#allocation4 + $0xd8] sm:$0xff] }
 0x2df   : > { %v6587_v35 = vcombine.high %v2545_v22, %v2549_v27  ;;  %v6586_v9 = vcombine.low %v2545_v22, %v2549_v27  ;;  %v10672_v22 = vld [vmem:[#allocation30_spill] sm:$0xff] }
 0x2e2   : > { %2487 = vxpose.xlu1.b32.cont [10/16] %v2471_v24, 128 }
 0x2e6   : > { %2488 = vxpose.xlu1.b32.cont [11/16] %v2472_v33, 128  ;;  %v6579_v33 = vcombine.high %v2537_v31, %v2541_v10 }
 0x2ea   : > { %2489 = vxpose.xlu1.b32.cont [12/16] %v2473_v0, 128  ;;  %v2557_v0 = vld [vmem:[#allocation4 + $0x138] sm:$0xff] }
 0x2eb   : > { %v6595_v24 = vcombine.high %v2553_v6, %v2557_v0  ;;  %v6594_v20 = vcombine.low %v2553_v6, %v2557_v0 }
 0x2ee   : > { %2490 = vxpose.xlu1.b32.cont [13/16] %v2474_v29, 128  ;;  %v2577_v29 = vld [vmem:[#allocation4 + $0x1d8] sm:$0xff] }
 0x2ef   : > { %v6619_v44 = vcombine.high %v2577_v29, %v2581_v36 }
 0x2f2   : > { %2491 = vxpose.xlu1.b32.cont [14/16] %v2475_v17, 128  ;;  %v6608_v17 = vcombine.low %v2568_v58, %v2572_v19 }
 0x2f6   : > { %2492 = vxpose.xlu1.b32.cont [15/16] %v2476_v57, 128  ;;  %v6611_v57 = vcombine.high %v2569_v55, %v2573_v13 }
 0x2fa   : > { %2493 = vxpose.xlu1.b32.end [16/16] %v2477_v43, 128 }
 0x33e   : > { %v2494_v46 = vpop.trf.xlu1 }
 0x342   : > { %v2495_v28 = vpop.trf.xlu1 }
 0x343   : > { %v9977_v25 = vpack.c.bf16 %v2495_v28, %v2494_v46  ;;  %v6610_v46 = vcombine.low %v2569_v55, %v2573_v13  ;;  %v6618_v28 = vcombine.low %v2577_v29, %v2581_v36 }
 0x345   : > { %2977 = vmatmul.mubr.bf16.vlgmr.msra.gmra.mrb[64].mxu0 %v9977_v25  ;;  %3090 = vmatmul.mubr.bf16.vlgmr.msra.gmra.mrb[64].mxu1 %v9977_v25 }
 0x346   : > { %3171 = vmatpush1.bf16.msra.mxu0 %v6560_v59  ;;  %3284 = vmatpush1.bf16.msra.mxu1 %v6562_v8  ;;  %v2496_v53 = vpop.trf.xlu1  ;;  %v6578_v59 = vcombine.low %v2537_v31, %v2541_v10  ;;  %v6585_v8 = vcombine.high %v2544_v18, %v2548_v38  ;;  %v10671_v18 = vld [vmem:[#allocation28_spill] sm:$0xff] }
 0x347   : > { %2986 = vmatprep.mubr.bf16.mxu0 %v10669_v7  ;;  %3099 = vmatprep.mubr.bf16.mxu1 %v10669_v7 }
 0x348   : > { %3172 = vmatprep.subr.bf16.mxu0 %v6569_v52  ;;  %3285 = vmatprep.subr.bf16.mxu1 %v6571_v3 }
 0x34a   : > { %v2497_v16 = vpop.trf.xlu1  ;;  %3173 = vmatpush1.bf16.msra.mxu0 %v6568_v34  ;;  %3286 = vmatpush1.bf16.msra.mxu1 %v6570_v49 }
 0x34b   : > { %v9989_v50 = vpack.c.bf16 %v2497_v16, %v2496_v53  ;;  %3174 = vmatprep.subr.bf16.mxu0 %v6577_v51  ;;  %3287 = vmatprep.subr.bf16.mxu1 %v6579_v33  ;;  %v10673_v16 = vld [vmem:[#allocation29_spill] sm:$0xff] }
 0x34d   : > { %2987 = vmatmul.mubr.bf16.gmra.mrb[68].mxu0 %v9989_v50  ;;  %3100 = vmatmul.mubr.bf16.gmra.mrb[68].mxu1 %v9989_v50 }
 0x34e   : > { %v2498_v4 = vpop.trf.xlu1  ;;  %2996 = vmatprep.mubr.bf16.mxu0 %v10669_v7  ;;  %3109 = vmatprep.mubr.bf16.mxu1 %v10669_v7 }
 0x34f   : > { %3175 = vmatpush1.bf16.msra.mxu0 %v6576_v15  ;;  %3288 = vmatpush1.bf16.msra.mxu1 %v6578_v59 }
 0x350   : > { %3176 = vmatprep.subr.bf16.mxu0 %v6585_v8  ;;  %3289 = vmatprep.subr.bf16.mxu1 %v6587_v35 }
 0x352   : > { %v2499_v48 = vpop.trf.xlu1 }
 0x353   : > { %v9995_v45 = vpack.c.bf16 %v2499_v48, %v2498_v4  ;;  %3177 = vmatpush1.bf16.msra.mxu0 %v6584_v63  ;;  %3290 = vmatpush1.bf16.msra.mxu1 %v6586_v9 }
 0x354   : > { %3178 = vmatprep.subr.bf16.mxu0 %v6593_v40  ;;  %3291 = vmatprep.subr.bf16.mxu1 %v6595_v24 }
 0x355   : > { %2997 = vmatmul.mubr.bf16.gmra.mrb[72].mxu0 %v9995_v45  ;;  %3110 = vmatmul.mubr.bf16.gmra.mrb[72].mxu1 %v9995_v45 }
 0x356   : > { %v2500_v12 = vpop.trf.xlu1  ;;  %3006 = vmatprep.mubr.bf16.mxu0 %v10669_v7  ;;  %3119 = vmatprep.mubr.bf16.mxu1 %v10669_v7 }
 0x357   : > { %3179 = vmatpush1.bf16.msra.mxu0 %v6592_v61  ;;  %3292 = vmatpush1.bf16.msra.mxu1 %v6594_v20 }
 0x358   : > { %3180 = vmatprep.subr.bf16.mxu0 %v6601_v26  ;;  %3293 = vmatprep.subr.bf16.mxu1 %v6603_v2 }
 0x35a   : > { %v2501_v60 = vpop.trf.xlu1 }
 0x35b   : > { %v2513_v43 = vpack.c.bf16 %v2501_v60, %v2500_v12  ;;  %3181 = vmatpush1.bf16.msra.mxu0 %v6600_v37  ;;  %3294 = vmatpush1.bf16.msra.mxu1 %v6602_v42 }
 0x35c   : > { %3182 = vmatprep.subr.bf16.mxu0 %v6609_v23  ;;  %3295 = vmatprep.subr.bf16.mxu1 %v6611_v57 }
 0x35d   : > { %3007 = vmatmul.mubr.bf16.gmra.mrb[76].mxu0 %v2513_v43  ;;  %3120 = vmatmul.mubr.bf16.gmra.mrb[76].mxu1 %v2513_v43 }
 0x35e   : > { %v2502_v30 = vpop.trf.xlu1  ;;  %3016 = vmatprep.mubr.bf16.mxu0 %v10669_v7  ;;  %3129 = vmatprep.mubr.bf16.mxu1 %v10669_v7 }
 0x35f   : > { %3183 = vmatpush1.bf16.msra.mxu0 %v6608_v17  ;;  %3296 = vmatpush1.bf16.msra.mxu1 %v6610_v46 }
 0x360   : > { %3184 = vmatprep.subr.bf16.mxu0 %v6617_v21  ;;  %3297 = vmatprep.subr.bf16.mxu1 %v6619_v44 }
 0x362   : > { %v2503_v11 = vpop.trf.xlu1 }
 0x363   : > { %v2514_v52 = vpack.c.bf16 %v2503_v11, %v2502_v30  ;;  %3185 = vmatpush1.bf16.msra.mxu0 %v6616_v54  ;;  %3298 = vmatpush1.bf16.msra.mxu1 %v6618_v28 }
 0x365   : > { %3017 = vmatmul.mubr.bf16.gmra.mrb[80].mxu0 %v2514_v52  ;;  %3130 = vmatmul.mubr.bf16.gmra.mrb[80].mxu1 %v2514_v52 }
 0x366   : > { %v2504_v3 = vpop.trf.xlu1  ;;  %3026 = vmatprep.mubr.bf16.mxu0 %v10669_v7  ;;  %3139 = vmatprep.mubr.bf16.mxu1 %v10669_v7 }
 0x36a   : > { %v2505_v5 = vpop.trf.xlu1 }
 0x36b   : > { %v2515_v31 = vpack.c.bf16 %v2505_v5, %v2504_v3 }
 0x36d   : > { %3027 = vmatmul.mubr.bf16.gmra.mrb[84].mxu0 %v2515_v31  ;;  %3140 = vmatmul.mubr.bf16.gmra.mrb[84].mxu1 %v2515_v31 }
 0x36e   : > { %v2506_v10 = vpop.trf.xlu1  ;;  %3036 = vmatprep.mubr.bf16.mxu0 %v10669_v7  ;;  %3149 = vmatprep.mubr.bf16.mxu1 %v10669_v7 }
 0x372   : > { %v2507_v53 = vpop.trf.xlu1 }
 0x373   : > { %v2516_v34 = vpack.c.bf16 %v2507_v53, %v2506_v10 }
 0x375   : > { %3037 = vmatmul.mubr.bf16.gmra.mrb[88].mxu0 %v2516_v34  ;;  %3150 = vmatmul.mubr.bf16.gmra.mrb[88].mxu1 %v2516_v34 }
 0x376   : > { %v2508_v49 = vpop.trf.xlu1  ;;  %3046 = vmatprep.mubr.bf16.mxu0 %v10669_v7  ;;  %3159 = vmatprep.mubr.bf16.mxu1 %v10669_v7 }
 0x37a   : > { %v2509_v51 = vpop.trf.xlu1 }
 0x37b   : > { %v2517_v33 = vpack.c.bf16 %v2509_v51, %v2508_v49 }
 0x37d   : > { %3047 = vmatmul.mubr.bf16.gmra.mrb[92].mxu0 %v2517_v33  ;;  %3160 = vmatmul.mubr.bf16.gmra.mrb[92].mxu1 %v2517_v33 }
 0x37e   : > { %3202 = vmatprep.mubr.bf16.mxu0 %v10669_v7  ;;  %3315 = vmatprep.mubr.bf16.mxu1 %v10669_v7 }
 0x385   : > { %3203 = vmatmul.mubr.bf16.vlgmr.msra.gmra.mrb[96].mxu0 %v9977_v25  ;;  %3316 = vmatmul.mubr.bf16.vlgmr.msra.gmra.mrb[96].mxu1 %v9977_v25  ;;  %v10034_v25 = vld [vmem:[%s10670_s21] sm:$0xff] }
 0x386   : > { %3212 = vmatprep.mubr.bf16.mxu0 %v10669_v7  ;;  %3325 = vmatprep.mubr.bf16.mxu1 %v10669_v7  ;;  %v10038_v38 = vrot.slane %v10034_v25, %v10671_v18  ;;  %v10042_v27 = vrot.slane %v10034_v25, %v10672_v22 }
 0x38d   : > { %3213 = vmatmul.mubr.bf16.gmra.mrb[100].mxu0 %v9989_v50  ;;  %3326 = vmatmul.mubr.bf16.gmra.mrb[100].mxu1 %v9989_v50  ;;  %v10046_v50 = vrot.slane %v10034_v25, %v10673_v16 }
 0x38e   : > { %3222 = vmatprep.mubr.bf16.mxu0 %v10669_v7  ;;  %3335 = vmatprep.mubr.bf16.mxu1 %v10669_v7 }
 0x395   : > { %3223 = vmatmul.mubr.bf16.gmra.mrb[104].mxu0 %v9995_v45  ;;  %3336 = vmatmul.mubr.bf16.gmra.mrb[104].mxu1 %v9995_v45 }
 0x396   : > { %3232 = vmatprep.mubr.bf16.mxu0 %v10669_v7  ;;  %3345 = vmatprep.mubr.bf16.mxu1 %v10669_v7 }
 0x39d   : > { %3233 = vmatmul.mubr.bf16.gmra.mrb[108].mxu0 %v2513_v43  ;;  %3346 = vmatmul.mubr.bf16.gmra.mrb[108].mxu1 %v2513_v43 }
 0x39e   : > { %3242 = vmatprep.mubr.bf16.mxu0 %v10669_v7  ;;  %3355 = vmatprep.mubr.bf16.mxu1 %v10669_v7 }
 0x3a5   : > { %3243 = vmatmul.mubr.bf16.gmra.mrb[112].mxu0 %v2514_v52  ;;  %3356 = vmatmul.mubr.bf16.gmra.mrb[112].mxu1 %v2514_v52 }
 0x3a6   : > { %3252 = vmatprep.mubr.bf16.mxu0 %v10669_v7  ;;  %3365 = vmatprep.mubr.bf16.mxu1 %v10669_v7 }
 0x3ad   : > { %3253 = vmatmul.mubr.bf16.gmra.mrb[116].mxu0 %v2515_v31  ;;  %3366 = vmatmul.mubr.bf16.gmra.mrb[116].mxu1 %v2515_v31 }
 0x3ae   : > { %3262 = vmatprep.mubr.bf16.mxu0 %v10669_v7  ;;  %3375 = vmatprep.mubr.bf16.mxu1 %v10669_v7 }
 0x3b5   : > { %3263 = vmatmul.mubr.bf16.gmra.mrb[120].mxu0 %v2516_v34  ;;  %3376 = vmatmul.mubr.bf16.gmra.mrb[120].mxu1 %v2516_v34 }
 0x3b6   : > { %3272 = vmatprep.mubr.bf16.mxu0 %v10669_v7  ;;  %3385 = vmatprep.mubr.bf16.mxu1 %v10669_v7  ;;  %v10674_v7 = vld [vmem:[#allocation33_spill] sm:$0xff] }
 0x3b7   : > { %v10050_v15 = vrot.slane %v10034_v25, %v10674_v7 }
 0x3bd   : > { %3273 = vmatmul.mubr.bf16.gmra.mrb[124].mxu0 %v2517_v33  ;;  %3386 = vmatmul.mubr.bf16.gmra.mrb[124].mxu1 %v2517_v33 }
 0x418   : > { %v2978_v59 = vpop.f32.mrb[64].mxu0  ;;  %v3091_v8 = vpop.f32.mrb[64].mxu1 }
 0x419   : > { %v2979_v35 = vadd.f32 %v2978_v59, %v10038_v38  ;;  %v3092_v39 = vadd.f32 %v3091_v8, %v10042_v27  ;;  %v2980_v41 = vpop.f32.mrb[65].mxu0  ;;  %v3093_v6 = vpop.f32.mrb[65].mxu1 }
 0x41a   : > { %v2981_v0 = vadd.f32 %v2980_v41, %v10046_v50  ;;  %v3094_v4 = vadd.f32 %v3093_v6, %v10050_v15  ;;  %v2982_v63 = vpop.f32.mrb[66].mxu0  ;;  %v3095_v9 = vpop.f32.mrb[66].mxu1 }
 0x41b   : > { %v2983_v40 = vadd.f32 %v2982_v63, %v10038_v38  ;;  %v3096_v24 = vadd.f32 %v3095_v9, %v10042_v27  ;;  %v2984_v47 = vpop.f32.mrb[67].mxu0  ;;  %v3097_v56 = vpop.f32.mrb[67].mxu1  ;;  %v3396_v48 = vmax.f32 %v2979_v35, 0.0  ;;  %v3398_v45 = vmax.f32 %v3092_v39, 0.0 }
 0x41c   : > { %v2985_v62 = vadd.f32 %v2984_v47, %v10046_v50  ;;  %v3098_v14 = vadd.f32 %v3097_v56, %v10050_v15  ;;  %v3397_v26 = vmax.f32 %v2981_v0, 0.0  ;;  %v3399_v2 = vmax.f32 %v3094_v4, 0.0 }
 0x41d   : > { %v3404_v61 = vmax.f32 %v2983_v40, 0.0  ;;  %v3406_v20 = vmax.f32 %v3096_v24, 0.0 }
 0x41e   : > { %v3405_v58 = vmax.f32 %v2985_v62, 0.0  ;;  %v3407_v19 = vmax.f32 %v3098_v14, 0.0 }
 0x41f   : > { %v3525_v55 = vmax.f32 %v3396_v48, %v3404_v61  ;;  %v3567_v13 = vmax.f32 %v3398_v45, %v3406_v20 }
 0x420   : > { %v3546_v12 = vmax.f32 %v3397_v26, %v3405_v58  ;;  %v3588_v37 = vmax.f32 %v3399_v2, %v3407_v19  ;;  %v2988_v42 = vpop.f32.mrb[68].mxu0  ;;  %v3101_v23 = vpop.f32.mrb[68].mxu1 }
 0x421   : > { %v2989_v57 = vadd.f32 %v2988_v42, %v10038_v38  ;;  %v3102_v32 = vadd.f32 %v3101_v23, %v10042_v27  ;;  %v2990_v1 = vpop.f32.mrb[69].mxu0  ;;  %v3103_v29 = vpop.f32.mrb[69].mxu1 }
 0x422   : > { %v2991_v36 = vadd.f32 %v2990_v1, %v10046_v50  ;;  %v3104_v60 = vadd.f32 %v3103_v29, %v10050_v15  ;;  %v2992_v43 = vpop.f32.mrb[70].mxu0  ;;  %v3105_v17 = vpop.f32.mrb[70].mxu1 }
 0x423   : > { %v3412_v46 = vmax.f32 %v2989_v57, 0.0  ;;  %v3414_v21 = vmax.f32 %v3102_v32, 0.0  ;;  %v2993_v44 = vadd.f32 %v2992_v43, %v10038_v38  ;;  %v3106_v30 = vadd.f32 %v3105_v17, %v10042_v27  ;;  %v2994_v54 = vpop.f32.mrb[71].mxu0  ;;  %v3107_v28 = vpop.f32.mrb[71].mxu1 }
 0x424   : > { %v3413_v11 = vmax.f32 %v2991_v36, 0.0  ;;  %v3415_v52 = vmax.f32 %v3104_v60, 0.0  ;;  %v2995_v3 = vadd.f32 %v2994_v54, %v10046_v50  ;;  %v3108_v5 = vadd.f32 %v3107_v28, %v10050_v15 }
 0x425   : > { %v3526_v31 = vmax.f32 %v3525_v55, %v3412_v46  ;;  %v3568_v10 = vmax.f32 %v3567_v13, %v3414_v21  ;;  %v3420_v53 = vmax.f32 %v2993_v44, 0.0  ;;  %v3422_v34 = vmax.f32 %v3106_v30, 0.0 }
 0x426   : > { %v3547_v49 = vmax.f32 %v3546_v12, %v3413_v11  ;;  %v3589_v51 = vmax.f32 %v3588_v37, %v3415_v52  ;;  %v3421_v33 = vmax.f32 %v2995_v3, 0.0  ;;  %v3423_v18 = vmax.f32 %v3108_v5, 0.0 }
 0x427   : > { %v3527_v22 = vmax.f32 %v3526_v31, %v3420_v53  ;;  %v3569_v16 = vmax.f32 %v3568_v10, %v3422_v34 }
 0x428   : > { %v3548_v7 = vmax.f32 %v3547_v49, %v3421_v33  ;;  %v3590_v59 = vmax.f32 %v3589_v51, %v3423_v18  ;;  %v2998_v8 = vpop.f32.mrb[72].mxu0  ;;  %v3111_v35 = vpop.f32.mrb[72].mxu1 }
 0x429   : > { %v2999_v39 = vadd.f32 %v2998_v8, %v10038_v38  ;;  %v3112_v41 = vadd.f32 %v3111_v35, %v10042_v27  ;;  %v3000_v6 = vpop.f32.mrb[73].mxu0  ;;  %v3113_v0 = vpop.f32.mrb[73].mxu1 }
 0x42a   : > { %v3001_v4 = vadd.f32 %v3000_v6, %v10046_v50  ;;  %v3114_v63 = vadd.f32 %v3113_v0, %v10050_v15  ;;  %v3002_v9 = vpop.f32.mrb[74].mxu0  ;;  %v3115_v40 = vpop.f32.mrb[74].mxu1 }
 0x42b   : > { %v3428_v24 = vmax.f32 %v2999_v39, 0.0  ;;  %v3430_v47 = vmax.f32 %v3112_v41, 0.0  ;;  %v3003_v56 = vadd.f32 %v3002_v9, %v10038_v38  ;;  %v3116_v62 = vadd.f32 %v3115_v40, %v10042_v27  ;;  %v3004_v14 = vpop.f32.mrb[75].mxu0  ;;  %v3117_v48 = vpop.f32.mrb[75].mxu1 }
 0x42c   : > { %v3429_v45 = vmax.f32 %v3001_v4, 0.0  ;;  %v3431_v61 = vmax.f32 %v3114_v63, 0.0  ;;  %v3005_v20 = vadd.f32 %v3004_v14, %v10046_v50  ;;  %v3118_v26 = vadd.f32 %v3117_v48, %v10050_v15 }
 0x42d   : > { %v3528_v2 = vmax.f32 %v3527_v22, %v3428_v24  ;;  %v3570_v58 = vmax.f32 %v3569_v16, %v3430_v47  ;;  %v3436_v19 = vmax.f32 %v3003_v56, 0.0  ;;  %v3438_v55 = vmax.f32 %v3116_v62, 0.0 }
 0x42e   : > { %v3549_v13 = vmax.f32 %v3548_v7, %v3429_v45  ;;  %v3591_v12 = vmax.f32 %v3590_v59, %v3431_v61  ;;  %v3437_v37 = vmax.f32 %v3005_v20, 0.0  ;;  %v3439_v42 = vmax.f32 %v3118_v26, 0.0 }
 0x42f   : > { %v3529_v23 = vmax.f32 %v3528_v2, %v3436_v19  ;;  %v3571_v57 = vmax.f32 %v3570_v58, %v3438_v55 }
 0x430   : > { %v3550_v32 = vmax.f32 %v3549_v13, %v3437_v37  ;;  %v3592_v1 = vmax.f32 %v3591_v12, %v3439_v42  ;;  %v3008_v29 = vpop.f32.mrb[76].mxu0  ;;  %v3121_v36 = vpop.f32.mrb[76].mxu1 }
 0x431   : > { %v3009_v60 = vadd.f32 %v3008_v29, %v10038_v38  ;;  %v3122_v43 = vadd.f32 %v3121_v36, %v10042_v27  ;;  %v3010_v17 = vpop.f32.mrb[77].mxu0  ;;  %v3123_v46 = vpop.f32.mrb[77].mxu1 }
 0x432   : > { %v3011_v21 = vadd.f32 %v3010_v17, %v10046_v50  ;;  %v3124_v44 = vadd.f32 %v3123_v46, %v10050_v15  ;;  %v3012_v30 = vpop.f32.mrb[78].mxu0  ;;  %v3125_v54 = vpop.f32.mrb[78].mxu1 }
 0x433   : > { %v3444_v28 = vmax.f32 %v3009_v60, 0.0  ;;  %v3446_v11 = vmax.f32 %v3122_v43, 0.0  ;;  %v3013_v52 = vadd.f32 %v3012_v30, %v10038_v38  ;;  %v3126_v3 = vadd.f32 %v3125_v54, %v10042_v27  ;;  %v3014_v5 = vpop.f32.mrb[79].mxu0  ;;  %v3127_v31 = vpop.f32.mrb[79].mxu1 }
 0x434   : > { %v3445_v10 = vmax.f32 %v3011_v21, 0.0  ;;  %v3447_v53 = vmax.f32 %v3124_v44, 0.0  ;;  %v3015_v34 = vadd.f32 %v3014_v5, %v10046_v50  ;;  %v3128_v49 = vadd.f32 %v3127_v31, %v10050_v15 }
 0x435   : > { %v3530_v51 = vmax.f32 %v3529_v23, %v3444_v28  ;;  %v3572_v33 = vmax.f32 %v3571_v57, %v3446_v11  ;;  %v3452_v18 = vmax.f32 %v3013_v52, 0.0  ;;  %v3454_v22 = vmax.f32 %v3126_v3, 0.0 }
 0x436   : > { %v3551_v16 = vmax.f32 %v3550_v32, %v3445_v10  ;;  %v3593_v7 = vmax.f32 %v3592_v1, %v3447_v53  ;;  %v3453_v59 = vmax.f32 %v3015_v34, 0.0  ;;  %v3455_v8 = vmax.f32 %v3128_v49, 0.0 }
 0x437   : > { %v3531_v35 = vmax.f32 %v3530_v51, %v3452_v18  ;;  %v3573_v39 = vmax.f32 %v3572_v33, %v3454_v22 }
 0x438   : > { %v3552_v41 = vmax.f32 %v3551_v16, %v3453_v59  ;;  %v3594_v6 = vmax.f32 %v3593_v7, %v3455_v8  ;;  %v3018_v0 = vpop.f32.mrb[80].mxu0  ;;  %v3131_v4 = vpop.f32.mrb[80].mxu1 }
 0x439   : > { %v3019_v63 = vadd.f32 %v3018_v0, %v10038_v38  ;;  %v3132_v9 = vadd.f32 %v3131_v4, %v10042_v27  ;;  %v3020_v40 = vpop.f32.mrb[81].mxu0  ;;  %v3133_v24 = vpop.f32.mrb[81].mxu1 }
 0x43a   : > { %v3021_v47 = vadd.f32 %v3020_v40, %v10046_v50  ;;  %v3134_v56 = vadd.f32 %v3133_v24, %v10050_v15  ;;  %v3022_v62 = vpop.f32.mrb[82].mxu0  ;;  %v3135_v14 = vpop.f32.mrb[82].mxu1 }
 0x43b   : > { %v3460_v48 = vmax.f32 %v3019_v63, 0.0  ;;  %v3462_v45 = vmax.f32 %v3132_v9, 0.0  ;;  %v3023_v61 = vadd.f32 %v3022_v62, %v10038_v38  ;;  %v3136_v20 = vadd.f32 %v3135_v14, %v10042_v27  ;;  %v3024_v26 = vpop.f32.mrb[83].mxu0  ;;  %v3137_v2 = vpop.f32.mrb[83].mxu1 }
 0x43c   : > { %v3461_v58 = vmax.f32 %v3021_v47, 0.0  ;;  %v3463_v19 = vmax.f32 %v3134_v56, 0.0  ;;  %v3025_v55 = vadd.f32 %v3024_v26, %v10046_v50  ;;  %v3138_v13 = vadd.f32 %v3137_v2, %v10050_v15 }
 0x43d   : > { %v3532_v12 = vmax.f32 %v3531_v35, %v3460_v48  ;;  %v3574_v37 = vmax.f32 %v3573_v39, %v3462_v45  ;;  %v3468_v42 = vmax.f32 %v3023_v61, 0.0  ;;  %v3470_v23 = vmax.f32 %v3136_v20, 0.0 }
 0x43e   : > { %v3553_v57 = vmax.f32 %v3552_v41, %v3461_v58  ;;  %v3595_v32 = vmax.f32 %v3594_v6, %v3463_v19  ;;  %v3469_v1 = vmax.f32 %v3025_v55, 0.0  ;;  %v3471_v29 = vmax.f32 %v3138_v13, 0.0 }
 0x43f   : > { %v3533_v36 = vmax.f32 %v3532_v12, %v3468_v42  ;;  %v3575_v60 = vmax.f32 %v3574_v37, %v3470_v23  ;;  %v8172_v2 = vmov 1966171168  }
 0x440   : > { %v3554_v43 = vmax.f32 %v3553_v57, %v3469_v1  ;;  %v3596_v17 = vmax.f32 %v3595_v32, %v3471_v29  ;;  %v3028_v46 = vpop.f32.mrb[84].mxu0  ;;  %v3141_v21 = vpop.f32.mrb[84].mxu1  ;;  %v3706_v58 = vunpack.c.l.s4 %v8172_v2 }
 0x441   : > { %v3029_v44 = vadd.f32 %v3028_v46, %v10038_v38  ;;  %v3142_v30 = vadd.f32 %v3141_v21, %v10042_v27  ;;  %v3030_v54 = vpop.f32.mrb[85].mxu0  ;;  %v3143_v28 = vpop.f32.mrb[85].mxu1 }
 0x442   : > { %v3031_v11 = vadd.f32 %v3030_v54, %v10046_v50  ;;  %v3144_v52 = vadd.f32 %v3143_v28, %v10050_v15  ;;  %v3032_v3 = vpop.f32.mrb[86].mxu0  ;;  %v3145_v5 = vpop.f32.mrb[86].mxu1  ;;  %v10675_v28 = vld [vmem:[#allocation24_spill] sm:$0xff] }
 0x443   : > { %v3476_v31 = vmax.f32 %v3029_v44, 0.0  ;;  %v3478_v10 = vmax.f32 %v3142_v30, 0.0  ;;  %v3033_v53 = vadd.f32 %v3032_v3, %v10038_v38  ;;  %v3146_v34 = vadd.f32 %v3145_v5, %v10042_v27  ;;  %v3034_v49 = vpop.f32.mrb[87].mxu0  ;;  %v3147_v51 = vpop.f32.mrb[87].mxu1 }
 0x444   : > { %v3477_v33 = vmax.f32 %v3031_v11, 0.0  ;;  %v3479_v18 = vmax.f32 %v3144_v52, 0.0  ;;  %v3035_v22 = vadd.f32 %v3034_v49, %v10046_v50  ;;  %v3148_v16 = vadd.f32 %v3147_v51, %v10050_v15 }
 0x445   : > { %v3534_v7 = vmax.f32 %v3533_v36, %v3476_v31  ;;  %v3576_v59 = vmax.f32 %v3575_v60, %v3478_v10  ;;  %v3484_v8 = vmax.f32 %v3033_v53, 0.0  ;;  %v3486_v35 = vmax.f32 %v3146_v34, 0.0  ;;  %v10676_v10 = vld [vmem:[#allocation25_spill] sm:$0xff]  ;;  %v10677_v34 = vld [vmem:[#allocation26_spill] sm:$0xff] }
 0x446   : > { %v3555_v39 = vmax.f32 %v3554_v43, %v3477_v33  ;;  %v3597_v41 = vmax.f32 %v3596_v17, %v3479_v18  ;;  %v3485_v6 = vmax.f32 %v3035_v22, 0.0  ;;  %v3487_v0 = vmax.f32 %v3148_v16, 0.0  ;;  %v10678_v16 = vld [vmem:[#allocation27_spill] sm:$0xff] }
 0x447   : > { %v3535_v4 = vmax.f32 %v3534_v7, %v3484_v8  ;;  %v3577_v63 = vmax.f32 %v3576_v59, %v3486_v35  ;;  %v10110_v11 = vrot.slane %v10034_v25, %v10675_v28  ;;  %v10114_v53 = vrot.slane %v10034_v25, %v10676_v10 }
 0x448   : > { %v3556_v9 = vmax.f32 %v3555_v39, %v3485_v6  ;;  %v3598_v40 = vmax.f32 %v3597_v41, %v3487_v0  ;;  %v3038_v24 = vpop.f32.mrb[88].mxu0  ;;  %v3151_v47 = vpop.f32.mrb[88].mxu1  ;;  %v10118_v49 = vrot.slane %v10034_v25, %v10677_v34  ;;  %v10124_v7 = vrot.slane %v10034_v25, %v10678_v16 }
 0x449   : > { %v3039_v56 = vadd.f32 %v3038_v24, %v10038_v38  ;;  %v3152_v62 = vadd.f32 %v3151_v47, %v10042_v27  ;;  %v3040_v14 = vpop.f32.mrb[89].mxu0  ;;  %v3153_v48 = vpop.f32.mrb[89].mxu1  ;;  %v3707_v41 = vunpack.c.0.s8 %v3706_v58 }
 0x44a   : > { %v3041_v45 = vadd.f32 %v3040_v14, %v10046_v50  ;;  %v3154_v61 = vadd.f32 %v3153_v48, %v10050_v15  ;;  %v3042_v20 = vpop.f32.mrb[90].mxu0  ;;  %v3155_v26 = vpop.f32.mrb[90].mxu1 }
 0x44b   : > { %v3492_v19 = vmax.f32 %v3039_v56, 0.0  ;;  %v3494_v55 = vmax.f32 %v3152_v62, 0.0  ;;  %v3043_v13 = vadd.f32 %v3042_v20, %v10038_v38  ;;  %v3156_v12 = vadd.f32 %v3155_v26, %v10042_v27  ;;  %v3044_v37 = vpop.f32.mrb[91].mxu0  ;;  %v3157_v42 = vpop.f32.mrb[91].mxu1 }
 0x44c   : > { %v3493_v23 = vmax.f32 %v3041_v45, 0.0  ;;  %v3495_v57 = vmax.f32 %v3154_v61, 0.0  ;;  %v3045_v32 = vadd.f32 %v3044_v37, %v10046_v50  ;;  %v3158_v1 = vadd.f32 %v3157_v42, %v10050_v15 }
 0x44d   : > { %v3536_v29 = vmax.f32 %v3535_v4, %v3492_v19  ;;  %v3578_v36 = vmax.f32 %v3577_v63, %v3494_v55  ;;  %v3500_v60 = vmax.f32 %v3043_v13, 0.0  ;;  %v3502_v43 = vmax.f32 %v3156_v12, 0.0 }
 0x44e   : > { %v3557_v17 = vmax.f32 %v3556_v9, %v3493_v23  ;;  %v3599_v46 = vmax.f32 %v3598_v40, %v3495_v57  ;;  %v3501_v21 = vmax.f32 %v3045_v32, 0.0  ;;  %v3503_v44 = vmax.f32 %v3158_v1, 0.0 }
 0x44f   : > { %v3537_v30 = vmax.f32 %v3536_v29, %v3500_v60  ;;  %v3579_v54 = vmax.f32 %v3578_v36, %v3502_v43 }
 0x450   : > { %v3558_v52 = vmax.f32 %v3557_v17, %v3501_v21  ;;  %v3600_v3 = vmax.f32 %v3599_v46, %v3503_v44  ;;  %v3048_v5 = vpop.f32.mrb[92].mxu0  ;;  %v3161_v31 = vpop.f32.mrb[92].mxu1 }
 0x451   : > { %v3049_v51 = vadd.f32 %v3048_v5, %v10038_v38  ;;  %v3162_v33 = vadd.f32 %v3161_v31, %v10042_v27  ;;  %v3050_v18 = vpop.f32.mrb[93].mxu0  ;;  %v3163_v22 = vpop.f32.mrb[93].mxu1 }
 0x452   : > { %v3051_v59 = vadd.f32 %v3050_v18, %v10046_v50  ;;  %v3164_v8 = vadd.f32 %v3163_v22, %v10050_v15  ;;  %v3052_v35 = vpop.f32.mrb[94].mxu0  ;;  %v3165_v39 = vpop.f32.mrb[94].mxu1 }
 0x453   : > { %v3508_v6 = vmax.f32 %v3049_v51, 0.0  ;;  %v3510_v0 = vmax.f32 %v3162_v33, 0.0  ;;  %v3053_v4 = vadd.f32 %v3052_v35, %v10038_v38  ;;  %v3166_v63 = vadd.f32 %v3165_v39, %v10042_v27  ;;  %v3054_v9 = vpop.f32.mrb[95].mxu0  ;;  %v3167_v40 = vpop.f32.mrb[95].mxu1  ;;  %v10679_v27 = vld [vmem:[#allocation23_spill] sm:$0xff] }
 0x454   : > { %v3509_v24 = vmax.f32 %v3051_v59, 0.0  ;;  %v3511_v47 = vmax.f32 %v3164_v8, 0.0  ;;  %v3055_v25 = vadd.f32 %v3054_v9, %v10046_v50  ;;  %v3168_v56 = vadd.f32 %v3167_v40, %v10050_v15 }
 0x455   : > { %v3538_v62 = vmax.f32 %v3537_v30, %v3508_v6  ;;  %v3580_v14 = vmax.f32 %v3579_v54, %v3510_v0  ;;  %v3516_v48 = vmax.f32 %v3053_v4, 0.0  ;;  %v3518_v45 = vmax.f32 %v3166_v63, 0.0 }
 0x456   : > { %v3559_v61 = vmax.f32 %v3558_v52, %v3509_v24  ;;  %v3601_v20 = vmax.f32 %v3600_v3, %v3511_v47  ;;  %v3517_v26 = vmax.f32 %v3055_v25, 0.0  ;;  %v3519_v2 = vmax.f32 %v3168_v56, 0.0 }
 0x457   : > { %v3539_v58 = vmax.f32 %v3538_v62, %v3516_v48  ;;  %v3581_v38 = vmax.f32 %v3580_v14, %v3518_v45  ;;  %v10133_v55 = vsub.s32 %v3707_v41, %v10679_v27 }
 0x458   : > { %v3560_v19 = vmax.f32 %v3559_v61, %v3517_v26  ;;  %v3602_v13 = vmax.f32 %v3601_v20, %v3519_v2  ;;  %v3204_v12 = vpop.f32.mrb[96].mxu0  ;;  %v3317_v37 = vpop.f32.mrb[96].mxu1 }
 0x459   : > { %v3540_v50 = vrot.slane %v3539_v58, 4  ;;  %v3582_v42 = vrot.slane %v3581_v38, 4  ;;  %v3205_v15 = vadd.f32 %v3204_v12, %v10110_v11  ;;  %v3318_v23 = vadd.f32 %v3317_v37, %v10118_v49  ;;  %v3206_v57 = vpop.f32.mrb[97].mxu0  ;;  %v3319_v32 = vpop.f32.mrb[97].mxu1 }
 0x45a   : > { %v3561_v1 = vrot.slane %v3560_v19, 4  ;;  %v3603_v29 = vrot.slane %v3602_v13, 4  ;;  %v3207_v36 = vadd.f32 %v3206_v57, %v10114_v53  ;;  %v3320_v60 = vadd.f32 %v3319_v32, %v10124_v7  ;;  %v3208_v43 = vpop.f32.mrb[98].mxu0  ;;  %v3321_v17 = vpop.f32.mrb[98].mxu1 }
 0x45b   : > { %v3541_v46 = vmax.f32 %v3539_v58, %v3540_v50  ;;  %v3583_v21 = vmax.f32 %v3581_v38, %v3582_v42  ;;  %v3400_v44 = vmax.f32 %v3205_v15, 0.0  ;;  %v3402_v30 = vmax.f32 %v3318_v23, 0.0  ;;  %v3210_v54 = vpop.f32.mrb[99].mxu0  ;;  %v3323_v28 = vpop.f32.mrb[99].mxu1 }
 0x45c   : > { %v3562_v52 = vmax.f32 %v3560_v19, %v3561_v1  ;;  %v3604_v3 = vmax.f32 %v3602_v13, %v3603_v29  ;;  %v3401_v5 = vmax.f32 %v3207_v36, 0.0  ;;  %v3403_v31 = vmax.f32 %v3320_v60, 0.0 }
 0x45d   : > { %v3542_v10 = vrot.slane %v3541_v46, 2  ;;  %v3584_v34 = vrot.slane %v3583_v21, 2  ;;  %v3209_v51 = vadd.f32 %v3208_v43, %v10110_v11  ;;  %v3322_v33 = vadd.f32 %v3321_v17, %v10118_v49 }
 0x45e   : > { %v3563_v18 = vrot.slane %v3562_v52, 2  ;;  %v3605_v22 = vrot.slane %v3604_v3, 2  ;;  %v3211_v16 = vadd.f32 %v3210_v54, %v10114_v53  ;;  %v3324_v59 = vadd.f32 %v3323_v28, %v10124_v7 }
 0x45f   : > { %v3543_v8 = vmax.f32 %v3541_v46, %v3542_v10  ;;  %v3585_v35 = vmax.f32 %v3583_v21, %v3584_v34  ;;  %v3408_v39 = vmax.f32 %v3209_v51, 0.0  ;;  %v3410_v41 = vmax.f32 %v3322_v33, 0.0 }
 0x460   : > { %v3564_v6 = vmax.f32 %v3562_v52, %v3563_v18  ;;  %v3606_v0 = vmax.f32 %v3604_v3, %v3605_v22  ;;  %v3409_v4 = vmax.f32 %v3211_v16, 0.0  ;;  %v3411_v63 = vmax.f32 %v3324_v59, 0.0  ;;  %v3214_v9 = vpop.f32.mrb[100].mxu0  ;;  %v3327_v40 = vpop.f32.mrb[100].mxu1 }
 0x461   : > { %v3544_v24 = vrot.slane %v3543_v8, 1  ;;  %v3586_v47 = vrot.slane %v3585_v35, 1  ;;  %v3609_v25 = vmax.f32 %v3400_v44, %v3408_v39  ;;  %v3651_v56 = vmax.f32 %v3402_v30, %v3410_v41  ;;  %v3216_v62 = vpop.f32.mrb[101].mxu0  ;;  %v3329_v14 = vpop.f32.mrb[101].mxu1 }
 0x462   : > { %v3565_v48 = vrot.slane %v3564_v6, 1  ;;  %v3607_v45 = vrot.slane %v3606_v0, 1  ;;  %v3630_v61 = vmax.f32 %v3401_v5, %v3409_v4  ;;  %v3672_v20 = vmax.f32 %v3403_v31, %v3411_v63  ;;  %v3218_v26 = vpop.f32.mrb[102].mxu0  ;;  %v3331_v2 = vpop.f32.mrb[102].mxu1 }
 0x463   : > { %v3545_v58 = vmax.f32 %v3543_v8, %v3544_v24  ;;  %v3587_v38 = vmax.f32 %v3585_v35, %v3586_v47  ;;  %v3215_v19 = vadd.f32 %v3214_v9, %v10110_v11  ;;  %v3328_v27 = vadd.f32 %v3327_v40, %v10118_v49  ;;  %v3220_v13 = vpop.f32.mrb[103].mxu0  ;;  %v3333_v12 = vpop.f32.mrb[103].mxu1 }
 0x464   : > { %v3566_v37 = vmax.f32 %v3564_v6, %v3565_v48  ;;  %v3608_v50 = vmax.f32 %v3606_v0, %v3607_v45  ;;  %v3217_v42 = vadd.f32 %v3216_v62, %v10114_v53  ;;  %v3330_v15 = vadd.f32 %v3329_v14, %v10124_v7 }
 0x465   : > { %v3416_v23 = vmax.f32 %v3215_v19, 0.0  ;;  %v3418_v57 = vmax.f32 %v3328_v27, 0.0  ;;  %v3219_v32 = vadd.f32 %v3218_v26, %v10110_v11  ;;  %v3332_v1 = vadd.f32 %v3331_v2, %v10118_v49 }
 0x466   : > { %v3701_v29 = vcombine.low %v3545_v58, %v3566_v37  ;;  %v3702_v36 = vcombine.low %v3587_v38, %v3608_v50  ;;  %v3417_v60 = vmax.f32 %v3217_v42, 0.0  ;;  %v3419_v43 = vmax.f32 %v3330_v15, 0.0 }
 0x467   : > { %v3610_v17 = vmax.f32 %v3609_v25, %v3416_v23  ;;  %v3652_v46 = vmax.f32 %v3651_v56, %v3418_v57  ;;  %v3424_v21 = vmax.f32 %v3219_v32, 0.0  ;;  %v3426_v44 = vmax.f32 %v3332_v1, 0.0 }
 0x468   : > { %v10150_v30 = vrot.slane %v3701_v29, %v10133_v55  ;;  %v10153_v54 = vrot.slane %v3702_v36, %v10133_v55  ;;  %v3631_v28 = vmax.f32 %v3630_v61, %v3417_v60  ;;  %v3673_v52 = vmax.f32 %v3672_v20, %v3419_v43  ;;  %v3224_v3 = vpop.f32.mrb[104].mxu0  ;;  %v3337_v5 = vpop.f32.mrb[104].mxu1 }
 0x469   : > { %v3611_v31 = vmax.f32 %v3610_v17, %v3424_v21  ;;  %v3653_v10 = vmax.f32 %v3652_v46, %v3426_v44  ;;  %v3221_v34 = vadd.f32 %v3220_v13, %v10114_v53  ;;  %v3334_v51 = vadd.f32 %v3333_v12, %v10124_v7  ;;  %v3226_v33 = vpop.f32.mrb[105].mxu0  ;;  %v3339_v18 = vpop.f32.mrb[105].mxu1 }
 0x46a   : > { %v3733_v22 = vcombine.low %v10150_v30, %v10153_v54  ;;  %v3225_v16 = vadd.f32 %v3224_v3, %v10110_v11  ;;  %v3338_v59 = vadd.f32 %v3337_v5, %v10118_v49  ;;  %v3227_v8 = vadd.f32 %v3226_v33, %v10114_v53  ;;  %v3228_v35 = vpop.f32.mrb[106].mxu0  ;;  %v3341_v39 = vpop.f32.mrb[106].mxu1  ;;  %v7466_v30 = vld [vmem:[#allocation7 + $0x224] ss:$16 sps:$4 sm:$0xff] (!%p6620_p1)   ;;  %v7468_v54 = vld [vmem:[#allocation7 + $0x20] ss:$16 sps:$4 sm:$0xff] (!%p6620_p1)  }
 0x46b   : > { %v3425_v41 = vmax.f32 %v3221_v34, 0.0  ;;  %v3427_v6 = vmax.f32 %v3334_v51, 0.0  ;;  %v3340_v0 = vadd.f32 %v3339_v18, %v10124_v7  ;;  %v3229_v4 = vadd.f32 %v3228_v35, %v10110_v11  ;;  %v3230_v63 = vpop.f32.mrb[107].mxu0  ;;  %v3343_v9 = vpop.f32.mrb[107].mxu1 }
 0x46c   : > { %v3432_v40 = vmax.f32 %v3225_v16, 0.0  ;;  %v3434_v24 = vmax.f32 %v3338_v59, 0.0  ;;  %v3433_v47 = vmax.f32 %v3227_v8, 0.0  ;;  %v3342_v61 = vadd.f32 %v3341_v39, %v10118_v49 }
 0x46d   : > { %v3632_v25 = vmax.f32 %v3631_v28, %v3425_v41  ;;  %v3674_v56 = vmax.f32 %v3673_v52, %v3427_v6  ;;  %v3435_v62 = vmax.f32 %v3340_v0, 0.0  ;;  %v3440_v14 = vmax.f32 %v3229_v4, 0.0 }
 0x46e   : > { %v3612_v48 = vmax.f32 %v3611_v31, %v3432_v40  ;;  %v3654_v45 = vmax.f32 %v3653_v10, %v3434_v24  ;;  %v3231_v20 = vadd.f32 %v3230_v63, %v10114_v53  ;;  %v3344_v58 = vadd.f32 %v3343_v9, %v10124_v7 }
 0x46f   : > { %v3633_v26 = vmax.f32 %v3632_v25, %v3433_v47  ;;  %v3675_v2 = vmax.f32 %v3674_v56, %v3435_v62  ;;  %v3442_v19 = vmax.f32 %v3342_v61, 0.0 }
 0x470   : > { %v3613_v38 = vmax.f32 %v3612_v48, %v3440_v14  ;;  %v3441_v27 = vmax.f32 %v3231_v20, 0.0  ;;  %v3234_v13 = vpop.f32.mrb[108].mxu0  ;;  %v3347_v12 = vpop.f32.mrb[108].mxu1  ;;  %v3443_v37 = vmax.f32 %v3344_v58, 0.0 }
 0x471   : > { %v3235_v50 = vadd.f32 %v3234_v13, %v10110_v11  ;;  %v3348_v42 = vadd.f32 %v3347_v12, %v10118_v49  ;;  %v3236_v15 = vpop.f32.mrb[109].mxu0  ;;  %v3349_v23 = vpop.f32.mrb[109].mxu1  ;;  %v3655_v57 = vmax.f32 %v3654_v45, %v3442_v19 }
 0x472   : > { %v3634_v32 = vmax.f32 %v3633_v26, %v3441_v27  ;;  %v3237_v1 = vadd.f32 %v3236_v15, %v10114_v53  ;;  %v3350_v29 = vadd.f32 %v3349_v23, %v10124_v7  ;;  %v3238_v36 = vpop.f32.mrb[110].mxu0  ;;  %v3351_v60 = vpop.f32.mrb[110].mxu1  ;;  %v3676_v43 = vmax.f32 %v3675_v2, %v3443_v37 }
 0x473   : > { %v3448_v17 = vmax.f32 %v3235_v50, 0.0  ;;  %v3450_v46 = vmax.f32 %v3348_v42, 0.0  ;;  %v3239_v21 = vadd.f32 %v3238_v36, %v10110_v11  ;;  %v3240_v44 = vpop.f32.mrb[111].mxu0  ;;  %v3353_v28 = vpop.f32.mrb[111].mxu1  ;;  %v3352_v5 = vadd.f32 %v3351_v60, %v10118_v49 }
 0x474   : > { %v3449_v52 = vmax.f32 %v3237_v1, 0.0  ;;  %v3451_v3 = vmax.f32 %v3350_v29, 0.0  ;;  %v3241_v31 = vadd.f32 %v3240_v44, %v10114_v53  ;;  %v3354_v33 = vadd.f32 %v3353_v28, %v10124_v7 }
 0x475   : > { %v3614_v10 = vmax.f32 %v3613_v38, %v3448_v17  ;;  %v3656_v34 = vmax.f32 %v3655_v57, %v3450_v46  ;;  %v3456_v51 = vmax.f32 %v3239_v21, 0.0  ;;  %v3458_v59 = vmax.f32 %v3352_v5, 0.0 }
 0x476   : > { %v3635_v18 = vmax.f32 %v3634_v32, %v3449_v52  ;;  %v3677_v16 = vmax.f32 %v3676_v43, %v3451_v3  ;;  %v3457_v8 = vmax.f32 %v3241_v31, 0.0  ;;  %v3459_v39 = vmax.f32 %v3354_v33, 0.0 }
 0x477   : > { %v3615_v35 = vmax.f32 %v3614_v10, %v3456_v51  ;;  %v3657_v41 = vmax.f32 %v3656_v34, %v3458_v59 }
 0x478   : > { %v3636_v6 = vmax.f32 %v3635_v18, %v3457_v8  ;;  %v3244_v0 = vpop.f32.mrb[112].mxu0  ;;  %v3357_v4 = vpop.f32.mrb[112].mxu1  ;;  %v3678_v63 = vmax.f32 %v3677_v16, %v3459_v39 }
 0x479   : > { %v3245_v9 = vadd.f32 %v3244_v0, %v10110_v11  ;;  %v3358_v40 = vadd.f32 %v3357_v4, %v10118_v49  ;;  %v3246_v24 = vpop.f32.mrb[113].mxu0  ;;  %v3359_v47 = vpop.f32.mrb[113].mxu1 }
 0x47a   : > { %v3247_v25 = vadd.f32 %v3246_v24, %v10114_v53  ;;  %v3360_v56 = vadd.f32 %v3359_v47, %v10124_v7  ;;  %v3248_v62 = vpop.f32.mrb[114].mxu0  ;;  %v3361_v14 = vpop.f32.mrb[114].mxu1 }
 0x47b   : > { %v3464_v48 = vmax.f32 %v3245_v9, 0.0  ;;  %v3466_v45 = vmax.f32 %v3358_v40, 0.0  ;;  %v3249_v61 = vadd.f32 %v3248_v62, %v10110_v11  ;;  %v3362_v20 = vadd.f32 %v3361_v14, %v10118_v49  ;;  %v3250_v26 = vpop.f32.mrb[115].mxu0  ;;  %v3363_v2 = vpop.f32.mrb[115].mxu1 }
 0x47c   : > { %v3465_v58 = vmax.f32 %v3247_v25, 0.0  ;;  %v3467_v38 = vmax.f32 %v3360_v56, 0.0  ;;  %v3251_v19 = vadd.f32 %v3250_v26, %v10114_v53  ;;  %v3364_v27 = vadd.f32 %v3363_v2, %v10124_v7 }
 0x47d   : > { %v3616_v13 = vmax.f32 %v3615_v35, %v3464_v48  ;;  %v3658_v12 = vmax.f32 %v3657_v41, %v3466_v45  ;;  %v3472_v37 = vmax.f32 %v3249_v61, 0.0  ;;  %v3474_v50 = vmax.f32 %v3362_v20, 0.0 }
 0x47e   : > { %v3637_v42 = vmax.f32 %v3636_v6, %v3465_v58  ;;  %v3679_v15 = vmax.f32 %v3678_v63, %v3467_v38  ;;  %v3473_v23 = vmax.f32 %v3251_v19, 0.0  ;;  %v3475_v57 = vmax.f32 %v3364_v27, 0.0 }
 0x47f   : > { %v3617_v32 = vmax.f32 %v3616_v13, %v3472_v37  ;;  %v3659_v1 = vmax.f32 %v3658_v12, %v3474_v50 }
 0x480   : > { %v3638_v29 = vmax.f32 %v3637_v42, %v3473_v23  ;;  %v3680_v36 = vmax.f32 %v3679_v15, %v3475_v57  ;;  %v3254_v60 = vpop.f32.mrb[116].mxu0  ;;  %v3367_v43 = vpop.f32.mrb[116].mxu1 }
 0x481   : > { %v3255_v17 = vadd.f32 %v3254_v60, %v10110_v11  ;;  %v3368_v46 = vadd.f32 %v3367_v43, %v10118_v49  ;;  %v3256_v21 = vpop.f32.mrb[117].mxu0  ;;  %v3369_v44 = vpop.f32.mrb[117].mxu1 }
 0x482   : > { %v3257_v28 = vadd.f32 %v3256_v21, %v10114_v53  ;;  %v3370_v52 = vadd.f32 %v3369_v44, %v10124_v7  ;;  %v3258_v3 = vpop.f32.mrb[118].mxu0  ;;  %v3371_v5 = vpop.f32.mrb[118].mxu1 }
 0x483   : > { %v3480_v31 = vmax.f32 %v3255_v17, 0.0  ;;  %v3482_v10 = vmax.f32 %v3368_v46, 0.0  ;;  %v3259_v34 = vadd.f32 %v3258_v3, %v10110_v11  ;;  %v3372_v51 = vadd.f32 %v3371_v5, %v10118_v49  ;;  %v3260_v33 = vpop.f32.mrb[119].mxu0  ;;  %v3373_v18 = vpop.f32.mrb[119].mxu1 }
 0x484   : > { %v3481_v16 = vmax.f32 %v3257_v28, 0.0  ;;  %v3483_v59 = vmax.f32 %v3370_v52, 0.0  ;;  %v3261_v8 = vadd.f32 %v3260_v33, %v10114_v53  ;;  %v3374_v35 = vadd.f32 %v3373_v18, %v10124_v7 }
 0x485   : > { %v3618_v39 = vmax.f32 %v3617_v32, %v3480_v31  ;;  %v3660_v41 = vmax.f32 %v3659_v1, %v3482_v10  ;;  %v3488_v6 = vmax.f32 %v3259_v34, 0.0  ;;  %v3490_v0 = vmax.f32 %v3372_v51, 0.0 }
 0x486   : > { %v3639_v4 = vmax.f32 %v3638_v29, %v3481_v16  ;;  %v3681_v63 = vmax.f32 %v3680_v36, %v3483_v59  ;;  %v3489_v9 = vmax.f32 %v3261_v8, 0.0  ;;  %v3491_v40 = vmax.f32 %v3374_v35, 0.0 }
 0x487   : > { %v3619_v24 = vmax.f32 %v3618_v39, %v3488_v6  ;;  %v3661_v47 = vmax.f32 %v3660_v41, %v3490_v0 }
 0x488   : > { %v3640_v25 = vmax.f32 %v3639_v4, %v3489_v9  ;;  %v3682_v56 = vmax.f32 %v3681_v63, %v3491_v40  ;;  %v3264_v62 = vpop.f32.mrb[120].mxu0  ;;  %v3377_v14 = vpop.f32.mrb[120].mxu1 }
 0x489   : > { %v3265_v48 = vadd.f32 %v3264_v62, %v10110_v11  ;;  %v3378_v45 = vadd.f32 %v3377_v14, %v10118_v49  ;;  %v3266_v61 = vpop.f32.mrb[121].mxu0  ;;  %v3379_v20 = vpop.f32.mrb[121].mxu1 }
 0x48a   : > { %v3267_v26 = vadd.f32 %v3266_v61, %v10114_v53  ;;  %v3380_v2 = vadd.f32 %v3379_v20, %v10124_v7  ;;  %v3268_v58 = vpop.f32.mrb[122].mxu0  ;;  %v3381_v38 = vpop.f32.mrb[122].mxu1 }
 0x48b   : > { %v3496_v19 = vmax.f32 %v3265_v48, 0.0  ;;  %v3498_v27 = vmax.f32 %v3378_v45, 0.0  ;;  %v3269_v13 = vadd.f32 %v3268_v58, %v10110_v11  ;;  %v3382_v12 = vadd.f32 %v3381_v38, %v10118_v49  ;;  %v3270_v37 = vpop.f32.mrb[123].mxu0  ;;  %v3383_v50 = vpop.f32.mrb[123].mxu1 }
 0x48c   : > { %v3497_v42 = vmax.f32 %v3267_v26, 0.0  ;;  %v3499_v15 = vmax.f32 %v3380_v2, 0.0  ;;  %v3271_v23 = vadd.f32 %v3270_v37, %v10114_v53  ;;  %v3384_v57 = vadd.f32 %v3383_v50, %v10124_v7 }
 0x48d   : > { %v3620_v32 = vmax.f32 %v3619_v24, %v3496_v19  ;;  %v3662_v1 = vmax.f32 %v3661_v47, %v3498_v27  ;;  %v3504_v29 = vmax.f32 %v3269_v13, 0.0  ;;  %v3506_v36 = vmax.f32 %v3382_v12, 0.0 }
 0x48e   : > { %v3641_v60 = vmax.f32 %v3640_v25, %v3497_v42  ;;  %v3683_v43 = vmax.f32 %v3682_v56, %v3499_v15  ;;  %v3505_v17 = vmax.f32 %v3271_v23, 0.0  ;;  %v3507_v46 = vmax.f32 %v3384_v57, 0.0 }
 0x48f   : > { %v3621_v21 = vmax.f32 %v3620_v32, %v3504_v29  ;;  %v3663_v44 = vmax.f32 %v3662_v1, %v3506_v36 }
 0x490   : > { %v3642_v28 = vmax.f32 %v3641_v60, %v3505_v17  ;;  %v3684_v52 = vmax.f32 %v3683_v43, %v3507_v46  ;;  %v3274_v3 = vpop.f32.mrb[124].mxu0  ;;  %v3387_v5 = vpop.f32.mrb[124].mxu1 }
 0x491   : > { %v3275_v31 = vadd.f32 %v3274_v3, %v10110_v11  ;;  %v3388_v10 = vadd.f32 %v3387_v5, %v10118_v49  ;;  %v3276_v34 = vpop.f32.mrb[125].mxu0  ;;  %v3389_v51 = vpop.f32.mrb[125].mxu1  ;;  %v3741_v5 = vrot.slane %v3733_v22, %v10133_v55  ;;  %v7470_v22 = vld [vmem:[#allocation7 + $0x44] ss:$16 sps:$4 sm:$0xff] (!%p6620_p1)  }
 0x492   : > { %v3277_v33 = vadd.f32 %v3276_v34, %v10114_v53  ;;  %v3390_v18 = vadd.f32 %v3389_v51, %v10124_v7  ;;  %v3278_v16 = vpop.f32.mrb[126].mxu0  ;;  %v3391_v59 = vpop.f32.mrb[126].mxu1 }
 0x493   : > { %v3512_v8 = vmax.f32 %v3275_v31, 0.0  ;;  %v3514_v35 = vmax.f32 %v3388_v10, 0.0  ;;  %v3279_v39 = vadd.f32 %v3278_v16, %v10110_v11  ;;  %v3392_v41 = vadd.f32 %v3391_v59, %v10118_v49  ;;  %v3280_v6 = vpop.f32.mrb[127].mxu0  ;;  %v3393_v0 = vpop.f32.mrb[127].mxu1  ;;  %v3524_v10 = vld [vmem:[#allocation2] sm:$0xff] }
 0x494   : > { %v3513_v4 = vmax.f32 %v3277_v33, 0.0  ;;  %v3515_v63 = vmax.f32 %v3390_v18, 0.0  ;;  %v3281_v9 = vadd.f32 %v3280_v6, %v10114_v53  ;;  %v3394_v40 = vadd.f32 %v3393_v0, %v10124_v7  ;;  %v7458_v33 = vld [vmem:[#allocation7 + $0x4] ss:$16 sps:$4 sm:$0xff] (!%p6620_p1)   ;;  %v7462_v16 = vld [vmem:[#allocation7] ss:$16 sps:$4 sm:$0xff] (!%p6620_p1)  }
 0x495   : > { %v3622_v24 = vmax.f32 %v3621_v21, %v3512_v8  ;;  %v3664_v47 = vmax.f32 %v3663_v44, %v3514_v35  ;;  %v3520_v25 = vmax.f32 %v3279_v39, 0.0  ;;  %v3522_v56 = vmax.f32 %v3392_v41, 0.0  ;;  %v7460_v18 = vld [vmem:[#allocation7 + $0x204] ss:$16 sps:$4 sm:$0xff] (!%p6620_p1)   ;;  %5365 = vmatprep.subr.bf16.mxu1 (!%p6620_p1), %v7458_v33  ;;  %v7463_v59 = vld [vmem:[#allocation7 + $0x200] ss:$16 sps:$4 sm:$0xff] (!%p6620_p1)  }
 0x496   : > { %v3643_v62 = vmax.f32 %v3642_v28, %v3513_v4  ;;  %v3685_v14 = vmax.f32 %v3684_v52, %v3515_v63  ;;  %v3521_v48 = vmax.f32 %v3281_v9, 0.0  ;;  %v3523_v45 = vmax.f32 %v3394_v40, 0.0  ;;  %5406 = vmatprep.subr.bf16.mxu0 (!%p6620_p1), %v7460_v18  ;;  %v7464_v8 = vld [vmem:[#allocation7 + $0x24] ss:$16 sps:$4 sm:$0xff] (!%p6620_p1)   ;;  %5366 = vmatpush1.bf16.msra.mxu1 (!%p6620_p1), %v7462_v16  ;;  %v7474_v39 = vld [vmem:[#allocation7 + $0x40] ss:$16 sps:$4 sm:$0xff] (!%p6620_p1)  }
 0x497   : > { %v3623_v61 = vmax.f32 %v3622_v24, %v3520_v25  ;;  %v3665_v11 = vmax.f32 %v3664_v47, %v3522_v56  ;;  %5407 = vmatpush1.bf16.msra.mxu0 (!%p6620_p1), %v7463_v59  ;;  %5367 = vmatprep.subr.bf16.mxu1 (!%p6620_p1), %v7464_v8  ;;  %v7472_v35 = vld [vmem:[#allocation7 + $0x244] ss:$16 sps:$4 sm:$0xff] (!%p6620_p1)   ;;  %v7475_v41 = vld [vmem:[#allocation7 + $0x240] ss:$16 sps:$4 sm:$0xff] (!%p6620_p1)  }
 0x498   : > { %v3644_v20 = vmax.f32 %v3643_v62, %v3521_v48  ;;  %v3686_v49 = vmax.f32 %v3685_v14, %v3523_v45  ;;  %5408 = vmatprep.subr.bf16.mxu0 (!%p6620_p1), %v7466_v30  ;;  %v7476_v6 = vld [vmem:[#allocation7 + $0x64] ss:$16 sps:$4 sm:$0xff] (!%p6620_p1)   ;;  %v7480_v4 = vld [vmem:[#allocation7 + $0x60] ss:$16 sps:$4 sm:$0xff] (!%p6620_p1)  }
 0x499   : > { %v3624_v26 = vrot.slane %v3623_v61, 4  ;;  %v3666_v2 = vrot.slane %v3665_v11, 4  ;;  %v7478_v0 = vld [vmem:[#allocation7 + $0x264] ss:$16 sps:$4 sm:$0xff] (!%p6620_p1)   ;;  %v7481_v63 = vld [vmem:[#allocation7 + $0x260] ss:$16 sps:$4 sm:$0xff] (!%p6620_p1)  }
 0x49a   : > { %v3645_v58 = vrot.slane %v3644_v20, 4  ;;  %v3687_v38 = vrot.slane %v3686_v49, 4  ;;  %5368 = vmatpush1.bf16.msra.mxu1 (!%p6620_p1), %v7468_v54  ;;  %v7482_v9 = vld [vmem:[#allocation7 + $0x84] ss:$16 sps:$4 sm:$0xff] (!%p6620_p1)   ;;  %v7486_v24 = vld [vmem:[#allocation7 + $0x80] ss:$16 sps:$4 sm:$0xff] (!%p6620_p1)  }
 0x49b   : > { %v3625_v19 = vmax.f32 %v3623_v61, %v3624_v26  ;;  %v3667_v53 = vmax.f32 %v3665_v11, %v3666_v2  ;;  %5369 = vmatprep.subr.bf16.mxu1 (!%p6620_p1), %v7470_v22  ;;  %v7484_v40 = vld [vmem:[#allocation7 + $0x284] ss:$16 sps:$4 sm:$0xff] (!%p6620_p1)   ;;  %v7487_v47 = vld [vmem:[#allocation7 + $0x280] ss:$16 sps:$4 sm:$0xff] (!%p6620_p1)  }
 0x49c   : > { %v3646_v27 = vmax.f32 %v3644_v20, %v3645_v58  ;;  %v3688_v7 = vmax.f32 %v3686_v49, %v3687_v38  ;;  %v7488_v25 = vld [vmem:[#allocation7 + $0xa4] ss:$16 sps:$4 sm:$0xff] (!%p6620_p1)   ;;  %v7492_v62 = vld [vmem:[#allocation7 + $0xa0] ss:$16 sps:$4 sm:$0xff] (!%p6620_p1)  }
 0x49d   : > { %v3626_v13 = vrot.slane %v3625_v19, 2  ;;  %v3668_v12 = vrot.slane %v3667_v53, 2  ;;  %v7490_v56 = vld [vmem:[#allocation7 + $0x2a4] ss:$16 sps:$4 sm:$0xff] (!%p6620_p1)   ;;  %v7493_v14 = vld [vmem:[#allocation7 + $0x2a0] ss:$16 sps:$4 sm:$0xff] (!%p6620_p1)  }
 0x49e   : > { %v3647_v37 = vrot.slane %v3646_v27, 2  ;;  %v3689_v50 = vrot.slane %v3688_v7, 2  ;;  %5370 = vmatpush1.bf16.msra.mxu1 (!%p6620_p1), %v7474_v39  ;;  %v7494_v48 = vld [vmem:[#allocation7 + $0xc4] ss:$16 sps:$4 sm:$0xff] (!%p6620_p1)   ;;  %v7498_v61 = vld [vmem:[#allocation7 + $0xc0] ss:$16 sps:$4 sm:$0xff] (!%p6620_p1)  }
 0x49f   : > { %v3627_v42 = vmax.f32 %v3625_v19, %v3626_v13  ;;  %v3669_v15 = vmax.f32 %v3667_v53, %v3668_v12  ;;  %5371 = vmatprep.subr.bf16.mxu1 (!%p6620_p1), %v7476_v6  ;;  %v7496_v45 = vld [vmem:[#allocation7 + $0x2c4] ss:$16 sps:$4 sm:$0xff] (!%p6620_p1)   ;;  %v7499_v11 = vld [vmem:[#allocation7 + $0x2c0] ss:$16 sps:$4 sm:$0xff] (!%p6620_p1)   ;;  %v7559_v6 = vld [vmem:[#allocation7 + $0xc] ss:$16 sps:$4 sm:$0xff] (!%p6620_p1)  }
 0x4a0   : > { %v3648_v23 = vmax.f32 %v3646_v27, %v3647_v37  ;;  %v3690_v57 = vmax.f32 %v3688_v7, %v3689_v50  ;;  %v7500_v20 = vld [vmem:[#allocation7 + $0xe4] ss:$16 sps:$4 sm:$0xff] (!%p6620_p1)   ;;  %v7504_v26 = vld [vmem:[#allocation7 + $0xe0] ss:$16 sps:$4 sm:$0xff] (!%p6620_p1)  }
 0x4a1   : > { %v3628_v32 = vrot.slane %v3627_v42, 1  ;;  %v3670_v1 = vrot.slane %v3669_v15, 1  ;;  %v7502_v49 = vld [vmem:[#allocation7 + $0x2e4] ss:$16 sps:$4 sm:$0xff] (!%p6620_p1)   ;;  %v7505_v2 = vld [vmem:[#allocation7 + $0x2e0] ss:$16 sps:$4 sm:$0xff] (!%p6620_p1)  }
 0x4a2   : > { %v3649_v29 = vrot.slane %v3648_v23, 1  ;;  %v3691_v36 = vrot.slane %v3690_v57, 1  ;;  %5372 = vmatpush1.bf16.msra.mxu1 (!%p6620_p1), %v7480_v4  ;;  %v7506_v58 = vld [vmem:[#allocation7 + $0x104] ss:$16 sps:$4 sm:$0xff] (!%p6620_p1)   ;;  %v7510_v19 = vld [vmem:[#allocation7 + $0x100] ss:$16 sps:$4 sm:$0xff] (!%p6620_p1)  }
 0x4a3   : > { %v3629_v60 = vmax.f32 %v3627_v42, %v3628_v32  ;;  %v3671_v43 = vmax.f32 %v3669_v15, %v3670_v1  ;;  %5373 = vmatprep.subr.bf16.mxu1 (!%p6620_p1), %v7482_v9  ;;  %v7508_v38 = vld [vmem:[#allocation7 + $0x304] ss:$16 sps:$4 sm:$0xff] (!%p6620_p1)   ;;  %v7511_v53 = vld [vmem:[#allocation7 + $0x300] ss:$16 sps:$4 sm:$0xff] (!%p6620_p1)  }
 0x4a4   : > { %v3650_v17 = vmax.f32 %v3648_v23, %v3649_v29  ;;  %v3692_v46 = vmax.f32 %v3690_v57, %v3691_v36  ;;  %v7512_v27 = vld [vmem:[#allocation7 + $0x124] ss:$16 sps:$4 sm:$0xff] (!%p6620_p1)   ;;  %v7516_v13 = vld [vmem:[#allocation7 + $0x120] ss:$16 sps:$4 sm:$0xff] (!%p6620_p1)  }
 0x4a5   : > { %v7514_v7 = vld [vmem:[#allocation7 + $0x324] ss:$16 sps:$4 sm:$0xff] (!%p6620_p1)   ;;  %v7517_v12 = vld [vmem:[#allocation7 + $0x320] ss:$16 sps:$4 sm:$0xff] (!%p6620_p1)  }
 0x4a6   : > { %v3703_v21 = vcombine.low %v3629_v60, %v3650_v17  ;;  %v3704_v44 = vcombine.low %v3671_v43, %v3692_v46  ;;  %5374 = vmatpush1.bf16.msra.mxu1 (!%p6620_p1), %v7486_v24  ;;  %v7518_v37 = vld [vmem:[#allocation7 + $0x144] ss:$16 sps:$4 sm:$0xff] (!%p6620_p1)   ;;  %v7522_v42 = vld [vmem:[#allocation7 + $0x140] ss:$16 sps:$4 sm:$0xff] (!%p6620_p1)   ;;  %v7557_v24 = vld [vmem:[#allocation7 + $0x8] ss:$16 sps:$4 sm:$0xff] (!%p6620_p1)  }
 0x4a7   : > { %5375 = vmatprep.subr.bf16.mxu1 (!%p6620_p1), %v7488_v25  ;;  %v7520_v50 = vld [vmem:[#allocation7 + $0x344] ss:$16 sps:$4 sm:$0xff] (!%p6620_p1)   ;;  %v7523_v15 = vld [vmem:[#allocation7 + $0x340] ss:$16 sps:$4 sm:$0xff] (!%p6620_p1)   ;;  %v7565_v25 = vld [vmem:[#allocation7 + $0x2c] ss:$16 sps:$4 sm:$0xff] (!%p6620_p1)  }
 0x4a8   : > { %v3725_v28 = vrot.slane %v3703_v21, %v10133_v55  ;;  %v3732_v52 = vrot.slane %v3704_v44, %v10133_v55  ;;  %v7524_v23 = vld [vmem:[#allocation7 + $0x164] ss:$16 sps:$4 sm:$0xff] (!%p6620_p1)   ;;  %v7528_v1 = vld [vmem:[#allocation7 + $0x160] ss:$16 sps:$4 sm:$0xff] (!%p6620_p1)  }
 0x4a9   : > { %v7526_v57 = vld [vmem:[#allocation7 + $0x364] ss:$16 sps:$4 sm:$0xff] (!%p6620_p1)   ;;  %v7529_v17 = vld [vmem:[#allocation7 + $0x360] ss:$16 sps:$4 sm:$0xff] (!%p6620_p1)  }
 0x4aa   : > { %v3734_v3 = vcombine.low %v3725_v28, %v3732_v52  ;;  %5376 = vmatpush1.bf16.msra.mxu1 (!%p6620_p1), %v7492_v62  ;;  %v10680_v29 = vld [vmem:[#allocation29_spill] sm:$0xff] (!%p6620_p1)  ;;  %v10682_v54 = vld [vmem:[#allocation28_spill] sm:$0xff] (!%p6620_p1)  ;;  %v10683_v22 = vld [vmem:[#allocation30_spill] sm:$0xff] (!%p6620_p1) }
 0x4ab   : > { %5377 = vmatprep.subr.bf16.mxu1 (!%p6620_p1), %v7494_v48  ;;  %v10681_v60 = vld [vmem:[#allocation33_spill] sm:$0xff] (!%p6620_p1) }
 0x4ac   : > { %v3748_v31 = vrot.slane %v3734_v3, %v10133_v55  ;;  %3756 = sbr.rel (%p6620_p1) target bundleno = 2151 (0x867), region = 130  ;;  %v7469_v55 = vld [vmem:[#allocation7 + $0x220] ss:$16 sps:$4 sm:$0xff] (!%p6620_p1)   ;;  %v7530_v46 = vld [vmem:[#allocation7 + $0x184] ss:$16 sps:$4 sm:$0xff] (!%p6620_p1)  }
 0x4ad   : > { %5409 = vmatpush1.bf16.msra.mxu0 (!%p6620_p1), %v7469_v55  ;;  %v7532_v21 = vld [vmem:[#allocation7 + $0x384] ss:$16 sps:$4 sm:$0xff] (!%p6620_p1)   ;;  %v7534_v52 = vld [vmem:[#allocation7 + $0x180] ss:$16 sps:$4 sm:$0xff] (!%p6620_p1)  }
 0x4ae   : > { %v3749_v34 = vcombine.low %v3741_v5, %v3748_v31  ;;  %5410 = vmatprep.subr.bf16.mxu0 (!%p6620_p1), %v7472_v35  ;;  %5378 = vmatpush1.bf16.msra.mxu1 (!%p6620_p1), %v7498_v61  ;;  %v7535_v3 = vld [vmem:[#allocation7 + $0x380] ss:$16 sps:$4 sm:$0xff] (!%p6620_p1)   ;;  %v7536_v5 = vld [vmem:[#allocation7 + $0x1a4] ss:$16 sps:$4 sm:$0xff] (!%p6620_p1)  }
 0x4af   : > { %5379 = vmatprep.subr.bf16.mxu1 (!%p6620_p1), %v7500_v20  ;;  %v7538_v31 = vld [vmem:[#allocation7 + $0x3a4] ss:$16 sps:$4 sm:$0xff] (!%p6620_p1)   ;;  %v7546_v18 = vld [vmem:[#allocation7 + $0x1c0] ss:$16 sps:$4 sm:$0xff] (!%p6620_p1)  }
 0x4b0   : > { %v3751_v51 = vmax.f32 %v3524_v10, %v3749_v34  ;;  %v7540_v10 = vld [vmem:[#allocation7 + $0x1a0] ss:$16 sps:$4 sm:$0xff] (!%p6620_p1)   ;;  %v7544_v33 = vld [vmem:[#allocation7 + $0x3c4] ss:$16 sps:$4 sm:$0xff] (!%p6620_p1)  }
 0x4b1   : > { %5411 = vmatpush1.bf16.msra.mxu0 (!%p6620_p1), %v7475_v41  ;;  %v7541_v34 = vld [vmem:[#allocation7 + $0x3a0] ss:$16 sps:$4 sm:$0xff] (!%p6620_p1)   ;;  %v7548_v59 = vld [vmem:[#allocation7 + $0x1e4] ss:$16 sps:$4 sm:$0xff] (!%p6620_p1)  }
 0x4b2   : > { %3752 = vst [vmem:[#allocation2] sm:$0xff] %v3751_v51  ;;  %5412 = vmatprep.subr.bf16.mxu0 (!%p6620_p1), %v7478_v0  ;;  %5380 = vmatpush1.bf16.msra.mxu1 (!%p6620_p1), %v7504_v26  ;;  %v7542_v51 = vld [vmem:[#allocation7 + $0x1c4] ss:$16 sps:$4 sm:$0xff] (!%p6620_p1)   ;;  %v7547_v16 = vld [vmem:[#allocation7 + $0x3c0] ss:$16 sps:$4 sm:$0xff] (!%p6620_p1)  }
 0x4b3   : > { %5381 = vmatprep.subr.bf16.mxu1 %v7506_v58  ;;  %v7550_v8 = vld [vmem:[#allocation7 + $0x3e4] ss:$16 sps:$4 sm:$0xff]   ;;  %v7552_v30 = vld [vmem:[#allocation7 + $0x1e0] ss:$16 sps:$4 sm:$0xff]  }
 0x4b4   : > { %v7553_v39 = vld [vmem:[#allocation7 + $0x3e0] ss:$16 sps:$4 sm:$0xff]   ;;  %v7556_v41 = vld [vmem:[#allocation7 + $0x404] ss:$16 sps:$4 sm:$0xff]  }
 0x4b5   : > { %5413 = vmatpush1.bf16.msra.mxu0 %v7481_v63  ;;  %v10684_v0 = vld [vmem:[#allocation25_spill] sm:$0xff] }
 0x4b6   : > { %5414 = vmatprep.subr.bf16.mxu0 %v7484_v40  ;;  %5382 = vmatpush1.bf16.msra.mxu1 %v7510_v19  ;;  %v7554_v9 = vld [vmem:[#allocation7 + $0x400] ss:$16 sps:$4 sm:$0xff]   ;;  %v7568_v48 = vld [vmem:[#allocation7 + $0x444] ss:$16 sps:$4 sm:$0xff]  }
 0x4b7   : > { %5383 = vmatprep.subr.bf16.mxu1 %v7512_v27  ;;  %v7560_v62 = vld [vmem:[#allocation7 + $0x420] ss:$16 sps:$4 sm:$0xff]   ;;  %v7574_v20 = vld [vmem:[#allocation7 + $0x464] ss:$16 sps:$4 sm:$0xff]  }
 0x4b8   : > { %v7566_v61 = vld [vmem:[#allocation7 + $0x440] ss:$16 sps:$4 sm:$0xff]   ;;  %v7580_v58 = vld [vmem:[#allocation7 + $0x484] ss:$16 sps:$4 sm:$0xff]  }
 0x4b9   : > { %5415 = vmatpush1.bf16.msra.mxu0 %v7487_v47  ;;  %v10215_v32 = vld [vmem:[#allocation2] sm:$0xff]  ;;  %v7562_v47 = vld [vmem:[#allocation7 + $0x424] ss:$16 sps:$4 sm:$0xff]   ;;  %v7572_v26 = vld [vmem:[#allocation7 + $0x460] ss:$16 sps:$4 sm:$0xff]  }
 0x4ba   : > { %5416 = vmatprep.subr.bf16.mxu0 %v7490_v56  ;;  %5384 = vmatpush1.bf16.msra.mxu1 %v7516_v13  ;;  %v3766_v36 = vrot.slane %v10215_v32, %v10680_v29  ;;  %v3774_v43 = vrot.slane %v10215_v32, %v10681_v60  ;;  %v3762_v55 = vrot.slane %v10215_v32, %v10682_v54  ;;  %v7578_v19 = vld [vmem:[#allocation7 + $0x480] ss:$16 sps:$4 sm:$0xff]   ;;  %v7586_v27 = vld [vmem:[#allocation7 + $0x4a4] ss:$16 sps:$4 sm:$0xff]  }
 0x4bb   : > { %5385 = vmatprep.subr.bf16.mxu1 %v7518_v37  ;;  %v3770_v35 = vrot.slane %v10215_v32, %v10683_v22  ;;  %v3782_v4 = vrot.slane %v10215_v32, %v10684_v0  ;;  %v7584_v13 = vld [vmem:[#allocation7 + $0x4a0] ss:$16 sps:$4 sm:$0xff]   ;;  %v7592_v37 = vld [vmem:[#allocation7 + $0x4c4] ss:$16 sps:$4 sm:$0xff]   ;;  %v7635_v0 = vld [vmem:[#allocation7 + $0x1a8] ss:$16 sps:$4 sm:$0xff]  }
 0x4bc   : > { %v3800_v44 = vpack.c.bf16 %v3766_v36, %v3766_v36  ;;  %v10221_v28 = vpack.c.bf16 %v3774_v43, %v3774_v43  ;;  %v10230_v63 = vpack.c.bf16 %v3762_v55, %v3762_v55  ;;  %v7599_v36 = vld [vmem:[#allocation7 + $0xe8] ss:$16 sps:$4 sm:$0xff]   ;;  %v7604_v43 = vld [vmem:[#allocation7 + $0x504] ss:$16 sps:$4 sm:$0xff]   ;;  %v7626_v55 = vld [vmem:[#allocation7 + $0x580] ss:$16 sps:$4 sm:$0xff]  }
 0x4bd   : > { %5417 = vmatpush1.bf16.msra.mxu0 %v7493_v14  ;;  %v10232_v40 = vpack.c.bf16 %v3770_v35, %v3770_v35  ;;  %v10234_v56 = vpack.c.bf16 %v3782_v4, %v3782_v4  ;;  %v7563_v14 = vld [vmem:[#allocation7 + $0x28] ss:$16 sps:$4 sm:$0xff]   ;;  %v7640_v4 = vld [vmem:[#allocation7 + $0x5c4] ss:$16 sps:$4 sm:$0xff]  }
 0x4be   : > { %5418 = vmatprep.subr.bf16.mxu0 %v7496_v45  ;;  %5386 = vmatpush1.bf16.msra.mxu1 %v7522_v42  ;;  %v7571_v45 = vld [vmem:[#allocation7 + $0x4c] ss:$16 sps:$4 sm:$0xff]   ;;  %v7590_v42 = vld [vmem:[#allocation7 + $0x4c0] ss:$16 sps:$4 sm:$0xff]   ;;  %v7629_v35 = vld [vmem:[#allocation7 + $0x188] ss:$16 sps:$4 sm:$0xff]  }
 0x4bf   : > { %5387 = vmatprep.subr.bf16.mxu1 %v7524_v23  ;;  %5397 = vmatprep.mubr.bf16.mxu1 %v3800_v44  ;;  %v7598_v23 = vld [vmem:[#allocation7 + $0x4e4] ss:$16 sps:$4 sm:$0xff]  }
 0x4c0   : > { %5438 = vmatprep.mubr.bf16.mxu0 %v10221_v28 }
 0x4c1   : > { %5419 = vmatpush1.bf16.msra.mxu0 %v7499_v11  ;;  %v7569_v11 = vld [vmem:[#allocation7 + $0x48] ss:$16 sps:$4 sm:$0xff]  }
 0x4c2   : > { %5420 = vmatprep.subr.bf16.mxu0 %v7502_v49  ;;  %5388 = vmatpush1.bf16.msra.mxu1 %v7528_v1  ;;  %v7577_v49 = vld [vmem:[#allocation7 + $0x6c] ss:$16 sps:$4 sm:$0xff]   ;;  %v7596_v1 = vld [vmem:[#allocation7 + $0x4e0] ss:$16 sps:$4 sm:$0xff]  }
 0x4c3   : > { %5389 = vmatprep.subr.bf16.mxu1 %v7530_v46  ;;  %v7602_v46 = vld [vmem:[#allocation7 + $0x500] ss:$16 sps:$4 sm:$0xff]  }
 0x4c5   : > { %5421 = vmatpush1.bf16.msra.mxu0 %v7505_v2  ;;  %v7575_v2 = vld [vmem:[#allocation7 + $0x68] ss:$16 sps:$4 sm:$0xff]  }
 0x4c6   : > { %5422 = vmatprep.subr.bf16.mxu0 %v7508_v38  ;;  %5390 = vmatpush1.bf16.msra.mxu1 %v7534_v52  ;;  %v7583_v38 = vld [vmem:[#allocation7 + $0x8c] ss:$16 sps:$4 sm:$0xff]  }
 0x4c7   : > { %5391 = vmatprep.subr.bf16.mxu1 %v7536_v5  ;;  %v7613_v52 = vld [vmem:[#allocation7 + $0x12c] ss:$16 sps:$4 sm:$0xff]   ;;  %v7611_v5 = vld [vmem:[#allocation7 + $0x128] ss:$16 sps:$4 sm:$0xff]  }
 0x4c9   : > { %5423 = vmatpush1.bf16.msra.mxu0 %v7511_v53  ;;  %v7581_v53 = vld [vmem:[#allocation7 + $0x88] ss:$16 sps:$4 sm:$0xff]  }
 0x4ca   : > { %5424 = vmatprep.subr.bf16.mxu0 %v7514_v7  ;;  %5392 = vmatpush1.bf16.msra.mxu1 %v7540_v10  ;;  %v7589_v7 = vld [vmem:[#allocation7 + $0xac] ss:$16 sps:$4 sm:$0xff]  }
 0x4cb   : > { %5393 = vmatprep.subr.bf16.mxu1 %v7542_v51  ;;  %v7619_v10 = vld [vmem:[#allocation7 + $0x14c] ss:$16 sps:$4 sm:$0xff]   ;;  %v7617_v51 = vld [vmem:[#allocation7 + $0x148] ss:$16 sps:$4 sm:$0xff]  }
 0x4cd   : > { %5425 = vmatpush1.bf16.msra.mxu0 %v7517_v12  ;;  %v7587_v12 = vld [vmem:[#allocation7 + $0xa8] ss:$16 sps:$4 sm:$0xff]  }
 0x4ce   : > { %5426 = vmatprep.subr.bf16.mxu0 %v7520_v50  ;;  %5394 = vmatpush1.bf16.msra.mxu1 %v7546_v18  ;;  %v7595_v50 = vld [vmem:[#allocation7 + $0xcc] ss:$16 sps:$4 sm:$0xff]  }
 0x4cf   : > { %5395 = vmatprep.subr.bf16.mxu1 %v7548_v59  ;;  %v7625_v18 = vld [vmem:[#allocation7 + $0x16c] ss:$16 sps:$4 sm:$0xff]   ;;  %v7623_v59 = vld [vmem:[#allocation7 + $0x168] ss:$16 sps:$4 sm:$0xff]  }
 0x4d1   : > { %5427 = vmatpush1.bf16.msra.mxu0 %v7523_v15  ;;  %v7593_v15 = vld [vmem:[#allocation7 + $0xc8] ss:$16 sps:$4 sm:$0xff]  }
 0x4d2   : > { %5428 = vmatprep.subr.bf16.mxu0 %v7526_v57  ;;  %5396 = vmatpush1.bf16.msra.mxu1 %v7552_v30  ;;  %v7601_v57 = vld [vmem:[#allocation7 + $0xec] ss:$16 sps:$4 sm:$0xff]  }
 0x4d3   : > { %5529 = vmatprep.subr.bf16.mxu1 %v7559_v6  ;;  %v7631_v30 = vld [vmem:[#allocation7 + $0x18c] ss:$16 sps:$4 sm:$0xff]   ;;  %v7632_v6 = vld [vmem:[#allocation7 + $0x5a0] ss:$16 sps:$4 sm:$0xff]  }
 0x4d5   : > { %5429 = vmatpush1.bf16.msra.mxu0 %v7529_v17  ;;  %5398 = vmatmul.mubr.bf16.vlgmr.msra.gmra.mrb[0].mxu1 %v10230_v63  ;;  %v7607_v17 = vld [vmem:[#allocation7 + $0x10c] ss:$16 sps:$4 sm:$0xff]  }
 0x4d6   : > { %5430 = vmatprep.subr.bf16.mxu0 %v7532_v21  ;;  %5530 = vmatpush1.bf16.msra.mxu1 %v7557_v24  ;;  %v7605_v21 = vld [vmem:[#allocation7 + $0x108] ss:$16 sps:$4 sm:$0xff]   ;;  %v7638_v24 = vld [vmem:[#allocation7 + $0x5c0] ss:$16 sps:$4 sm:$0xff]  }
 0x4d7   : > { %5531 = vmatprep.subr.bf16.mxu1 %v7565_v25  ;;  %5561 = vmatprep.mubr.bf16.mxu1 %v3800_v44  ;;  %v7610_v44 = vld [vmem:[#allocation7 + $0x524] ss:$16 sps:$4 sm:$0xff]  }
 0x4d8   : > { %v7646_v25 = vld [vmem:[#allocation7 + $0x5e4] ss:$16 sps:$4 sm:$0xff]  }
 0x4d9   : > { %5431 = vmatpush1.bf16.msra.mxu0 %v7535_v3  ;;  %v7608_v3 = vld [vmem:[#allocation7 + $0x520] ss:$16 sps:$4 sm:$0xff]  }
 0x4da   : > { %5432 = vmatprep.subr.bf16.mxu0 %v7538_v31  ;;  %5532 = vmatpush1.bf16.msra.mxu1 %v7563_v14  ;;  %v7616_v31 = vld [vmem:[#allocation7 + $0x544] ss:$16 sps:$4 sm:$0xff]   ;;  %v7644_v14 = vld [vmem:[#allocation7 + $0x5e0] ss:$16 sps:$4 sm:$0xff]  }
 0x4db   : > { %5533 = vmatprep.subr.bf16.mxu1 %v7571_v45 }
 0x4dd   : > { %5433 = vmatpush1.bf16.msra.mxu0 %v7541_v34  ;;  %v7614_v34 = vld [vmem:[#allocation7 + $0x540] ss:$16 sps:$4 sm:$0xff]  }
 0x4de   : > { %5434 = vmatprep.subr.bf16.mxu0 %v7544_v33  ;;  %5534 = vmatpush1.bf16.msra.mxu1 %v7569_v11  ;;  %v7622_v33 = vld [vmem:[#allocation7 + $0x564] ss:$16 sps:$4 sm:$0xff]  }
 0x4df   : > { %5535 = vmatprep.subr.bf16.mxu1 %v7577_v49  ;;  %v7652_v11 = vld [vmem:[#allocation7 + $0x604] ss:$16 sps:$4 sm:$0xff]  }
 0x4e0   : > { %v10686_v49 = vld [vmem:[#allocation27_spill] sm:$0xff] }
 0x4e1   : > { %5435 = vmatpush1.bf16.msra.mxu0 %v7547_v16  ;;  %v7620_v16 = vld [vmem:[#allocation7 + $0x560] ss:$16 sps:$4 sm:$0xff]  }
 0x4e2   : > { %5436 = vmatprep.subr.bf16.mxu0 %v7550_v8  ;;  %5536 = vmatpush1.bf16.msra.mxu1 %v7575_v2  ;;  %v7628_v8 = vld [vmem:[#allocation7 + $0x584] ss:$16 sps:$4 sm:$0xff]   ;;  %v7650_v2 = vld [vmem:[#allocation7 + $0x600] ss:$16 sps:$4 sm:$0xff]  }
 0x4e3   : > { %5537 = vmatprep.subr.bf16.mxu1 %v7583_v38  ;;  %v7653_v38 = vld [vmem:[#allocation7 + $0x208] ss:$16 sps:$4 sm:$0xff]  }
 0x4e5   : > { %5437 = vmatpush1.bf16.msra.mxu0 %v7553_v39  ;;  %v7634_v39 = vld [vmem:[#allocation7 + $0x5a4] ss:$16 sps:$4 sm:$0xff]  }
 0x4e6   : > { %5447 = vmatprep.subr.bf16.mxu0 %v7556_v41  ;;  %5538 = vmatpush1.bf16.msra.mxu1 %v7581_v53  ;;  %v7637_v41 = vld [vmem:[#allocation7 + $0x1ac] ss:$16 sps:$4 sm:$0xff]  }
 0x4e7   : > { %5539 = vmatprep.subr.bf16.mxu1 %v7589_v7  ;;  %v7661_v53 = vld [vmem:[#allocation7 + $0x22c] ss:$16 sps:$4 sm:$0xff]   ;;  %v7656_v7 = vld [vmem:[#allocation7 + $0x620] ss:$16 sps:$4 sm:$0xff]  }
 0x4e8   : > { %5439 = vmatmul.mubr.bf16.vlgmr.msra.gmra.mrb[0].mxu0 %v10232_v40 }
 0x4e9   : > { %5448 = vmatpush1.bf16.msra.mxu0 %v7554_v9  ;;  %5479 = vmatprep.mubr.bf16.mxu0 %v10234_v56  ;;  %v7643_v9 = vld [vmem:[#allocation7 + $0x1cc] ss:$16 sps:$4 sm:$0xff]  }
 0x4ea   : > { %5449 = vmatprep.subr.bf16.mxu0 %v7562_v47  ;;  %5540 = vmatpush1.bf16.msra.mxu1 %v7587_v12  ;;  %v7641_v47 = vld [vmem:[#allocation7 + $0x1c8] ss:$16 sps:$4 sm:$0xff]   ;;  %v7667_v12 = vld [vmem:[#allocation7 + $0x24c] ss:$16 sps:$4 sm:$0xff]  }
 0x4eb   : > { %5541 = vmatprep.subr.bf16.mxu1 %v7595_v50  ;;  %v7665_v50 = vld [vmem:[#allocation7 + $0x248] ss:$16 sps:$4 sm:$0xff]  }
 0x4ed   : > { %5450 = vmatpush1.bf16.msra.mxu0 %v7560_v62  ;;  %v7649_v62 = vld [vmem:[#allocation7 + $0x1ec] ss:$16 sps:$4 sm:$0xff]  }
 0x4ee   : > { %5451 = vmatprep.subr.bf16.mxu0 %v7568_v48  ;;  %5542 = vmatpush1.bf16.msra.mxu1 %v7593_v15  ;;  %v10685_v48 = vld [vmem:[#allocation24_spill] sm:$0xff] }
 0x4ef   : > { %5543 = vmatprep.subr.bf16.mxu1 %v7601_v57  ;;  %v3778_v45 = vrot.slane %v10215_v32, %v10685_v48  ;;  %v7668_v15 = vld [vmem:[#allocation7 + $0x660] ss:$16 sps:$4 sm:$0xff]   ;;  %v7676_v57 = vld [vmem:[#allocation7 + $0x684] ss:$16 sps:$4 sm:$0xff]   ;;  %v7725_v48 = vld [vmem:[#allocation7 + $0x388] ss:$16 sps:$4 sm:$0xff]  }
 0x4f1   : > { %5452 = vmatpush1.bf16.msra.mxu0 %v7566_v61  ;;  %v7647_v61 = vld [vmem:[#allocation7 + $0x1e8] ss:$16 sps:$4 sm:$0xff]  }
 0x4f2   : > { %5453 = vmatprep.subr.bf16.mxu0 %v7574_v20  ;;  %5544 = vmatpush1.bf16.msra.mxu1 %v7599_v36  ;;  %v7655_v20 = vld [vmem:[#allocation7 + $0x20c] ss:$16 sps:$4 sm:$0xff]   ;;  %v7674_v36 = vld [vmem:[#allocation7 + $0x680] ss:$16 sps:$4 sm:$0xff]  }
 0x4f3   : > { %5545 = vmatprep.subr.bf16.mxu1 %v7607_v17  ;;  %v7685_v17 = vld [vmem:[#allocation7 + $0x2ac] ss:$16 sps:$4 sm:$0xff]  }
 0x4f5   : > { %5454 = vmatpush1.bf16.msra.mxu0 %v7572_v26  ;;  %v3790_v26 = vrot.slane %v10215_v32, %v10686_v49  ;;  %v7659_v32 = vld [vmem:[#allocation7 + $0x228] ss:$16 sps:$4 sm:$0xff]   ;;  %v7736_v49 = vld [vmem:[#allocation7 + $0x7c4] ss:$16 sps:$4 sm:$0xff]  }
 0x4f6   : > { %5455 = vmatprep.subr.bf16.mxu0 %v7580_v58  ;;  %5546 = vmatpush1.bf16.msra.mxu1 %v7605_v21  ;;  %v10243_v58 = vpack.c.bf16 %v3778_v45, %v3778_v45  ;;  %v7683_v21 = vld [vmem:[#allocation7 + $0x2a8] ss:$16 sps:$4 sm:$0xff]   ;;  %v7730_v45 = vld [vmem:[#allocation7 + $0x7a4] ss:$16 sps:$4 sm:$0xff]  }
 0x4f7   : > { %5547 = vmatprep.subr.bf16.mxu1 %v7613_v52  ;;  %v7691_v52 = vld [vmem:[#allocation7 + $0x2cc] ss:$16 sps:$4 sm:$0xff]  }
 0x4f9   : > { %5456 = vmatpush1.bf16.msra.mxu0 %v7578_v19  ;;  %v7658_v19 = vld [vmem:[#allocation7 + $0x624] ss:$16 sps:$4 sm:$0xff]  }
 0x4fa   : > { %5457 = vmatprep.subr.bf16.mxu0 %v7586_v27  ;;  %5548 = vmatpush1.bf16.msra.mxu1 %v7611_v5  ;;  %v10245_v27 = vpack.c.bf16 %v3790_v26, %v3790_v26  ;;  %v7689_v5 = vld [vmem:[#allocation7 + $0x2c8] ss:$16 sps:$4 sm:$0xff]   ;;  %v7739_v26 = vld [vmem:[#allocation7 + $0x3cc] ss:$16 sps:$4 sm:$0xff]  }
 0x4fb   : > { %5549 = vmatprep.subr.bf16.mxu1 %v7619_v10  ;;  %v7697_v10 = vld [vmem:[#allocation7 + $0x2ec] ss:$16 sps:$4 sm:$0xff]  }
 0x4fd   : > { %5458 = vmatpush1.bf16.msra.mxu0 %v7584_v13  ;;  %v7664_v13 = vld [vmem:[#allocation7 + $0x644] ss:$16 sps:$4 sm:$0xff]  }
 0x4fe   : > { %5459 = vmatprep.subr.bf16.mxu0 %v7592_v37  ;;  %5550 = vmatpush1.bf16.msra.mxu1 %v7617_v51  ;;  %v7662_v37 = vld [vmem:[#allocation7 + $0x640] ss:$16 sps:$4 sm:$0xff]   ;;  %v7695_v51 = vld [vmem:[#allocation7 + $0x2e8] ss:$16 sps:$4 sm:$0xff]  }
 0x4ff   : > { %5551 = vmatprep.subr.bf16.mxu1 %v7625_v18  ;;  %v7703_v18 = vld [vmem:[#allocation7 + $0x30c] ss:$16 sps:$4 sm:$0xff]  }
 0x501   : > { %5460 = vmatpush1.bf16.msra.mxu0 %v7590_v42  ;;  %v7670_v42 = vld [vmem:[#allocation7 + $0x664] ss:$16 sps:$4 sm:$0xff]  }
 0x502   : > { %5461 = vmatprep.subr.bf16.mxu0 %v7598_v23  ;;  %5552 = vmatpush1.bf16.msra.mxu1 %v7623_v59  ;;  %v7671_v23 = vld [vmem:[#allocation7 + $0x268] ss:$16 sps:$4 sm:$0xff]  }
 0x503   : > { %5553 = vmatprep.subr.bf16.mxu1 %v7631_v30  ;;  %v7701_v59 = vld [vmem:[#allocation7 + $0x308] ss:$16 sps:$4 sm:$0xff]   ;;  %v7709_v30 = vld [vmem:[#allocation7 + $0x32c] ss:$16 sps:$4 sm:$0xff]  }
 0x505   : > { %5462 = vmatpush1.bf16.msra.mxu0 %v7596_v1  ;;  %v7679_v1 = vld [vmem:[#allocation7 + $0x28c] ss:$16 sps:$4 sm:$0xff]  }
 0x506   : > { %5463 = vmatprep.subr.bf16.mxu0 %v7604_v43  ;;  %5554 = vmatpush1.bf16.msra.mxu1 %v7629_v35  ;;  %v7682_v43 = vld [vmem:[#allocation7 + $0x6a4] ss:$16 sps:$4 sm:$0xff]   ;;  %v7707_v35 = vld [vmem:[#allocation7 + $0x328] ss:$16 sps:$4 sm:$0xff]  }
 0x507   : > { %5555 = vmatprep.subr.bf16.mxu1 %v7637_v41  ;;  %v7715_v41 = vld [vmem:[#allocation7 + $0x34c] ss:$16 sps:$4 sm:$0xff]  }
 0x509   : > { %5464 = vmatpush1.bf16.msra.mxu0 %v7602_v46  ;;  %v7680_v46 = vld [vmem:[#allocation7 + $0x6a0] ss:$16 sps:$4 sm:$0xff]  }
 0x50a   : > { %5465 = vmatprep.subr.bf16.mxu0 %v7610_v44  ;;  %5556 = vmatpush1.bf16.msra.mxu1 %v7635_v0  ;;  %v7688_v44 = vld [vmem:[#allocation7 + $0x6c4] ss:$16 sps:$4 sm:$0xff]   ;;  %v7713_v0 = vld [vmem:[#allocation7 + $0x348] ss:$16 sps:$4 sm:$0xff]  }
 0x50b   : > { %5557 = vmatprep.subr.bf16.mxu1 %v7643_v9  ;;  %v7721_v9 = vld [vmem:[#allocation7 + $0x36c] ss:$16 sps:$4 sm:$0xff]  }
 0x50d   : > { %5466 = vmatpush1.bf16.msra.mxu0 %v7608_v3  ;;  %v7686_v3 = vld [vmem:[#allocation7 + $0x6c0] ss:$16 sps:$4 sm:$0xff]  }
 0x50e   : > { %5467 = vmatprep.subr.bf16.mxu0 %v7616_v31  ;;  %5558 = vmatpush1.bf16.msra.mxu1 %v7641_v47  ;;  %v7694_v31 = vld [vmem:[#allocation7 + $0x6e4] ss:$16 sps:$4 sm:$0xff]   ;;  %v7719_v47 = vld [vmem:[#allocation7 + $0x368] ss:$16 sps:$4 sm:$0xff]  }
 0x50f   : > { %5559 = vmatprep.subr.bf16.mxu1 %v7649_v62  ;;  %v7727_v62 = vld [vmem:[#allocation7 + $0x38c] ss:$16 sps:$4 sm:$0xff]  }
 0x511   : > { %5468 = vmatpush1.bf16.msra.mxu0 %v7614_v34  ;;  %v7692_v34 = vld [vmem:[#allocation7 + $0x6e0] ss:$16 sps:$4 sm:$0xff]  }
 0x512   : > { %5469 = vmatprep.subr.bf16.mxu0 %v7622_v33  ;;  %5560 = vmatpush1.bf16.msra.mxu1 %v7647_v61  ;;  %v7700_v33 = vld [vmem:[#allocation7 + $0x704] ss:$16 sps:$4 sm:$0xff]   ;;  %v7733_v61 = vld [vmem:[#allocation7 + $0x3ac] ss:$16 sps:$4 sm:$0xff]  }
 0x513   : > { %5570 = vmatprep.subr.bf16.mxu1 %v7655_v20  ;;  %v7731_v20 = vld [vmem:[#allocation7 + $0x3a8] ss:$16 sps:$4 sm:$0xff]  }
 0x515   : > { %5470 = vmatpush1.bf16.msra.mxu0 %v7620_v16  ;;  %5562 = vmatmul.mubr.bf16.vlgmr.msra.gmra.mrb[4].mxu1 %v10230_v63  ;;  %v7673_v63 = vld [vmem:[#allocation7 + $0x26c] ss:$16 sps:$4 sm:$0xff]   ;;  %v7698_v16 = vld [vmem:[#allocation7 + $0x700] ss:$16 sps:$4 sm:$0xff]  }
 0x516   : > { %5471 = vmatprep.subr.bf16.mxu0 %v7628_v8  ;;  %5571 = vmatpush1.bf16.msra.mxu1 %v7653_v38  ;;  %v7706_v8 = vld [vmem:[#allocation7 + $0x724] ss:$16 sps:$4 sm:$0xff]   ;;  %v7737_v38 = vld [vmem:[#allocation7 + $0x3c8] ss:$16 sps:$4 sm:$0xff]  }
 0x517   : > { %5572 = vmatprep.subr.bf16.mxu1 %v7661_v53  ;;  %5602 = vmatprep.mubr.bf16.mxu1 %v10221_v28  ;;  %v7677_v28 = vld [vmem:[#allocation7 + $0x288] ss:$16 sps:$4 sm:$0xff]   ;;  %v7745_v53 = vld [vmem:[#allocation7 + $0x3ec] ss:$16 sps:$4 sm:$0xff]  }
 0x519   : > { %5472 = vmatpush1.bf16.msra.mxu0 %v7626_v55  ;;  %v7704_v55 = vld [vmem:[#allocation7 + $0x720] ss:$16 sps:$4 sm:$0xff]  }
 0x51a   : > { %5473 = vmatprep.subr.bf16.mxu0 %v7634_v39  ;;  %5573 = vmatpush1.bf16.msra.mxu1 %v7659_v32  ;;  %v7712_v39 = vld [vmem:[#allocation7 + $0x744] ss:$16 sps:$4 sm:$0xff]   ;;  %v7954_v32 = vld [vmem:[#allocation2] sm:$0xff] }
 0x51b   : > { %5574 = vmatprep.subr.bf16.mxu1 %v7667_v12 }
 0x51d   : > { %5474 = vmatpush1.bf16.msra.mxu0 %v7632_v6  ;;  %v7710_v6 = vld [vmem:[#allocation7 + $0x740] ss:$16 sps:$4 sm:$0xff]  }
 0x51e   : > { %5475 = vmatprep.subr.bf16.mxu0 %v7640_v4  ;;  %5575 = vmatpush1.bf16.msra.mxu1 %v7665_v50  ;;  %v7718_v4 = vld [vmem:[#allocation7 + $0x764] ss:$16 sps:$4 sm:$0xff]   ;;  %v7748_v50 = vld [vmem:[#allocation7 + $0x40c] ss:$16 sps:$4 sm:$0xff]  }
 0x51f   : > { %5576 = vmatprep.subr.bf16.mxu1 %v7673_v63 }
 0x521   : > { %5476 = vmatpush1.bf16.msra.mxu0 %v7638_v24  ;;  %v7716_v24 = vld [vmem:[#allocation7 + $0x760] ss:$16 sps:$4 sm:$0xff]  }
 0x522   : > { %5477 = vmatprep.subr.bf16.mxu0 %v7646_v25  ;;  %5577 = vmatpush1.bf16.msra.mxu1 %v7671_v23  ;;  %v7724_v25 = vld [vmem:[#allocation7 + $0x784] ss:$16 sps:$4 sm:$0xff]   ;;  %v7842_v23 = vld [vmem:[#allocation9] ss:$8 sps:$4 sm:$0xff]  }
 0x523   : > { %5578 = vmatprep.subr.bf16.mxu1 %v7679_v1  ;;  %v7749_v1 = vld [vmem:[#allocation7 + $0x428] ss:$16 sps:$4 sm:$0xff]  }
 0x525   : > { %5478 = vmatpush1.bf16.msra.mxu0 %v7644_v14  ;;  %v7722_v14 = vld [vmem:[#allocation7 + $0x780] ss:$16 sps:$4 sm:$0xff]  }
 0x526   : > { %5488 = vmatprep.subr.bf16.mxu0 %v7652_v11  ;;  %5579 = vmatpush1.bf16.msra.mxu1 %v7677_v28  ;;  %v7728_v11 = vld [vmem:[#allocation7 + $0x7a0] ss:$16 sps:$4 sm:$0xff]   ;;  %v7754_v28 = vld [vmem:[#allocation7 + $0x44c] ss:$16 sps:$4 sm:$0xff]  }
 0x527   : > { %5580 = vmatprep.subr.bf16.mxu1 %v7685_v17  ;;  %v7850_v17 = vld [vmem:[#allocation9 + $0x24] ss:$8 sps:$4 sm:$0xff]  }
 0x528   : > { %5480 = vmatmul.mubr.bf16.vlgmr.msra.gmra.mrb[0].mxu0 %v10243_v58 }
 0x529   : > { %5489 = vmatpush1.bf16.msra.mxu0 %v7650_v2  ;;  %5520 = vmatprep.mubr.bf16.mxu0 %v10245_v27  ;;  %v7734_v2 = vld [vmem:[#allocation7 + $0x7c0] ss:$16 sps:$4 sm:$0xff]  }
 0x52a   : > { %5490 = vmatprep.subr.bf16.mxu0 %v7658_v19  ;;  %5581 = vmatpush1.bf16.msra.mxu1 %v7683_v21  ;;  %v7742_v19 = vld [vmem:[#allocation7 + $0x7e4] ss:$16 sps:$4 sm:$0xff]   ;;  %v7757_v21 = vld [vmem:[#allocation7 + $0x46c] ss:$16 sps:$4 sm:$0xff]  }
 0x52b   : > { %5582 = vmatprep.subr.bf16.mxu1 %v7691_v52  ;;  %v7760_v52 = vld [vmem:[#allocation7 + $0x48c] ss:$16 sps:$4 sm:$0xff]  }
 0x52d   : > { %5491 = vmatpush1.bf16.msra.mxu0 %v7656_v7  ;;  %v7740_v7 = vld [vmem:[#allocation7 + $0x7e0] ss:$16 sps:$4 sm:$0xff]  }
 0x52e   : > { %5492 = vmatprep.subr.bf16.mxu0 %v7664_v13  ;;  %5583 = vmatpush1.bf16.msra.mxu1 %v7689_v5  ;;  %v10687_v13 = vld [vmem:[#allocation26_spill] sm:$0xff]  ;;  %v7856_v5 = vld [vmem:[#allocation9 + $0x44] ss:$8 sps:$4 sm:$0xff]  }
 0x52f   : > { %5584 = vmatprep.subr.bf16.mxu1 %v7697_v10  ;;  %v3786_v12 = vrot.slane %v7954_v32, %v10687_v13  ;;  %v7763_v10 = vld [vmem:[#allocation7 + $0x4ac] ss:$16 sps:$4 sm:$0xff]   ;;  %v7785_v13 = vld [vmem:[#allocation7 + $0x5a8] ss:$16 sps:$4 sm:$0xff]  }
 0x530   : > { %v7883_v32 = vld [vmem:[#allocation9 + $0xd4] ss:$8 sps:$4 sm:$0xff]  }
 0x531   : > { %5493 = vmatpush1.bf16.msra.mxu0 %v7662_v37  ;;  %v7743_v37 = vld [vmem:[#allocation7 + $0x3e8] ss:$16 sps:$4 sm:$0xff]   ;;  %v10252_v63 = vpack.c.bf16 %v3786_v12, %v3786_v12  ;;  %v7790_v12 = vld [vmem:[#allocation7 + $0x5cc] ss:$16 sps:$4 sm:$0xff]  }
 0x532   : > { %5494 = vmatprep.subr.bf16.mxu0 %v7670_v42  ;;  %5585 = vmatpush1.bf16.msra.mxu1 %v7695_v51  ;;  %v7746_v42 = vld [vmem:[#allocation7 + $0x408] ss:$16 sps:$4 sm:$0xff]   ;;  %v7859_v51 = vld [vmem:[#allocation9 + $0x54] ss:$8 sps:$4 sm:$0xff]  }
 0x533   : > { %5586 = vmatprep.subr.bf16.mxu1 %v7703_v18  ;;  %v7766_v18 = vld [vmem:[#allocation7 + $0x4cc] ss:$16 sps:$4 sm:$0xff]  }
 0x535   : > { %5495 = vmatpush1.bf16.msra.mxu0 %v7668_v15  ;;  %v7751_v15 = vld [vmem:[#allocation7 + $0x42c] ss:$16 sps:$4 sm:$0xff]  }
 0x536   : > { %5496 = vmatprep.subr.bf16.mxu0 %v7676_v57  ;;  %5587 = vmatpush1.bf16.msra.mxu1 %v7701_v59  ;;  %v7844_v57 = vld [vmem:[#allocation9 + $0x4] ss:$8 sps:$4 sm:$0xff]  }
 0x537   : > { %5588 = vmatprep.subr.bf16.mxu1 %v7709_v30  ;;  %v7862_v59 = vld [vmem:[#allocation9 + $0x64] ss:$8 sps:$4 sm:$0xff]  }
 0x538   : > { %v7769_v30 = vld [vmem:[#allocation7 + $0x4ec] ss:$16 sps:$4 sm:$0xff]  }
 0x539   : > { %5497 = vmatpush1.bf16.msra.mxu0 %v7674_v36  ;;  %v7847_v36 = vld [vmem:[#allocation9 + $0x14] ss:$8 sps:$4 sm:$0xff]  }
 0x53a   : > { %5498 = vmatprep.subr.bf16.mxu0 %v7682_v43  ;;  %5589 = vmatpush1.bf16.msra.mxu1 %v7707_v35  ;;  %v7845_v43 = vld [vmem:[#allocation9 + $0x10] ss:$8 sps:$4 sm:$0xff]   ;;  %v7865_v35 = vld [vmem:[#allocation9 + $0x74] ss:$8 sps:$4 sm:$0xff]  }
 0x53b   : > { %5590 = vmatprep.subr.bf16.mxu1 %v7715_v41  ;;  %v7772_v41 = vld [vmem:[#allocation7 + $0x50c] ss:$16 sps:$4 sm:$0xff]  }
 0x53d   : > { %5499 = vmatpush1.bf16.msra.mxu0 %v7680_v46  ;;  %v7752_v46 = vld [vmem:[#allocation7 + $0x448] ss:$16 sps:$4 sm:$0xff]  }
 0x53e   : > { %5500 = vmatprep.subr.bf16.mxu0 %v7688_v44  ;;  %5591 = vmatpush1.bf16.msra.mxu1 %v7713_v0  ;;  %v7755_v44 = vld [vmem:[#allocation7 + $0x468] ss:$16 sps:$4 sm:$0xff]   ;;  %v7868_v0 = vld [vmem:[#allocation9 + $0x84] ss:$8 sps:$4 sm:$0xff]  }
 0x53f   : > { %5592 = vmatprep.subr.bf16.mxu1 %v7721_v9  ;;  %v7775_v9 = vld [vmem:[#allocation7 + $0x52c] ss:$16 sps:$4 sm:$0xff]  }
 0x541   : > { %5501 = vmatpush1.bf16.msra.mxu0 %v7686_v3  ;;  %v7853_v3 = vld [vmem:[#allocation9 + $0x34] ss:$8 sps:$4 sm:$0xff]  }
 0x542   : > { %5502 = vmatprep.subr.bf16.mxu0 %v7694_v31  ;;  %5593 = vmatpush1.bf16.msra.mxu1 %v7719_v47  ;;  %v7758_v31 = vld [vmem:[#allocation7 + $0x488] ss:$16 sps:$4 sm:$0xff]   ;;  %v7871_v47 = vld [vmem:[#allocation9 + $0x94] ss:$8 sps:$4 sm:$0xff]  }
 0x543   : > { %5594 = vmatprep.subr.bf16.mxu1 %v7727_v62  ;;  %v7778_v62 = vld [vmem:[#allocation7 + $0x54c] ss:$16 sps:$4 sm:$0xff]  }
 0x545   : > { %5503 = vmatpush1.bf16.msra.mxu0 %v7692_v34  ;;  %v7854_v34 = vld [vmem:[#allocation9 + $0x40] ss:$8 sps:$4 sm:$0xff]  }
 0x546   : > { %5504 = vmatprep.subr.bf16.mxu0 %v7700_v33  ;;  %5595 = vmatpush1.bf16.msra.mxu1 %v7725_v48  ;;  %v7761_v33 = vld [vmem:[#allocation7 + $0x4a8] ss:$16 sps:$4 sm:$0xff]   ;;  %v7874_v48 = vld [vmem:[#allocation9 + $0xa4] ss:$8 sps:$4 sm:$0xff]  }
 0x547   : > { %5596 = vmatprep.subr.bf16.mxu1 %v7733_v61  ;;  %v7781_v61 = vld [vmem:[#allocation7 + $0x56c] ss:$16 sps:$4 sm:$0xff]  }
 0x549   : > { %5505 = vmatpush1.bf16.msra.mxu0 %v7698_v16  ;;  %v7857_v16 = vld [vmem:[#allocation9 + $0x50] ss:$8 sps:$4 sm:$0xff]  }
 0x54a   : > { %5506 = vmatprep.subr.bf16.mxu0 %v7706_v8  ;;  %5597 = vmatpush1.bf16.msra.mxu1 %v7731_v20  ;;  %v7764_v8 = vld [vmem:[#allocation7 + $0x4c8] ss:$16 sps:$4 sm:$0xff]   ;;  %v7877_v20 = vld [vmem:[#allocation9 + $0xb4] ss:$8 sps:$4 sm:$0xff]  }
 0x54b   : > { %5598 = vmatprep.subr.bf16.mxu1 %v7739_v26  ;;  %v7784_v26 = vld [vmem:[#allocation7 + $0x58c] ss:$16 sps:$4 sm:$0xff]  }
 0x54d   : > { %5507 = vmatpush1.bf16.msra.mxu0 %v7704_v55  ;;  %v7860_v55 = vld [vmem:[#allocation9 + $0x60] ss:$8 sps:$4 sm:$0xff]  }
 0x54e   : > { %5508 = vmatprep.subr.bf16.mxu0 %v7712_v39  ;;  %5599 = vmatpush1.bf16.msra.mxu1 %v7737_v38  ;;  %v7767_v39 = vld [vmem:[#allocation7 + $0x4e8] ss:$16 sps:$4 sm:$0xff]   ;;  %v7880_v38 = vld [vmem:[#allocation9 + $0xc4] ss:$8 sps:$4 sm:$0xff]  }
 0x54f   : > { %5600 = vmatprep.subr.bf16.mxu1 %v7745_v53  ;;  %v7787_v53 = vld [vmem:[#allocation7 + $0x5ac] ss:$16 sps:$4 sm:$0xff]  }
 0x551   : > { %5509 = vmatpush1.bf16.msra.mxu0 %v7710_v6  ;;  %v7863_v6 = vld [vmem:[#allocation9 + $0x70] ss:$8 sps:$4 sm:$0xff]  }
 0x552   : > { %5510 = vmatprep.subr.bf16.mxu0 %v7718_v4  ;;  %5601 = vmatpush1.bf16.msra.mxu1 %v7743_v37  ;;  %v7770_v4 = vld [vmem:[#allocation7 + $0x508] ss:$16 sps:$4 sm:$0xff]  }
 0x553   : > { %5611 = vmatprep.subr.bf16.mxu1 %v7748_v50  ;;  %v7881_v37 = vld [vmem:[#allocation9 + $0xd0] ss:$8 sps:$4 sm:$0xff]  }
 0x554   : > { %v7788_v50 = vld [vmem:[#allocation7 + $0x5c8] ss:$16 sps:$4 sm:$0xff]  }
 0x555   : > { %5511 = vmatpush1.bf16.msra.mxu0 %v7716_v24  ;;  %5603 = vmatmul.mubr.bf16.vlgmr.msra.gmra.mrb[4].mxu1 %v10232_v40  ;;  %v7848_v40 = vld [vmem:[#allocation9 + $0x20] ss:$8 sps:$4 sm:$0xff]  }
 0x556   : > { %5512 = vmatprep.subr.bf16.mxu0 %v7724_v25  ;;  %5612 = vmatpush1.bf16.msra.mxu1 %v7746_v42  ;;  %v7866_v24 = vld [vmem:[#allocation9 + $0x80] ss:$8 sps:$4 sm:$0xff]   ;;  %v7793_v42 = vld [vmem:[#allocation7 + $0x5ec] ss:$16 sps:$4 sm:$0xff]  }
 0x557   : > { %5643 = vmatprep.mubr.bf16.mxu1 %v10234_v56  ;;  %5613 = vmatprep.subr.bf16.mxu1 %v7751_v15  ;;  %v7851_v56 = vld [vmem:[#allocation9 + $0x30] ss:$8 sps:$4 sm:$0xff]  }
 0x558   : > { %v7773_v25 = vld [vmem:[#allocation7 + $0x528] ss:$16 sps:$4 sm:$0xff]  }
 0x559   : > { %5513 = vmatpush1.bf16.msra.mxu0 %v7722_v14  ;;  %v7869_v14 = vld [vmem:[#allocation9 + $0x90] ss:$8 sps:$4 sm:$0xff]  }
 0x55a   : > { %5514 = vmatprep.subr.bf16.mxu0 %v7730_v45  ;;  %5614 = vmatpush1.bf16.msra.mxu1 %v7749_v1  ;;  %v7776_v45 = vld [vmem:[#allocation7 + $0x548] ss:$16 sps:$4 sm:$0xff]   ;;  %v7799_v1 = vld [vmem:[#allocation7 + $0x62c] ss:$16 sps:$4 sm:$0xff]  }
 0x55b   : > { %5615 = vmatprep.subr.bf16.mxu1 %v7754_v28  ;;  %v7791_v15 = vld [vmem:[#allocation7 + $0x5e8] ss:$16 sps:$4 sm:$0xff]   ;;  %v7802_v28 = vld [vmem:[#allocation7 + $0x64c] ss:$16 sps:$4 sm:$0xff]  }
 0x55d   : > { %5515 = vmatpush1.bf16.msra.mxu0 %v7728_v11  ;;  %v7872_v11 = vld [vmem:[#allocation9 + $0xa0] ss:$8 sps:$4 sm:$0xff]  }
 0x55e   : > { %5516 = vmatprep.subr.bf16.mxu0 %v7736_v49  ;;  %5616 = vmatpush1.bf16.msra.mxu1 %v7752_v46  ;;  %v7779_v49 = vld [vmem:[#allocation7 + $0x568] ss:$16 sps:$4 sm:$0xff]  }
 0x55f   : > { %5617 = vmatprep.subr.bf16.mxu1 %v7757_v21  ;;  %v7803_v46 = vld [vmem:[#allocation7 + $0x668] ss:$16 sps:$4 sm:$0xff]   ;;  %v7808_v21 = vld [vmem:[#allocation7 + $0x68c] ss:$16 sps:$4 sm:$0xff]  }
 0x561   : > { %5517 = vmatpush1.bf16.msra.mxu0 %v7734_v2  ;;  %v7875_v2 = vld [vmem:[#allocation9 + $0xb0] ss:$8 sps:$4 sm:$0xff]  }
 0x562   : > { %5518 = vmatprep.subr.bf16.mxu0 %v7742_v19  ;;  %5618 = vmatpush1.bf16.msra.mxu1 %v7755_v44  ;;  %v7782_v19 = vld [vmem:[#allocation7 + $0x588] ss:$16 sps:$4 sm:$0xff]   ;;  %v7811_v44 = vld [vmem:[#allocation7 + $0x6ac] ss:$16 sps:$4 sm:$0xff]  }
 0x563   : > { %5619 = vmatprep.subr.bf16.mxu1 %v7760_v52  ;;  %v7814_v52 = vld [vmem:[#allocation7 + $0x6cc] ss:$16 sps:$4 sm:$0xff]  }
 0x565   : > { %5519 = vmatpush1.bf16.msra.mxu0 %v7740_v7  ;;  %v7878_v7 = vld [vmem:[#allocation9 + $0xc0] ss:$8 sps:$4 sm:$0xff]  }
 0x566   : > { %6097 = vmatprep.subr.bf16.mxu0 %v7844_v57  ;;  %5620 = vmatpush1.bf16.msra.mxu1 %v7758_v31  ;;  %v7794_v57 = vld [vmem:[#allocation7 + $0x608] ss:$16 sps:$4 sm:$0xff]  }
 0x567   : > { %5621 = vmatprep.subr.bf16.mxu1 %v7763_v10  ;;  %v7812_v10 = vld [vmem:[#allocation7 + $0x6c8] ss:$16 sps:$4 sm:$0xff]  }
 0x568   : > { %5521 = vmatmul.mubr.bf16.vlgmr.msra.gmra.mrb[0].mxu0 %v10252_v63 }
 0x569   : > { %6098 = vmatpush1.bf16.msra.mxu0 %v7842_v23  ;;  %v7796_v23 = vld [vmem:[#allocation7 + $0x60c] ss:$16 sps:$4 sm:$0xff]  }
 0x56a   : > { %6099 = vmatprep.subr.bf16.mxu0 %v7847_v36  ;;  %5622 = vmatpush1.bf16.msra.mxu1 %v7761_v33  ;;  %v7797_v36 = vld [vmem:[#allocation7 + $0x628] ss:$16 sps:$4 sm:$0xff]   ;;  %v7889_v33 = vld [vmem:[#allocation9 + $0xf4] ss:$8 sps:$4 sm:$0xff]  }
 0x56b   : > { %5623 = vmatprep.subr.bf16.mxu1 %v7766_v18  ;;  %v7887_v18 = vld [vmem:[#allocation9 + $0xf0] ss:$8 sps:$4 sm:$0xff]  }
 0x56d   : > { %6100 = vmatpush1.bf16.msra.mxu0 %v7845_v43  ;;  %v7800_v43 = vld [vmem:[#allocation7 + $0x648] ss:$16 sps:$4 sm:$0xff]  }
 0x56e   : > { %6101 = vmatprep.subr.bf16.mxu0 %v7850_v17  ;;  %5624 = vmatpush1.bf16.msra.mxu1 %v7764_v8  ;;  %v7805_v17 = vld [vmem:[#allocation7 + $0x66c] ss:$16 sps:$4 sm:$0xff]  }
 0x56f   : > { %5625 = vmatprep.subr.bf16.mxu1 %v7769_v30  ;;  %v7892_v8 = vld [vmem:[#allocation9 + $0x104] ss:$8 sps:$4 sm:$0xff]   ;;  %v7818_v30 = vld [vmem:[#allocation7 + $0x708] ss:$16 sps:$4 sm:$0xff]  }
 0x571   : > { %6102 = vmatpush1.bf16.msra.mxu0 %v7848_v40  ;;  %v7806_v40 = vld [vmem:[#allocation7 + $0x688] ss:$16 sps:$4 sm:$0xff]  }
 0x572   : > { %6103 = vmatprep.subr.bf16.mxu0 %v7853_v3  ;;  %5626 = vmatpush1.bf16.msra.mxu1 %v7767_v39  ;;  %v7886_v3 = vld [vmem:[#allocation9 + $0xe4] ss:$8 sps:$4 sm:$0xff]  }
 0x573   : > { %5627 = vmatprep.subr.bf16.mxu1 %v7772_v41  ;;  %v7826_v39 = vld [vmem:[#allocation7 + $0x74c] ss:$16 sps:$4 sm:$0xff]   ;;  %v7824_v41 = vld [vmem:[#allocation7 + $0x748] ss:$16 sps:$4 sm:$0xff]  }
 0x575   : > { %6104 = vmatpush1.bf16.msra.mxu0 %v7851_v56  ;;  %v7884_v56 = vld [vmem:[#allocation9 + $0xe0] ss:$8 sps:$4 sm:$0xff]  }
 0x576   : > { %6105 = vmatprep.subr.bf16.mxu0 %v7856_v5  ;;  %5628 = vmatpush1.bf16.msra.mxu1 %v7770_v4  ;;  %v7832_v4 = vld [vmem:[#allocation7 + $0x78c] ss:$16 sps:$4 sm:$0xff]  }
 0x577   : > { %5629 = vmatprep.subr.bf16.mxu1 %v7775_v9  ;;  %v7830_v9 = vld [vmem:[#allocation7 + $0x788] ss:$16 sps:$4 sm:$0xff]  }
 0x579   : > { %6106 = vmatpush1.bf16.msra.mxu0 %v7854_v34 }
 0x57a   : > { %6107 = vmatprep.subr.bf16.mxu0 %v7859_v51  ;;  %5630 = vmatpush1.bf16.msra.mxu1 %v7773_v25  ;;  %v7817_v51 = vld [vmem:[#allocation7 + $0x6ec] ss:$16 sps:$4 sm:$0xff]  }
 0x57b   : > { %5631 = vmatprep.subr.bf16.mxu1 %v7778_v62  ;;  %v7838_v25 = vld [vmem:[#allocation7 + $0x7cc] ss:$16 sps:$4 sm:$0xff]   ;;  %v7836_v62 = vld [vmem:[#allocation7 + $0x7c8] ss:$16 sps:$4 sm:$0xff]  }
 0x57d   : > { %6108 = vmatpush1.bf16.msra.mxu0 %v7857_v16  ;;  %v7815_v16 = vld [vmem:[#allocation7 + $0x6e8] ss:$16 sps:$4 sm:$0xff]  }
 0x57e   : > { %6109 = vmatprep.subr.bf16.mxu0 %v7862_v59  ;;  %5632 = vmatpush1.bf16.msra.mxu1 %v7776_v45  ;;  %v7820_v59 = vld [vmem:[#allocation7 + $0x70c] ss:$16 sps:$4 sm:$0xff]   ;;  %v10263_v45 = vld [vmem:[%s10688_s13] sm:$0xf] }
 0x57f   : > { %5633 = vmatprep.subr.bf16.mxu1 %v7781_v61  ;;  %v5348_v61 = vrot.slane %v10263_v45, %v10682_v54 }
 0x581   : > { %6110 = vmatpush1.bf16.msra.mxu0 %v7860_v55  ;;  %v7823_v55 = vld [vmem:[#allocation7 + $0x72c] ss:$16 sps:$4 sm:$0xff]  }
 0x582   : > { %6111 = vmatprep.subr.bf16.mxu0 %v7865_v35  ;;  %5634 = vmatpush1.bf16.msra.mxu1 %v7779_v49  ;;  %v7821_v35 = vld [vmem:[#allocation7 + $0x728] ss:$16 sps:$4 sm:$0xff]  }
 0x583   : > { %5635 = vmatprep.subr.bf16.mxu1 %v7784_v26 }
 0x585   : > { %6112 = vmatpush1.bf16.msra.mxu0 %v7863_v6  ;;  %v7829_v6 = vld [vmem:[#allocation7 + $0x76c] ss:$16 sps:$4 sm:$0xff]  }
 0x586   : > { %6113 = vmatprep.subr.bf16.mxu0 %v7868_v0  ;;  %5636 = vmatpush1.bf16.msra.mxu1 %v7782_v19  ;;  %v7827_v0 = vld [vmem:[#allocation7 + $0x768] ss:$16 sps:$4 sm:$0xff]  }
 0x587   : > { %5637 = vmatprep.subr.bf16.mxu1 %v7787_v53 }
 0x589   : > { %6114 = vmatpush1.bf16.msra.mxu0 %v7866_v24  ;;  %v7835_v24 = vld [vmem:[#allocation7 + $0x7ac] ss:$16 sps:$4 sm:$0xff]  }
 0x58a   : > { %6115 = vmatprep.subr.bf16.mxu0 %v7871_v47  ;;  %5638 = vmatpush1.bf16.msra.mxu1 %v7785_v13  ;;  %v7833_v47 = vld [vmem:[#allocation7 + $0x7a8] ss:$16 sps:$4 sm:$0xff]  }
 0x58b   : > { %5639 = vmatprep.subr.bf16.mxu1 %v7790_v12  ;;  %v7890_v12 = vld [vmem:[#allocation9 + $0x100] ss:$8 sps:$4 sm:$0xff]  }
 0x58d   : > { %6116 = vmatpush1.bf16.msra.mxu0 %v7869_v14  ;;  %v7841_v14 = vld [vmem:[#allocation7 + $0x7ec] ss:$16 sps:$4 sm:$0xff]  }
 0x58e   : > { %6117 = vmatprep.subr.bf16.mxu0 %v7874_v48  ;;  %5640 = vmatpush1.bf16.msra.mxu1 %v7788_v50  ;;  %v7839_v48 = vld [vmem:[#allocation7 + $0x7e8] ss:$16 sps:$4 sm:$0xff]   ;;  %v7895_v50 = vld [vmem:[#allocation9 + $0x114] ss:$8 sps:$4 sm:$0xff]  }
 0x58f   : > { %5641 = vmatprep.subr.bf16.mxu1 %v7793_v42  ;;  %v7938_v42 = vld [vmem:[%s10689_s24 + $0x40] sm:$0xff]  }
 0x591   : > { %6118 = vmatpush1.bf16.msra.mxu0 %v7872_v11  ;;  %v5352_v11 = vrot.slane %v10263_v45, %v10680_v29 }
 0x592   : > { %6119 = vmatprep.subr.bf16.mxu0 %v7877_v20  ;;  %5642 = vmatpush1.bf16.msra.mxu1 %v7791_v15  ;;  %v7939_v15 = vld [vmem:[%s10689_s24] sm:$0xff]  }
 0x593   : > { %5652 = vmatprep.subr.bf16.mxu1 %v7796_v23  ;;  %v7940_v23 = vld [vmem:[%s10689_s24 + $0x48] sm:$0xff]  }
 0x595   : > { %6120 = vmatpush1.bf16.msra.mxu0 %v7875_v2  ;;  %5644 = vmatmul.mubr.bf16.vlgmr.msra.gmra.mrb[4].mxu1 %v10243_v58  ;;  %v7809_v58 = vld [vmem:[#allocation7 + $0x6a8] ss:$16 sps:$4 sm:$0xff]  }
 0x596   : > { %6121 = vmatprep.subr.bf16.mxu0 %v7880_v38  ;;  %5653 = vmatpush1.bf16.msra.mxu1 %v7794_v57  ;;  %v7893_v57 = vld [vmem:[#allocation9 + $0x110] ss:$8 sps:$4 sm:$0xff]  }
 0x597   : > { %5684 = vmatprep.mubr.bf16.mxu1 %v10245_v27  ;;  %5654 = vmatprep.subr.bf16.mxu1 %v7799_v1  ;;  %v7898_v1 = vld [vmem:[#allocation9 + $0x124] ss:$8 sps:$4 sm:$0xff]  }
 0x599   : > { %6122 = vmatpush1.bf16.msra.mxu0 %v7878_v7 }
 0x59a   : > { %6123 = vmatprep.subr.bf16.mxu0 %v7883_v32  ;;  %5655 = vmatpush1.bf16.msra.mxu1 %v7797_v36  ;;  %v7941_v36 = vld [vmem:[%s10689_s24 + $0x8] sm:$0xff]  }
 0x59b   : > { %5656 = vmatprep.subr.bf16.mxu1 %v7802_v28  ;;  %v7942_v28 = vld [vmem:[%s10689_s24 + $0x50] sm:$0xff]  }
 0x59d   : > { %6124 = vmatpush1.bf16.msra.mxu0 %v7881_v37 }
 0x59e   : > { %5657 = vmatpush1.bf16.msra.mxu1 %v7800_v43  ;;  %6125 = vmatprep.subr.bf16.mxu0 %v7886_v3  ;;  %v7896_v43 = vld [vmem:[#allocation9 + $0x120] ss:$8 sps:$4 sm:$0xff]  }
 0x59f   : > { %5658 = vmatprep.subr.bf16.mxu1 %v7805_v17  ;;  %v7901_v17 = vld [vmem:[#allocation9 + $0x134] ss:$8 sps:$4 sm:$0xff]   ;;  %v7902_v3 = vld [vmem:[#allocation9 + $0x140] ss:$8 sps:$4 sm:$0xff]  }
 0x5a1   : > { %6126 = vmatpush1.bf16.msra.mxu0 %v7884_v56  ;;  %v7947_v56 = vld [vmem:[%s10689_s24 + $0x20] sm:$0xff]  }
 0x5a2   : > { %5659 = vmatpush1.bf16.msra.mxu1 %v7803_v46  ;;  %6127 = vmatprep.subr.bf16.mxu0 %v7889_v33  ;;  %v7943_v46 = vld [vmem:[%s10689_s24 + $0x10] sm:$0xff]  }
 0x5a3   : > { %5660 = vmatprep.subr.bf16.mxu1 %v7808_v21  ;;  %v7944_v21 = vld [vmem:[%s10689_s24 + $0x58] sm:$0xff]   ;;  %v7913_v33 = vld [vmem:[#allocation9 + $0x174] ss:$8 sps:$4 sm:$0xff]  }
 0x5a5   : > { %6128 = vmatpush1.bf16.msra.mxu0 %v7887_v18  ;;  %v7911_v18 = vld [vmem:[#allocation9 + $0x170] ss:$8 sps:$4 sm:$0xff]  }
 0x5a6   : > { %5661 = vmatpush1.bf16.msra.mxu1 %v7806_v40  ;;  %6138 = vmatprep.subr.bf16.mxu0 %v7892_v8  ;;  %v7899_v40 = vld [vmem:[#allocation9 + $0x130] ss:$8 sps:$4 sm:$0xff]   ;;  %v7919_v8 = vld [vmem:[#allocation9 + $0x194] ss:$8 sps:$4 sm:$0xff]  }
 0x5a7   : > { %5662 = vmatprep.subr.bf16.mxu1 %v7811_v44  ;;  %v7904_v44 = vld [vmem:[#allocation9 + $0x144] ss:$8 sps:$4 sm:$0xff]  }
 0x5a8   : > { %v5399_v27 = vpop.f32.mrb[0].mxu1 }
 0x5a9   : > { %v5401_v5 = vpop.f32.mrb[1].mxu1  ;;  %v5400_v20 = vadd.f32 %v5399_v27, %v5348_v61  ;;  %v7907_v27 = vld [vmem:[#allocation9 + $0x154] ss:$8 sps:$4 sm:$0xff]  }
 0x5aa   : > { %v5403_v31 = vpop.f32.mrb[2].mxu1  ;;  %5663 = vmatpush1.bf16.msra.mxu1 %v7809_v58  ;;  %v5402_v49 = vadd.f32 %v5401_v5, %v5352_v11  ;;  %v7945_v58 = vld [vmem:[%s10689_s24 + $0x18] sm:$0xff]   ;;  %v7948_v5 = vld [vmem:[%s10689_s24 + $0x68] sm:$0xff]  }
 0x5ab   : > { %v5404_v34 = vpop.f32.mrb[3].mxu1  ;;  %5664 = vmatprep.subr.bf16.mxu1 %v7814_v52  ;;  %v7946_v52 = vld [vmem:[%s10689_s24 + $0x60] sm:$0xff]   ;;  %v7905_v31 = vld [vmem:[#allocation9 + $0x150] ss:$8 sps:$4 sm:$0xff]  }
 0x5ac   : > { %v7949_v34 = vld [vmem:[%s10689_s24 + $0x28] sm:$0xff]  }
 0x5ae   : > { %5665 = vmatpush1.bf16.msra.mxu1 %v7812_v10  ;;  %v7910_v10 = vld [vmem:[#allocation9 + $0x164] ss:$8 sps:$4 sm:$0xff]  }
 0x5af   : > { %5666 = vmatprep.subr.bf16.mxu1 %v7817_v51  ;;  %v7908_v51 = vld [vmem:[#allocation9 + $0x160] ss:$8 sps:$4 sm:$0xff]  }
 0x5b2   : > { %5667 = vmatpush1.bf16.msra.mxu1 %v7815_v16  ;;  %v7916_v16 = vld [vmem:[#allocation9 + $0x184] ss:$8 sps:$4 sm:$0xff]  }
 0x5b3   : > { %5668 = vmatprep.subr.bf16.mxu1 %v7820_v59  ;;  %v7914_v59 = vld [vmem:[#allocation9 + $0x180] ss:$8 sps:$4 sm:$0xff]  }
 0x5b6   : > { %5669 = vmatpush1.bf16.msra.mxu1 %v7818_v30  ;;  %v7917_v30 = vld [vmem:[#allocation9 + $0x190] ss:$8 sps:$4 sm:$0xff]  }
 0x5b7   : > { %5670 = vmatprep.subr.bf16.mxu1 %v7823_v55  ;;  %v7922_v55 = vld [vmem:[#allocation9 + $0x1a4] ss:$8 sps:$4 sm:$0xff]  }
 0x5ba   : > { %5671 = vmatpush1.bf16.msra.mxu1 %v7821_v35  ;;  %v7920_v35 = vld [vmem:[#allocation9 + $0x1a0] ss:$8 sps:$4 sm:$0xff]  }
 0x5bb   : > { %5672 = vmatprep.subr.bf16.mxu1 %v7826_v39  ;;  %v7925_v39 = vld [vmem:[#allocation9 + $0x1b4] ss:$8 sps:$4 sm:$0xff]  }
 0x5be   : > { %5673 = vmatpush1.bf16.msra.mxu1 %v7824_v41  ;;  %v7923_v41 = vld [vmem:[#allocation9 + $0x1b0] ss:$8 sps:$4 sm:$0xff]  }
 0x5bf   : > { %5674 = vmatprep.subr.bf16.mxu1 %v7829_v6  ;;  %v7928_v6 = vld [vmem:[#allocation9 + $0x1c4] ss:$8 sps:$4 sm:$0xff]  }
 0x5c2   : > { %5675 = vmatpush1.bf16.msra.mxu1 %v7827_v0  ;;  %v7926_v0 = vld [vmem:[#allocation9 + $0x1c0] ss:$8 sps:$4 sm:$0xff]  }
 0x5c3   : > { %5676 = vmatprep.subr.bf16.mxu1 %v7832_v4  ;;  %v7931_v4 = vld [vmem:[#allocation9 + $0x1d4] ss:$8 sps:$4 sm:$0xff]  }
 0x5c6   : > { %5677 = vmatpush1.bf16.msra.mxu1 %v7830_v9  ;;  %v7929_v9 = vld [vmem:[#allocation9 + $0x1d0] ss:$8 sps:$4 sm:$0xff]  }
 0x5c7   : > { %5678 = vmatprep.subr.bf16.mxu1 %v7835_v24  ;;  %v7934_v24 = vld [vmem:[#allocation9 + $0x1e4] ss:$8 sps:$4 sm:$0xff]  }
 0x5ca   : > { %5679 = vmatpush1.bf16.msra.mxu1 %v7833_v47  ;;  %v7932_v47 = vld [vmem:[#allocation9 + $0x1e0] ss:$8 sps:$4 sm:$0xff]  }
 0x5cb   : > { %5680 = vmatprep.subr.bf16.mxu1 %v7838_v25  ;;  %v7937_v25 = vld [vmem:[#allocation9 + $0x1f4] ss:$8 sps:$4 sm:$0xff]  }
 0x5ce   : > { %5681 = vmatpush1.bf16.msra.mxu1 %v7836_v62  ;;  %v7935_v62 = vld [vmem:[#allocation9 + $0x1f0] ss:$8 sps:$4 sm:$0xff]  }
 0x5cf   : > { %5682 = vmatprep.subr.bf16.mxu1 %v7841_v14  ;;  %v5356_v14 = vrot.slane %v10263_v45, %v10683_v22  ;;  %v7952_v22 = vld [vmem:[%s10689_s24 + $0x78] sm:$0xff]  }
 0x5d2   : > { %5683 = vmatpush1.bf16.msra.mxu1 %v7839_v48  ;;  %v5360_v48 = vrot.slane %v10263_v45, %v10681_v60  ;;  %v7951_v60 = vld [vmem:[%s10689_s24 + $0x30] sm:$0xff]   ;;  %v7953_v45 = vld [vmem:[%s10689_s24 + $0x38] sm:$0xff]  }
 0x5d3   : > { %7056 = vmatprep.subr.bf16.mxu1 %v7938_v42 }
 0x5d5   : > { %5685 = vmatmul.mubr.bf16.vlgmr.msra.gmra.mrb[4].mxu1 %v10252_v63 }
 0x5d6   : > { %7057 = vmatpush3.bf16.msra.mxu1 %v7939_v15 }
 0x5d7   : > { %7058 = vmatprep.subr.bf16.mxu1 %v7940_v23 }
 0x5da   : > { %7059 = vmatpush3.bf16.msra.mxu1 %v7941_v36 }
 0x5db   : > { %7060 = vmatprep.subr.bf16.mxu1 %v7942_v28 }
 0x5de   : > { %7061 = vmatpush3.bf16.msra.mxu1 %v7943_v46 }
 0x5df   : > { %7062 = vmatprep.subr.bf16.mxu1 %v7944_v21 }
 0x5e2   : > { %7063 = vmatpush3.bf16.msra.mxu1 %v7945_v58 }
 0x5e3   : > { %7064 = vmatprep.subr.bf16.mxu1 %v7946_v52 }
 0x5e6   : > { %7065 = vmatpush3.bf16.msra.mxu1 %v7947_v56 }
 0x5e7   : > { %7066 = vmatprep.subr.bf16.mxu1 %v7948_v5 }
 0x5ea   : > { %7067 = vmatpush3.bf16.msra.mxu1 %v7949_v34 }
 0x63b   : > { %v5522_v26 = vpop.f32.mrb[0].mxu0 }
 0x63c   : > { %v7271_v2 = vadd.f32 %v5522_v26, %v5400_v20  ;;  %v5524_v38 = vpop.f32.mrb[1].mxu0 }
 0x63d   : > { %v7273_v19 = vadd.f32 %v5524_v38, %v5402_v49  ;;  %v5526_v53 = vpop.f32.mrb[2].mxu0 }
 0x63e   : > { %v5693_v7 = vmax.f32 %v7271_v2, 0.0  ;;  %v5527_v63 = vpop.f32.mrb[3].mxu0 }
 0x63f   : > { %v5694_v32 = vmax.f32 %v7273_v19, 0.0  ;;  %v7950_v63 = vld [vmem:[%s10689_s24 + $0x70] sm:$0xff]  }
 0x640   : > { %v5697_v37 = vpack.c.bf16 %v5693_v7, %v5693_v7  ;;  %7068 = vmatprep.subr.bf16.mxu1 %v7950_v63 }
 0x641   : > { %v5698_v13 = vpack.c.bf16 %v5694_v32, %v5694_v32  ;;  %7069 = vmatpush3.bf16.msra.mxu1 %v7951_v60  ;;  %v5765_v32 = vld [vmem:[%s10690_s6] sm:$0x3] }
 0x642   : > { %7070 = vmatprep.subr.bf16.mxu1 %v7952_v22 }
 0x643   : > { %6129 = vmatprep.mubr.bf16.mxu0 %v5698_v13  ;;  %v6090_v13 = vrot.slane %v5765_v32, %v10682_v54  ;;  %v6215_v54 = vld [vmem:[%s10691_s4] sm:$0x1] }
 0x644   : > { %6130 = vmatmul.mubr.bf16.vlgmr.msra.gmra.mrb[4].mxu0 %v5697_v37 }
 0x645   : > { %6139 = vmatpush1.bf16.msra.mxu0 %v7890_v12  ;;  %7071 = vmatpush3.bf16.msra.mxu1 %v7953_v45  ;;  %v6094_v12 = vrot.slane %v5765_v32, %v10680_v29 }
 0x646   : > { %6140 = vmatprep.subr.bf16.mxu0 %v7895_v50 }
 0x649   : > { %6141 = vmatpush1.bf16.msra.mxu0 %v7893_v57 }
 0x64a   : > { %6142 = vmatprep.subr.bf16.mxu0 %v7898_v1 }
 0x64d   : > { %6143 = vmatpush1.bf16.msra.mxu0 %v7896_v43 }
 0x64e   : > { %6144 = vmatprep.subr.bf16.mxu0 %v7901_v17 }
 0x651   : > { %6145 = vmatpush1.bf16.msra.mxu0 %v7899_v40 }
 0x652   : > { %6146 = vmatprep.subr.bf16.mxu0 %v7904_v44 }
 0x655   : > { %6147 = vmatpush1.bf16.msra.mxu0 %v7902_v3 }
 0x656   : > { %6148 = vmatprep.subr.bf16.mxu0 %v7907_v27 }
 0x659   : > { %6149 = vmatpush1.bf16.msra.mxu0 %v7905_v31 }
 0x65a   : > { %6150 = vmatprep.subr.bf16.mxu0 %v7910_v10 }
 0x65d   : > { %6151 = vmatpush1.bf16.msra.mxu0 %v7908_v51 }
 0x65e   : > { %6152 = vmatprep.subr.bf16.mxu0 %v7913_v33 }
 0x661   : > { %6153 = vmatpush1.bf16.msra.mxu0 %v7911_v18 }
 0x662   : > { %6154 = vmatprep.subr.bf16.mxu0 %v7916_v16 }
 0x665   : > { %6155 = vmatpush1.bf16.msra.mxu0 %v7914_v59 }
 0x666   : > { %6156 = vmatprep.subr.bf16.mxu0 %v7919_v8 }
 0x669   : > { %6157 = vmatpush1.bf16.msra.mxu0 %v7917_v30 }
 0x66a   : > { %6158 = vmatprep.subr.bf16.mxu0 %v7922_v55 }
 0x66d   : > { %6159 = vmatpush1.bf16.msra.mxu0 %v7920_v35 }
 0x66e   : > { %6160 = vmatprep.subr.bf16.mxu0 %v7925_v39 }
 0x671   : > { %6161 = vmatpush1.bf16.msra.mxu0 %v7923_v41 }
 0x672   : > { %6162 = vmatprep.subr.bf16.mxu0 %v7928_v6 }
 0x675   : > { %6163 = vmatpush1.bf16.msra.mxu0 %v7926_v0 }
 0x676   : > { %6164 = vmatprep.subr.bf16.mxu0 %v7931_v4 }
 0x679   : > { %6165 = vmatpush1.bf16.msra.mxu0 %v7929_v9 }
 0x67a   : > { %6166 = vmatprep.subr.bf16.mxu0 %v7934_v24 }
 0x67d   : > { %6167 = vmatpush1.bf16.msra.mxu0 %v7932_v47 }
 0x67e   : > { %6168 = vmatprep.subr.bf16.mxu0 %v7937_v25 }
 0x681   : > { %6169 = vmatpush1.bf16.msra.mxu0 %v7935_v62 }
 0x6a8   : > { %v5686_v61 = vpop.f32.mrb[4].mxu1 }
 0x6a9   : > { %v7274_v11 = vadd.f32 %v5686_v61, %v5356_v14  ;;  %v5688_v20 = vpop.f32.mrb[5].mxu1 }
 0x6aa   : > { %v7275_v49 = vadd.f32 %v5688_v20, %v5360_v48  ;;  %v5690_v26 = vpop.f32.mrb[6].mxu1 }
 0x6ab   : > { %v5695_v2 = vmax.f32 %v7274_v11, 0.0  ;;  %v5691_v38 = vpop.f32.mrb[7].mxu1 }
 0x6ac   : > { %v5696_v19 = vmax.f32 %v7275_v49, 0.0 }
 0x6ad   : > { %v5699_v7 = vpack.c.bf16 %v5695_v2, %v5695_v2 }
 0x6ae   : > { %v5700_v53 = vpack.c.bf16 %v5696_v19, %v5696_v19 }
 0x6b0   : > { %6170 = vmatprep.mubr.bf16.mxu0 %v5700_v53 }
 0x6b1   : > { %6171 = vmatmul.mubr.bf16.vlgmr.msra.gmra.mrb[4].mxu0 %v5699_v7 }
 0x784   : > { %v6172_v37 = vpop.f32.mrb[4].mxu0 }
 0x785   : > { %v7276_v50 = vadd.f32 %v6172_v37, %v6090_v13  ;;  %v6174_v42 = vpop.f32.mrb[5].mxu0 }
 0x786   : > { %v7277_v15 = vadd.f32 %v6174_v42, %v6094_v12  ;;  %v6176_v23 = vpop.f32.mrb[6].mxu0 }
 0x787   : > { %v6179_v57 = vmax.f32 %v7276_v50, 0.0  ;;  %v6177_v1 = vpop.f32.mrb[7].mxu0 }
 0x788   : > { %v6180_v36 = vmax.f32 %v7277_v15, 0.0 }
 0x789   : > { %v6181_v43 = vpack.c.bf16 %v6179_v57, %v6179_v57 }
 0x78a   : > { %v6182_v28 = vpack.c.bf16 %v6180_v36, %v6180_v36 }
 0x78c   : > { %6344 = vmatprep.mubr.bf16.mxu1 %v6182_v28 }
 0x78d   : > { %6345 = vmatmul.mubr.bf16.vlgmr.msra.gmra.mrb[8].mxu1 %v6181_v43 }
 0x860   : > { %v7072_v17 = vpop.f32.mrb[8].mxu1 }
 0x861   : > { %v7073_v46 = vpop.f32.mrb[9].mxu1 }
 0x862   : > { %v7074_v29 = vadd.f32 %v7073_v46, %v7072_v17  ;;  %v7075_v21 = vpop.f32.mrb[10].mxu1 }
 0x863   : > { %v7076_v40 = vpop.f32.mrb[11].mxu1 }
 0x864   : > { %v6347_v44 = vadd.f32 %v7074_v29, %v6215_v54 }
 0x866   : > { %6352 = vst [vmem:[%s8437_s23] sm:$0x1] %v6347_v44 }
 0x867 PF: > { %s10692_s20 = sld [smem:[#allocation16_spill]]  ;;  %s10693_s12 = sld [smem:[#allocation19_spill]] }
 0x868   : > { %s10694_s27 = sld [smem:[#allocation101_spill]]  ;;  %s6366_s14 = sshll.u32 %s8437_s23, 4  ;;  %s6367_s14 = int_to_ptr.vmem [resolvable:$true] %s6366_s14 }
 0x869   : > { %s6354_s28 = scalar_lea.sflag [#allocation6], %s538_s19  ;;  %s8039_s3 = scalar_lea.vmem %s6367_s14, 16 }
 0x86a   : > { %p8040_p2 = scmp.ne.s32.totalorder %s6367_s14, %s8039_s3  ;;  %s8173_s6 = smov [#allocation10]  }
 0x86b   : > { %s8043_s10 = sshll.u32 %s8173_s6, 4  ;;  %s8044_s10 = int_to_ptr.vmem [resolvable:$false] %s8043_s10 }
 0x86c   : > { %s8045_s2 = scalar_lea.vmem %s8044_s10, 32  ;;  %p8046_p11 = scmp.lt.s32.totalorder %s6367_s14, %s8044_s10 }
 0x86d   : > { %s6957_s25 = sshll.u32 %s10692_s20, 4  ;;  %p10696_p6 = scmp.ne.s32.totalorder %s10693_s12, 0 }
 0x86e   : > { %s10695_s13 = smov %s10694_s27  ;;  %s10334_s22 = scalar_lea.hbm %s10694_s27, %s6957_s25 }
 0x86f   : > { %p8041_p9 = pnand %p8040_p2, %p10696_p6  ;;  %p8047_p13 = scmp.lt.s32.totalorder %s8045_s2, %s8039_s3 }
 0x871   : > { %p8042_p10 = pneg %p8041_p9  ;;  %p8048_p0 = por %p8047_p13, %p8046_p11 }
 0x873   : > { %p8049_p4 = pnand %p8048_p0, %p8042_p10 }
 0x875   : > { %8052 = shalt.err (!%p8049_p4)
}
 0x876   : > { %s8053_s19 = scalar_lea.hbm %s10334_s22, 16  ;;  %s8057_s20 = scalar_lea.hbm %s10695_s13, 32 }
 0x877   : > { %p8054_p3 = scmp.ne.s32.totalorder %s10334_s22, %s8053_s19  ;;  %p8058_p8 = scmp.lt.u32.totalorder %s10334_s22, %s10695_s13 }
 0x878   : > { %p8059_p12 = scmp.lt.u32.totalorder %s8057_s20, %s8053_s19  ;;  %p8061_p2 = scmp.lt.u32.totalorder %s8053_s19, %s10334_s22 }
 0x879   : > { %p8055_p7 = pnand %p8054_p3, %p10696_p6 }
 0x87a   : > { %p8060_p1 = por %p8059_p12, %p8058_p8 }
 0x87b   : > { %p8056_p5 = pneg %p8055_p7 }
 0x87c   : > { %p8062_p9 = por %p8061_p2, %p8060_p1 }
 0x87e   : > { %p8063_p10 = pnand %p8062_p9, %p8056_p5 }
 0x880   : > { %8066 = shalt.err (!%p8063_p10)
}
 0x881   : > { %7317 = dma.vmem_to_hbm [thread:$0]  (%p10696_p6), %s6367_s14, 16, %s10334_s22, %s6354_s28  }
 0x882 PF: > { %s10697_s30 = sld [smem:[#allocation14_spill]]  ;;  %s10698_s27 = sld [smem:[#allocation20_spill]] }
 0x883   : > { %p7339_p11 = scmp.ge.s32.totalorder %s8157_s17, 2 }
 0x888   : > { %s6378_s3 = sand.u32 1, %s10697_s30   ;;  %p10699_p13 = scmp.ne.s32.totalorder %s10698_s27, 0 }
 0x889   : > { %s6379_s6 = scalar_lea.sflag [#allocation6], %s6378_s3 }
 0x88a   : > { %p7330_p0 = pnand %p7339_p11, %p10699_p13 }
 0x88c   : > { %8116 = dma.done.wait (!%p7330_p0), %s6379_s6, 16  }
 0x88d   : > { %8118 = vsyncadd (!%p7330_p0), %s6379_s6, 4294967280  ;;  %s28_s17 = sadd.s32 1, %s8157_s17   ;;  %s10700_s10 = sld [smem:[#allocation15_spill]] }
 0x88e   : > { %p25_p4 = scmp.ge.s32.totalorder %s28_s17, 6   ;;  %s10701_s27 = sld [smem:[#allocation21_spill]] }
 0x88f   : > { %s10702_s12 = sld [smem:[#allocation22_spill]]  ;;  %s10703_s22 = sld [smem:[#allocation17_spill]] }
 0x890   : > { %s10704_s2 = sld [smem:[#allocation18_spill]]  ;;  %s10705_s25 = smov %s8125_s26 }
 0x891   : > { %s10707_s28 = smov %s8137_s29  ;;  %s10709_s30 = smov %s8149_s15 }
 0x892   : > { %s10710_s14 = smov %s8153_s16  ;;  %27 = sbr.rel (!%p25_p4) target bundleno = 18 (0x12), region = 171 }
 0x893   : > { %s10706_s26 = smov %s10700_s10 }
 0x895   : > { %s10708_s29 = smov %s10702_s12  ;;  %s10711_s15 = smov %s10703_s22 }
 0x896   : > { %s10712_s16 = smov %s10704_s2 }
 0x899   :  { %6383 = vsyncpa [#allocation5], 1 }
 0x89a   :  { %6385 = vsyncpa [#allocation5 + $0x1], 1 }
 0x89b   :  { %6386 = vsyncpa [#allocation8], 1 }
 0x89c   :  { %6387 = vsyncpa [#allocation6], 1 }
 0x89d   :  { %6389 = vsyncpa [#allocation6 + $0x1], 1 }

</bundles_post_ra>
